<compile_context>
chip_gen: v7x
topology: tpu7x:2x2x1
jax: 0.10.0
libtpu: 0.0.40
codegen_flags: <defaults>
</compile_context>

<pallas_src>
import jax
import jax.numpy as jnp
from jax import lax
from jax.experimental import pallas as pl
from jax.experimental.pallas import tpu as pltpu

CP = 128  # lane-aligned (padded) channel count


def _tiny_hidden_kernel(x_ref, w1_ref, w2_ref, w3_ref, b3_ref, o_ref,
                        xp_ref, col_ref):
    """Fused TinyHidden forward for ONE batch element (one grid step).

    x_ref   : (1, H, W, CP)   padded input tile, NHWC, f32
    w1_ref  : (9*CP, CP)      block conv1 weights, im2col (ky,kx,ci)-major
    w2_ref  : (9*CP, CP)      block conv2 weights
    w3_ref  : (9*CP, CP)      head conv weights (Cout zero-padded to CP)
    b3_ref  : (1, CP)         head bias (zero-padded)
    o_ref   : (1, H*W, CP)    output rows (row = y*W + x) for this element
    xp_ref  : (H+2, Wp, CP)   VMEM scratch: zero-halo padded activation
    col_ref : (H*W, 9*CP)     VMEM scratch: im2col matrix
    """
    _, H, W, C = x_ref.shape
    rows = H * W
    Wp = xp_ref.shape[1]

    # Zero only the 1-pixel halo (borders stay zero across all three layers).
    # Re-done every step so each grid step is self-contained under "parallel"
    # megacore partitioning (each core has its own scratch).
    zr = jnp.zeros((1, Wp, C), jnp.float32)
    xp_ref[0:1, :, :] = zr
    xp_ref[H + 1:H + 2, :, :] = zr
    zc = jnp.zeros((H + 2, 1, C), jnp.float32)
    xp_ref[:, 0:1, :] = zc
    xp_ref[:, W + 1:W + 2, :] = zc

    def conv3x3(w_ref):
        # im2col: 9 lane-aligned (rows, C) stores, then ONE MXU matmul.
        for ky in range(3):                      # statically unrolled
            for kx in range(3):
                tap = ky * 3 + kx
                col_ref[:, tap * C:(tap + 1) * C] = (
                    xp_ref[ky:ky + H, kx:kx + W, :].reshape(rows, C))
        return jnp.dot(col_ref[...], w_ref[...],
                       preferred_element_type=jnp.float32)

    x = x_ref[0]                                 # (H, W, C) residual source
    x_rows = x.reshape(rows, C)

    # block1.conv1 -> relu
    xp_ref[1:H + 1, 1:W + 1, :] = x
    h = jnp.maximum(conv3x3(w1_ref), 0.0)

    # block1.conv2 + residual -> relu
    xp_ref[1:H + 1, 1:W + 1, :] = h.reshape(H, W, C)
    h = jnp.maximum(conv3x3(w2_ref) + x_rows, 0.0)

    # head conv + bias -> tanh
    xp_ref[1:H + 1, 1:W + 1, :] = h.reshape(H, W, C)
    y = jnp.tanh(conv3x3(w3_ref) + b3_ref[...])
    o_ref[0] = y.astype(o_ref.dtype)


def tiny_hidden_forward(x_nchw, params):
    """Forward pass matching TinyHidden.forward (NCHW in/out, float32)."""
    x = jnp.transpose(x_nchw, (0, 2, 3, 1)).astype(jnp.float32)  # NCHW->NHWC
    N, H, W, Cin = x.shape
    Cout = params["head_w"].shape[3]
    assert Cin <= CP and Cout <= CP

    # Lane-align the channel axis: zero-pad Cin (and head Cout) to 128.
    xpad = jnp.pad(x, ((0, 0), (0, 0), (0, 0), (0, CP - Cin)))

    def fold(w):  # (3,3,ci,co) HWIO -> zero-pad to (3,3,CP,CP) -> (9*CP, CP)
        ci, co = w.shape[2], w.shape[3]
        wp = jnp.pad(w, ((0, 0), (0, 0), (0, CP - ci), (0, CP - co)))
        return wp.reshape(9 * CP, CP)

    w1 = fold(params["blk_w1"])
    w2 = fold(params["blk_w2"])
    w3 = fold(params["head_w"])
    b3 = jnp.pad(params["head_b"], ((0, 0), (0, CP - Cout)))

    wp_halo = max(8, -(-(W + 2) // 8) * 8)       # sublane-round W+2 up to 8

    out = pl.pallas_call(
        _tiny_hidden_kernel,
        out_shape=jax.ShapeDtypeStruct((N, H * W, CP), jnp.float32),
        grid=(N,),
        in_specs=[
            pl.BlockSpec((1, H, W, CP), lambda n: (n, 0, 0, 0)),
            pl.BlockSpec((9 * CP, CP), lambda n: (0, 0)),
            pl.BlockSpec((9 * CP, CP), lambda n: (0, 0)),
            pl.BlockSpec((9 * CP, CP), lambda n: (0, 0)),
            pl.BlockSpec((1, CP), lambda n: (0, 0)),
        ],
        out_specs=pl.BlockSpec((1, H * W, CP), lambda n: (n, 0, 0)),
        scratch_shapes=[
            pltpu.VMEM((H + 2, wp_halo, CP), jnp.float32),
            pltpu.VMEM((H * W, 9 * CP), jnp.float32),
        ],
        compiler_params=pltpu.CompilerParams(
            dimension_semantics=("parallel",)),
    )(xpad, w1, w2, w3, b3)

    out = out[:, :, :Cout].reshape(N, H, W, Cout)
    return jnp.transpose(out, (0, 3, 1, 2))      # NHWC -> NCHW


def init_params(key):
    """Deterministic parameter init (shapes from TinyHidden.__init__)."""
    c_blk, c_out = 65, 64
    k1, k2, k3, k4 = jax.random.split(key, 4)

    def conv_w(k, cin, cout):
        bound = 1.0 / jnp.sqrt(cin * 9.0)
        return jax.random.uniform(k, (3, 3, cin, cout), jnp.float32,
                                  -bound, bound)        # HWIO

    return {
        "blk_w1": conv_w(k1, c_blk, c_blk),             # conv1, no bias
        "blk_w2": conv_w(k2, c_blk, c_blk),             # conv2, no bias
        "head_w": conv_w(k3, c_blk, c_out),             # head conv (65->64)
        "head_b": (1.0 / jnp.sqrt(c_blk * 9.0))
                  * jax.random.uniform(k4, (1, c_out), jnp.float32, -1.0, 1.0),
    }


def _reference_forward(x_nchw, params):
    """Pure-JAX reference using lax.conv (NCHW) for a correctness check."""
    def conv(x, w_hwio, b=None):
        w = jnp.transpose(w_hwio, (3, 2, 0, 1))         # HWIO -> OIHW
        y = lax.conv_general_dilated(x, w, (1, 1), "SAME",
                                     dimension_numbers=("NCHW", "OIHW", "NCHW"))
        if b is not None:
            y = y + b.reshape(1, -1, 1, 1)
        return y

    x = x_nchw.astype(jnp.float32)
    h = jax.nn.relu(conv(x, params["blk_w1"]))
    h = jax.nn.relu(conv(h, params["blk_w2"]) + x)
    return jnp.tanh(conv(h, params["head_w"], params["head_b"]))


if __name__ == "__main__":
    key = jax.random.PRNGKey(0)
    kx, kp = jax.random.split(key)

    # Small input consistent with the module: batch=2, channels=65, spatial=8x8.
    x = jax.random.normal(kx, (2, 65, 8, 8), jnp.float32)
    params = init_params(kp)

    out = jax.block_until_ready(tiny_hidden_forward(x, params))
    assert out.shape == (2, 64, 8, 8), out.shape

    ref = jax.block_until_ready(_reference_forward(x, params))
    assert jnp.allclose(out, ref, atol=1e-3, rtol=1e-3), \
        float(jnp.max(jnp.abs(out - ref)))

    print("KERNEL_OK")
</pallas_src>

<mosaic_0001>
module attributes {stable_mosaic.version = 11 : i64} {
  func.func @_tiny_hidden_kernel(%arg0: i32, %arg1: memref<1x8x8x128xf32, #tpu.memory_space<vmem>>, %arg2: memref<1152x128xf32, #tpu.memory_space<vmem>>, %arg3: memref<1152x128xf32, #tpu.memory_space<vmem>>, %arg4: memref<1152x128xf32, #tpu.memory_space<vmem>>, %arg5: memref<1x128xf32, #tpu.memory_space<vmem>>, %arg6: memref<1x64x128xf32, #tpu.memory_space<vmem>>, %arg7: memref<10x16x128xf32, #tpu.memory_space<vmem>>, %arg8: memref<64x1152xf32, #tpu.memory_space<vmem>>) attributes {dimension_semantics = [#tpu.dimension_semantics<parallel>], iteration_bounds = array<i64: 2>, scalar_prefetch = 0 : i64, scratch_operands = 2 : i64, tpu.core_type = #tpu.core_type<tc>, window_params = [{transform_indices = @transform_0, window_bounds = array<i64: 1, 8, 8, 128>}, {pipeline_mode = #tpu.pipeline_mode<synchronous>, transform_indices = @transform_1, window_bounds = array<i64: 1152, 128>}, {pipeline_mode = #tpu.pipeline_mode<synchronous>, transform_indices = @transform_2, window_bounds = array<i64: 1152, 128>}, {pipeline_mode = #tpu.pipeline_mode<synchronous>, transform_indices = @transform_3, window_bounds = array<i64: 1152, 128>}, {pipeline_mode = #tpu.pipeline_mode<synchronous>, transform_indices = @transform_4, window_bounds = array<i64: 1, 128>}, {transform_indices = @transform_5, window_bounds = array<i64: 1, 64, 128>}]} {
    %cst = arith.constant 0.000000e+00 : f32
    %0 = vector.broadcast %cst : f32 to vector<1x16x128xf32>
    %c0 = arith.constant 0 : index
    %c0_0 = arith.constant 0 : index
    %c0_1 = arith.constant 0 : index
    %1 = vector.load %arg7[%c0, %c0_0, %c0_1] : memref<10x16x128xf32, #tpu.memory_space<vmem>>, vector<1x16x128xf32>
    tpu.vector_store %arg7[%c0, %c0_0, %c0_1], %0 {strides = array<i32>} : memref<10x16x128xf32, #tpu.memory_space<vmem>>, vector<1x16x128xf32>,
    %c9 = arith.constant 9 : index
    %c0_2 = arith.constant 0 : index
    %c0_3 = arith.constant 0 : index
    %2 = vector.load %arg7[%c9, %c0_2, %c0_3] : memref<10x16x128xf32, #tpu.memory_space<vmem>>, vector<1x16x128xf32>
    tpu.vector_store %arg7[%c9, %c0_2, %c0_3], %0 {strides = array<i32>} : memref<10x16x128xf32, #tpu.memory_space<vmem>>, vector<1x16x128xf32>,
    %cst_4 = arith.constant 0.000000e+00 : f32
    %3 = vector.broadcast %cst_4 : f32 to vector<10x1x128xf32>
    %c0_5 = arith.constant 0 : index
    %c0_6 = arith.constant 0 : index
    %c0_7 = arith.constant 0 : index
    %4 = vector.load %arg7[%c0_5, %c0_6, %c0_7] : memref<10x16x128xf32, #tpu.memory_space<vmem>>, vector<10x1x128xf32>
    tpu.vector_store %arg7[%c0_5, %c0_6, %c0_7], %3 {strides = array<i32>} : memref<10x16x128xf32, #tpu.memory_space<vmem>>, vector<10x1x128xf32>,
    %c0_8 = arith.constant 0 : index
    %c9_9 = arith.constant 9 : index
    %c0_10 = arith.constant 0 : index
    %5 = vector.load %arg7[%c0_8, %c9_9, %c0_10] : memref<10x16x128xf32, #tpu.memory_space<vmem>>, vector<10x1x128xf32>
    tpu.vector_store %arg7[%c0_8, %c9_9, %c0_10], %3 {strides = array<i32>} : memref<10x16x128xf32, #tpu.memory_space<vmem>>, vector<10x1x128xf32>,
    %c0_11 = arith.constant 0 : index
    %c0_12 = arith.constant 0 : index
    %c0_13 = arith.constant 0 : index
    %c0_14 = arith.constant 0 : index
    %6 = vector.load %arg1[%c0_11, %c0_12, %c0_13, %c0_14] : memref<1x8x8x128xf32, #tpu.memory_space<vmem>>, vector<1x8x8x128xf32>
    %7 = vector.shape_cast %6 : vector<1x8x8x128xf32> to vector<8x8x128xf32>
    %8 = vector.shape_cast %7 : vector<8x8x128xf32> to vector<64x128xf32>
    %c1 = arith.constant 1 : index
    %c1_15 = arith.constant 1 : index
    %c0_16 = arith.constant 0 : index
    %9 = vector.load %arg7[%c1, %c1_15, %c0_16] : memref<10x16x128xf32, #tpu.memory_space<vmem>>, vector<8x8x128xf32>
    tpu.vector_store %arg7[%c1, %c1_15, %c0_16], %7 {strides = array<i32>} : memref<10x16x128xf32, #tpu.memory_space<vmem>>, vector<8x8x128xf32>,
    %c0_17 = arith.constant 0 : index
    %c0_18 = arith.constant 0 : index
    %c0_19 = arith.constant 0 : index
    %10 = vector.load %arg7[%c0_17, %c0_18, %c0_19] : memref<10x16x128xf32, #tpu.memory_space<vmem>>, vector<8x8x128xf32>
    %11 = vector.shape_cast %10 : vector<8x8x128xf32> to vector<64x128xf32>
    %c0_20 = arith.constant 0 : index
    %c0_21 = arith.constant 0 : index
    %12 = vector.load %arg8[%c0_20, %c0_21] : memref<64x1152xf32, #tpu.memory_space<vmem>>, vector<64x128xf32>
    tpu.vector_store %arg8[%c0_20, %c0_21], %11 {strides = array<i32>} : memref<64x1152xf32, #tpu.memory_space<vmem>>, vector<64x128xf32>,
    %c0_22 = arith.constant 0 : index
    %c1_23 = arith.constant 1 : index
    %c0_24 = arith.constant 0 : index
    %13 = vector.load %arg7[%c0_22, %c1_23, %c0_24] : memref<10x16x128xf32, #tpu.memory_space<vmem>>, vector<8x8x128xf32>
    %14 = vector.shape_cast %13 : vector<8x8x128xf32> to vector<64x128xf32>
    %c0_25 = arith.constant 0 : index
    %c128 = arith.constant 128 : index
    %15 = vector.load %arg8[%c0_25, %c128] : memref<64x1152xf32, #tpu.memory_space<vmem>>, vector<64x128xf32>
    tpu.vector_store %arg8[%c0_25, %c128], %14 {strides = array<i32>} : memref<64x1152xf32, #tpu.memory_space<vmem>>, vector<64x128xf32>,
    %c0_26 = arith.constant 0 : index
    %c2 = arith.constant 2 : index
    %c0_27 = arith.constant 0 : index
    %16 = vector.load %arg7[%c0_26, %c2, %c0_27] : memref<10x16x128xf32, #tpu.memory_space<vmem>>, vector<8x8x128xf32>
    %17 = vector.shape_cast %16 : vector<8x8x128xf32> to vector<64x128xf32>
    %c0_28 = arith.constant 0 : index
    %c256 = arith.constant 256 : index
    %18 = vector.load %arg8[%c0_28, %c256] : memref<64x1152xf32, #tpu.memory_space<vmem>>, vector<64x128xf32>
    tpu.vector_store %arg8[%c0_28, %c256], %17 {strides = array<i32>} : memref<64x1152xf32, #tpu.memory_space<vmem>>, vector<64x128xf32>,
    %c1_29 = arith.constant 1 : index
    %c0_30 = arith.constant 0 : index
    %c0_31 = arith.constant 0 : index
    %19 = vector.load %arg7[%c1_29, %c0_30, %c0_31] : memref<10x16x128xf32, #tpu.memory_space<vmem>>, vector<8x8x128xf32>
    %20 = vector.shape_cast %19 : vector<8x8x128xf32> to vector<64x128xf32>
    %c0_32 = arith.constant 0 : index
    %c384 = arith.constant 384 : index
    %21 = vector.load %arg8[%c0_32, %c384] : memref<64x1152xf32, #tpu.memory_space<vmem>>, vector<64x128xf32>
    tpu.vector_store %arg8[%c0_32, %c384], %20 {strides = array<i32>} : memref<64x1152xf32, #tpu.memory_space<vmem>>, vector<64x128xf32>,
    %c1_33 = arith.constant 1 : index
    %c1_34 = arith.constant 1 : index
    %c0_35 = arith.constant 0 : index
    %22 = vector.load %arg7[%c1_33, %c1_34, %c0_35] : memref<10x16x128xf32, #tpu.memory_space<vmem>>, vector<8x8x128xf32>
    %23 = vector.shape_cast %22 : vector<8x8x128xf32> to vector<64x128xf32>
    %c0_36 = arith.constant 0 : index
    %c512 = arith.constant 512 : index
    %24 = vector.load %arg8[%c0_36, %c512] : memref<64x1152xf32, #tpu.memory_space<vmem>>, vector<64x128xf32>
    tpu.vector_store %arg8[%c0_36, %c512], %23 {strides = array<i32>} : memref<64x1152xf32, #tpu.memory_space<vmem>>, vector<64x128xf32>,
    %c1_37 = arith.constant 1 : index
    %c2_38 = arith.constant 2 : index
    %c0_39 = arith.constant 0 : index
    %25 = vector.load %arg7[%c1_37, %c2_38, %c0_39] : memref<10x16x128xf32, #tpu.memory_space<vmem>>, vector<8x8x128xf32>
    %26 = vector.shape_cast %25 : vector<8x8x128xf32> to vector<64x128xf32>
    %c0_40 = arith.constant 0 : index
    %c640 = arith.constant 640 : index
    %27 = vector.load %arg8[%c0_40, %c640] : memref<64x1152xf32, #tpu.memory_space<vmem>>, vector<64x128xf32>
    tpu.vector_store %arg8[%c0_40, %c640], %26 {strides = array<i32>} : memref<64x1152xf32, #tpu.memory_space<vmem>>, vector<64x128xf32>,
    %c2_41 = arith.constant 2 : index
    %c0_42 = arith.constant 0 : index
    %c0_43 = arith.constant 0 : index
    %28 = vector.load %arg7[%c2_41, %c0_42, %c0_43] : memref<10x16x128xf32, #tpu.memory_space<vmem>>, vector<8x8x128xf32>
    %29 = vector.shape_cast %28 : vector<8x8x128xf32> to vector<64x128xf32>
    %c0_44 = arith.constant 0 : index
    %c768 = arith.constant 768 : index
    %30 = vector.load %arg8[%c0_44, %c768] : memref<64x1152xf32, #tpu.memory_space<vmem>>, vector<64x128xf32>
    tpu.vector_store %arg8[%c0_44, %c768], %29 {strides = array<i32>} : memref<64x1152xf32, #tpu.memory_space<vmem>>, vector<64x128xf32>,
    %c2_45 = arith.constant 2 : index
    %c1_46 = arith.constant 1 : index
    %c0_47 = arith.constant 0 : index
    %31 = vector.load %arg7[%c2_45, %c1_46, %c0_47] : memref<10x16x128xf32, #tpu.memory_space<vmem>>, vector<8x8x128xf32>
    %32 = vector.shape_cast %31 : vector<8x8x128xf32> to vector<64x128xf32>
    %c0_48 = arith.constant 0 : index
    %c896 = arith.constant 896 : index
    %33 = vector.load %arg8[%c0_48, %c896] : memref<64x1152xf32, #tpu.memory_space<vmem>>, vector<64x128xf32>
    tpu.vector_store %arg8[%c0_48, %c896], %32 {strides = array<i32>} : memref<64x1152xf32, #tpu.memory_space<vmem>>, vector<64x128xf32>,
    %c2_49 = arith.constant 2 : index
    %c2_50 = arith.constant 2 : index
    %c0_51 = arith.constant 0 : index
    %34 = vector.load %arg7[%c2_49, %c2_50, %c0_51] : memref<10x16x128xf32, #tpu.memory_space<vmem>>, vector<8x8x128xf32>
    %35 = vector.shape_cast %34 : vector<8x8x128xf32> to vector<64x128xf32>
    %c0_52 = arith.constant 0 : index
    %c1024 = arith.constant 1024 : index
    %36 = vector.load %arg8[%c0_52, %c1024] : memref<64x1152xf32, #tpu.memory_space<vmem>>, vector<64x128xf32>
    tpu.vector_store %arg8[%c0_52, %c1024], %35 {strides = array<i32>} : memref<64x1152xf32, #tpu.memory_space<vmem>>, vector<64x128xf32>,
    %c0_53 = arith.constant 0 : index
    %c0_54 = arith.constant 0 : index
    %37 = vector.load %arg8[%c0_53, %c0_54] : memref<64x1152xf32, #tpu.memory_space<vmem>>, vector<64x1152xf32>
    %c0_55 = arith.constant 0 : index
    %c0_56 = arith.constant 0 : index
    %38 = vector.load %arg2[%c0_55, %c0_56] : memref<1152x128xf32, #tpu.memory_space<vmem>>, vector<1152x128xf32>
    %cst_57 = arith.constant dense<0.000000e+00> : vector<64x128xf32>
    %39 = tpu.matmul %37, %38, %cst_57 {dimension_numbers = #tpu.dot_dimension_numbers<[1], [0], [0], [1], [0, 0, 1, 1], [], []>} : vector<64x1152xf32>, vector<1152x128xf32>, vector<64x128xf32> -> vector<64x128xf32>
    %cst_58 = arith.constant 0.000000e+00 : f32
    %40 = vector.broadcast %cst_58 : f32 to vector<64x128xf32>
    %41 = arith.maximumf %39, %40 : vector<64x128xf32>
    %42 = vector.shape_cast %41 : vector<64x128xf32> to vector<8x8x128xf32>
    %c1_59 = arith.constant 1 : index
    %c1_60 = arith.constant 1 : index
    %c0_61 = arith.constant 0 : index
    %43 = vector.load %arg7[%c1_59, %c1_60, %c0_61] : memref<10x16x128xf32, #tpu.memory_space<vmem>>, vector<8x8x128xf32>
    tpu.vector_store %arg7[%c1_59, %c1_60, %c0_61], %42 {strides = array<i32>} : memref<10x16x128xf32, #tpu.memory_space<vmem>>, vector<8x8x128xf32>,
    %c0_62 = arith.constant 0 : index
    %c0_63 = arith.constant 0 : index
    %c0_64 = arith.constant 0 : index
    %44 = vector.load %arg7[%c0_62, %c0_63, %c0_64] : memref<10x16x128xf32, #tpu.memory_space<vmem>>, vector<8x8x128xf32>
    %45 = vector.shape_cast %44 : vector<8x8x128xf32> to vector<64x128xf32>
    %c0_65 = arith.constant 0 : index
    %c0_66 = arith.constant 0 : index
    %46 = vector.load %arg8[%c0_65, %c0_66] : memref<64x1152xf32, #tpu.memory_space<vmem>>, vector<64x128xf32>
    tpu.vector_store %arg8[%c0_65, %c0_66], %45 {strides = array<i32>} : memref<64x1152xf32, #tpu.memory_space<vmem>>, vector<64x128xf32>,
    %c0_67 = arith.constant 0 : index
    %c1_68 = arith.constant 1 : index
    %c0_69 = arith.constant 0 : index
    %47 = vector.load %arg7[%c0_67, %c1_68, %c0_69] : memref<10x16x128xf32, #tpu.memory_space<vmem>>, vector<8x8x128xf32>
    %48 = vector.shape_cast %47 : vector<8x8x128xf32> to vector<64x128xf32>
    %c0_70 = arith.constant 0 : index
    %c128_71 = arith.constant 128 : index
    %49 = vector.load %arg8[%c0_70, %c128_71] : memref<64x1152xf32, #tpu.memory_space<vmem>>, vector<64x128xf32>
    tpu.vector_store %arg8[%c0_70, %c128_71], %48 {strides = array<i32>} : memref<64x1152xf32, #tpu.memory_space<vmem>>, vector<64x128xf32>,
    %c0_72 = arith.constant 0 : index
    %c2_73 = arith.constant 2 : index
    %c0_74 = arith.constant 0 : index
    %50 = vector.load %arg7[%c0_72, %c2_73, %c0_74] : memref<10x16x128xf32, #tpu.memory_space<vmem>>, vector<8x8x128xf32>
    %51 = vector.shape_cast %50 : vector<8x8x128xf32> to vector<64x128xf32>
    %c0_75 = arith.constant 0 : index
    %c256_76 = arith.constant 256 : index
    %52 = vector.load %arg8[%c0_75, %c256_76] : memref<64x1152xf32, #tpu.memory_space<vmem>>, vector<64x128xf32>
    tpu.vector_store %arg8[%c0_75, %c256_76], %51 {strides = array<i32>} : memref<64x1152xf32, #tpu.memory_space<vmem>>, vector<64x128xf32>,
    %c1_77 = arith.constant 1 : index
    %c0_78 = arith.constant 0 : index
    %c0_79 = arith.constant 0 : index
    %53 = vector.load %arg7[%c1_77, %c0_78, %c0_79] : memref<10x16x128xf32, #tpu.memory_space<vmem>>, vector<8x8x128xf32>
    %54 = vector.shape_cast %53 : vector<8x8x128xf32> to vector<64x128xf32>
    %c0_80 = arith.constant 0 : index
    %c384_81 = arith.constant 384 : index
    %55 = vector.load %arg8[%c0_80, %c384_81] : memref<64x1152xf32, #tpu.memory_space<vmem>>, vector<64x128xf32>
    tpu.vector_store %arg8[%c0_80, %c384_81], %54 {strides = array<i32>} : memref<64x1152xf32, #tpu.memory_space<vmem>>, vector<64x128xf32>,
    %c1_82 = arith.constant 1 : index
    %c1_83 = arith.constant 1 : index
    %c0_84 = arith.constant 0 : index
    %56 = vector.load %arg7[%c1_82, %c1_83, %c0_84] : memref<10x16x128xf32, #tpu.memory_space<vmem>>, vector<8x8x128xf32>
    %57 = vector.shape_cast %56 : vector<8x8x128xf32> to vector<64x128xf32>
    %c0_85 = arith.constant 0 : index
    %c512_86 = arith.constant 512 : index
    %58 = vector.load %arg8[%c0_85, %c512_86] : memref<64x1152xf32, #tpu.memory_space<vmem>>, vector<64x128xf32>
    tpu.vector_store %arg8[%c0_85, %c512_86], %57 {strides = array<i32>} : memref<64x1152xf32, #tpu.memory_space<vmem>>, vector<64x128xf32>,
    %c1_87 = arith.constant 1 : index
    %c2_88 = arith.constant 2 : index
    %c0_89 = arith.constant 0 : index
    %59 = vector.load %arg7[%c1_87, %c2_88, %c0_89] : memref<10x16x128xf32, #tpu.memory_space<vmem>>, vector<8x8x128xf32>
    %60 = vector.shape_cast %59 : vector<8x8x128xf32> to vector<64x128xf32>
    %c0_90 = arith.constant 0 : index
    %c640_91 = arith.constant 640 : index
    %61 = vector.load %arg8[%c0_90, %c640_91] : memref<64x1152xf32, #tpu.memory_space<vmem>>, vector<64x128xf32>
    tpu.vector_store %arg8[%c0_90, %c640_91], %60 {strides = array<i32>} : memref<64x1152xf32, #tpu.memory_space<vmem>>, vector<64x128xf32>,
    %c2_92 = arith.constant 2 : index
    %c0_93 = arith.constant 0 : index
    %c0_94 = arith.constant 0 : index
    %62 = vector.load %arg7[%c2_92, %c0_93, %c0_94] : memref<10x16x128xf32, #tpu.memory_space<vmem>>, vector<8x8x128xf32>
    %63 = vector.shape_cast %62 : vector<8x8x128xf32> to vector<64x128xf32>
    %c0_95 = arith.constant 0 : index
    %c768_96 = arith.constant 768 : index
    %64 = vector.load %arg8[%c0_95, %c768_96] : memref<64x1152xf32, #tpu.memory_space<vmem>>, vector<64x128xf32>
    tpu.vector_store %arg8[%c0_95, %c768_96], %63 {strides = array<i32>} : memref<64x1152xf32, #tpu.memory_space<vmem>>, vector<64x128xf32>,
    %c2_97 = arith.constant 2 : index
    %c1_98 = arith.constant 1 : index
    %c0_99 = arith.constant 0 : index
    %65 = vector.load %arg7[%c2_97, %c1_98, %c0_99] : memref<10x16x128xf32, #tpu.memory_space<vmem>>, vector<8x8x128xf32>
    %66 = vector.shape_cast %65 : vector<8x8x128xf32> to vector<64x128xf32>
    %c0_100 = arith.constant 0 : index
    %c896_101 = arith.constant 896 : index
    %67 = vector.load %arg8[%c0_100, %c896_101] : memref<64x1152xf32, #tpu.memory_space<vmem>>, vector<64x128xf32>
    tpu.vector_store %arg8[%c0_100, %c896_101], %66 {strides = array<i32>} : memref<64x1152xf32, #tpu.memory_space<vmem>>, vector<64x128xf32>,
    %c2_102 = arith.constant 2 : index
    %c2_103 = arith.constant 2 : index
    %c0_104 = arith.constant 0 : index
    %68 = vector.load %arg7[%c2_102, %c2_103, %c0_104] : memref<10x16x128xf32, #tpu.memory_space<vmem>>, vector<8x8x128xf32>
    %69 = vector.shape_cast %68 : vector<8x8x128xf32> to vector<64x128xf32>
    %c0_105 = arith.constant 0 : index
    %c1024_106 = arith.constant 1024 : index
    %70 = vector.load %arg8[%c0_105, %c1024_106] : memref<64x1152xf32, #tpu.memory_space<vmem>>, vector<64x128xf32>
    tpu.vector_store %arg8[%c0_105, %c1024_106], %69 {strides = array<i32>} : memref<64x1152xf32, #tpu.memory_space<vmem>>, vector<64x128xf32>,
    %c0_107 = arith.constant 0 : index
    %c0_108 = arith.constant 0 : index
    %71 = vector.load %arg8[%c0_107, %c0_108] : memref<64x1152xf32, #tpu.memory_space<vmem>>, vector<64x1152xf32>
    %c0_109 = arith.constant 0 : index
    %c0_110 = arith.constant 0 : index
    %72 = vector.load %arg3[%c0_109, %c0_110] : memref<1152x128xf32, #tpu.memory_space<vmem>>, vector<1152x128xf32>
    %cst_111 = arith.constant dense<0.000000e+00> : vector<64x128xf32>
    %73 = tpu.matmul %71, %72, %cst_111 {dimension_numbers = #tpu.dot_dimension_numbers<[1], [0], [0], [1], [0, 0, 1, 1], [], []>} : vector<64x1152xf32>, vector<1152x128xf32>, vector<64x128xf32> -> vector<64x128xf32>
    %74 = arith.addf %73, %8 : vector<64x128xf32>
    %cst_112 = arith.constant 0.000000e+00 : f32
    %75 = vector.broadcast %cst_112 : f32 to vector<64x128xf32>
    %76 = arith.maximumf %74, %75 : vector<64x128xf32>
    %77 = vector.shape_cast %76 : vector<64x128xf32> to vector<8x8x128xf32>
    %c1_113 = arith.constant 1 : index
    %c1_114 = arith.constant 1 : index
    %c0_115 = arith.constant 0 : index
    %78 = vector.load %arg7[%c1_113, %c1_114, %c0_115] : memref<10x16x128xf32, #tpu.memory_space<vmem>>, vector<8x8x128xf32>
    tpu.vector_store %arg7[%c1_113, %c1_114, %c0_115], %77 {strides = array<i32>} : memref<10x16x128xf32, #tpu.memory_space<vmem>>, vector<8x8x128xf32>,
    %c0_116 = arith.constant 0 : index
    %c0_117 = arith.constant 0 : index
    %c0_118 = arith.constant 0 : index
    %79 = vector.load %arg7[%c0_116, %c0_117, %c0_118] : memref<10x16x128xf32, #tpu.memory_space<vmem>>, vector<8x8x128xf32>
    %80 = vector.shape_cast %79 : vector<8x8x128xf32> to vector<64x128xf32>
    %c0_119 = arith.constant 0 : index
    %c0_120 = arith.constant 0 : index
    %81 = vector.load %arg8[%c0_119, %c0_120] : memref<64x1152xf32, #tpu.memory_space<vmem>>, vector<64x128xf32>
    tpu.vector_store %arg8[%c0_119, %c0_120], %80 {strides = array<i32>} : memref<64x1152xf32, #tpu.memory_space<vmem>>, vector<64x128xf32>,
    %c0_121 = arith.constant 0 : index
    %c1_122 = arith.constant 1 : index
    %c0_123 = arith.constant 0 : index
    %82 = vector.load %arg7[%c0_121, %c1_122, %c0_123] : memref<10x16x128xf32, #tpu.memory_space<vmem>>, vector<8x8x128xf32>
    %83 = vector.shape_cast %82 : vector<8x8x128xf32> to vector<64x128xf32>
    %c0_124 = arith.constant 0 : index
    %c128_125 = arith.constant 128 : index
    %84 = vector.load %arg8[%c0_124, %c128_125] : memref<64x1152xf32, #tpu.memory_space<vmem>>, vector<64x128xf32>
    tpu.vector_store %arg8[%c0_124, %c128_125], %83 {strides = array<i32>} : memref<64x1152xf32, #tpu.memory_space<vmem>>, vector<64x128xf32>,
    %c0_126 = arith.constant 0 : index
    %c2_127 = arith.constant 2 : index
    %c0_128 = arith.constant 0 : index
    %85 = vector.load %arg7[%c0_126, %c2_127, %c0_128] : memref<10x16x128xf32, #tpu.memory_space<vmem>>, vector<8x8x128xf32>
    %86 = vector.shape_cast %85 : vector<8x8x128xf32> to vector<64x128xf32>
    %c0_129 = arith.constant 0 : index
    %c256_130 = arith.constant 256 : index
    %87 = vector.load %arg8[%c0_129, %c256_130] : memref<64x1152xf32, #tpu.memory_space<vmem>>, vector<64x128xf32>
    tpu.vector_store %arg8[%c0_129, %c256_130], %86 {strides = array<i32>} : memref<64x1152xf32, #tpu.memory_space<vmem>>, vector<64x128xf32>,
    %c1_131 = arith.constant 1 : index
    %c0_132 = arith.constant 0 : index
    %c0_133 = arith.constant 0 : index
    %88 = vector.load %arg7[%c1_131, %c0_132, %c0_133] : memref<10x16x128xf32, #tpu.memory_space<vmem>>, vector<8x8x128xf32>
    %89 = vector.shape_cast %88 : vector<8x8x128xf32> to vector<64x128xf32>
    %c0_134 = arith.constant 0 : index
    %c384_135 = arith.constant 384 : index
    %90 = vector.load %arg8[%c0_134, %c384_135] : memref<64x1152xf32, #tpu.memory_space<vmem>>, vector<64x128xf32>
    tpu.vector_store %arg8[%c0_134, %c384_135], %89 {strides = array<i32>} : memref<64x1152xf32, #tpu.memory_space<vmem>>, vector<64x128xf32>,
    %c1_136 = arith.constant 1 : index
    %c1_137 = arith.constant 1 : index
    %c0_138 = arith.constant 0 : index
    %91 = vector.load %arg7[%c1_136, %c1_137, %c0_138] : memref<10x16x128xf32, #tpu.memory_space<vmem>>, vector<8x8x128xf32>
    %92 = vector.shape_cast %91 : vector<8x8x128xf32> to vector<64x128xf32>
    %c0_139 = arith.constant 0 : index
    %c512_140 = arith.constant 512 : index
    %93 = vector.load %arg8[%c0_139, %c512_140] : memref<64x1152xf32, #tpu.memory_space<vmem>>, vector<64x128xf32>
    tpu.vector_store %arg8[%c0_139, %c512_140], %92 {strides = array<i32>} : memref<64x1152xf32, #tpu.memory_space<vmem>>, vector<64x128xf32>,
    %c1_141 = arith.constant 1 : index
    %c2_142 = arith.constant 2 : index
    %c0_143 = arith.constant 0 : index
    %94 = vector.load %arg7[%c1_141, %c2_142, %c0_143] : memref<10x16x128xf32, #tpu.memory_space<vmem>>, vector<8x8x128xf32>
    %95 = vector.shape_cast %94 : vector<8x8x128xf32> to vector<64x128xf32>
    %c0_144 = arith.constant 0 : index
    %c640_145 = arith.constant 640 : index
    %96 = vector.load %arg8[%c0_144, %c640_145] : memref<64x1152xf32, #tpu.memory_space<vmem>>, vector<64x128xf32>
    tpu.vector_store %arg8[%c0_144, %c640_145], %95 {strides = array<i32>} : memref<64x1152xf32, #tpu.memory_space<vmem>>, vector<64x128xf32>,
    %c2_146 = arith.constant 2 : index
    %c0_147 = arith.constant 0 : index
    %c0_148 = arith.constant 0 : index
    %97 = vector.load %arg7[%c2_146, %c0_147, %c0_148] : memref<10x16x128xf32, #tpu.memory_space<vmem>>, vector<8x8x128xf32>
    %98 = vector.shape_cast %97 : vector<8x8x128xf32> to vector<64x128xf32>
    %c0_149 = arith.constant 0 : index
    %c768_150 = arith.constant 768 : index
    %99 = vector.load %arg8[%c0_149, %c768_150] : memref<64x1152xf32, #tpu.memory_space<vmem>>, vector<64x128xf32>
    tpu.vector_store %arg8[%c0_149, %c768_150], %98 {strides = array<i32>} : memref<64x1152xf32, #tpu.memory_space<vmem>>, vector<64x128xf32>,
    %c2_151 = arith.constant 2 : index
    %c1_152 = arith.constant 1 : index
    %c0_153 = arith.constant 0 : index
    %100 = vector.load %arg7[%c2_151, %c1_152, %c0_153] : memref<10x16x128xf32, #tpu.memory_space<vmem>>, vector<8x8x128xf32>
    %101 = vector.shape_cast %100 : vector<8x8x128xf32> to vector<64x128xf32>
    %c0_154 = arith.constant 0 : index
    %c896_155 = arith.constant 896 : index
    %102 = vector.load %arg8[%c0_154, %c896_155] : memref<64x1152xf32, #tpu.memory_space<vmem>>, vector<64x128xf32>
    tpu.vector_store %arg8[%c0_154, %c896_155], %101 {strides = array<i32>} : memref<64x1152xf32, #tpu.memory_space<vmem>>, vector<64x128xf32>,
    %c2_156 = arith.constant 2 : index
    %c2_157 = arith.constant 2 : index
    %c0_158 = arith.constant 0 : index
    %103 = vector.load %arg7[%c2_156, %c2_157, %c0_158] : memref<10x16x128xf32, #tpu.memory_space<vmem>>, vector<8x8x128xf32>
    %104 = vector.shape_cast %103 : vector<8x8x128xf32> to vector<64x128xf32>
    %c0_159 = arith.constant 0 : index
    %c1024_160 = arith.constant 1024 : index
    %105 = vector.load %arg8[%c0_159, %c1024_160] : memref<64x1152xf32, #tpu.memory_space<vmem>>, vector<64x128xf32>
    tpu.vector_store %arg8[%c0_159, %c1024_160], %104 {strides = array<i32>} : memref<64x1152xf32, #tpu.memory_space<vmem>>, vector<64x128xf32>,
    %c0_161 = arith.constant 0 : index
    %c0_162 = arith.constant 0 : index
    %106 = vector.load %arg8[%c0_161, %c0_162] : memref<64x1152xf32, #tpu.memory_space<vmem>>, vector<64x1152xf32>
    %c0_163 = arith.constant 0 : index
    %c0_164 = arith.constant 0 : index
    %107 = vector.load %arg4[%c0_163, %c0_164] : memref<1152x128xf32, #tpu.memory_space<vmem>>, vector<1152x128xf32>
    %cst_165 = arith.constant dense<0.000000e+00> : vector<64x128xf32>
    %108 = tpu.matmul %106, %107, %cst_165 {dimension_numbers = #tpu.dot_dimension_numbers<[1], [0], [0], [1], [0, 0, 1, 1], [], []>} : vector<64x1152xf32>, vector<1152x128xf32>, vector<64x128xf32> -> vector<64x128xf32>
    %c0_166 = arith.constant 0 : index
    %c0_167 = arith.constant 0 : index
    %109 = vector.load %arg5[%c0_166, %c0_167] : memref<1x128xf32, #tpu.memory_space<vmem>>, vector<1x128xf32>
    %110 = vector.broadcast %109 : vector<1x128xf32> to vector<64x128xf32>
    %111 = arith.addf %108, %110 : vector<64x128xf32>
    %112 = math.tanh %111 : vector<64x128xf32>
    %c0_168 = arith.constant 0 : index
    %c0_169 = arith.constant 0 : index
    %c0_170 = arith.constant 0 : index
    %113 = vector.load %arg6[%c0_168, %c0_169, %c0_170] : memref<1x64x128xf32, #tpu.memory_space<vmem>>, vector<1x64x128xf32>
    %114 = vector.shape_cast %113 : vector<1x64x128xf32> to vector<64x128xf32>
    %115 = vector.shape_cast %112 : vector<64x128xf32> to vector<1x64x128xf32>
    tpu.vector_store %arg6[%c0_168, %c0_169, %c0_170], %115 {strides = array<i32>} : memref<1x64x128xf32, #tpu.memory_space<vmem>>, vector<1x64x128xf32>,
    return
  }
  func.func @transform_0(%arg0: i32) -> (i32, i32, i32, i32) {
    %c0_i32 = arith.constant 0 : i32
    %c0_i32_0 = arith.constant 0 : i32
    %c0_i32_1 = arith.constant 0 : i32
    %c0_i32_2 = arith.constant 0 : i32
    return %arg0, %c0_i32, %c0_i32_0, %c0_i32_1 : i32, i32, i32, i32
  }
  func.func @transform_1(%arg0: i32) -> (i32, i32) {
    %c0_i32 = arith.constant 0 : i32
    %c0_i32_0 = arith.constant 0 : i32
    %c0_i32_1 = arith.constant 0 : i32
    return %c0_i32, %c0_i32_0 : i32, i32
  }
  func.func @transform_2(%arg0: i32) -> (i32, i32) {
    %c0_i32 = arith.constant 0 : i32
    %c0_i32_0 = arith.constant 0 : i32
    %c0_i32_1 = arith.constant 0 : i32
    return %c0_i32, %c0_i32_0 : i32, i32
  }
  func.func @transform_3(%arg0: i32) -> (i32, i32) {
    %c0_i32 = arith.constant 0 : i32
    %c0_i32_0 = arith.constant 0 : i32
    %c0_i32_1 = arith.constant 0 : i32
    return %c0_i32, %c0_i32_0 : i32, i32
  }
  func.func @transform_4(%arg0: i32) -> (i32, i32) {
    %c0_i32 = arith.constant 0 : i32
    %c0_i32_0 = arith.constant 0 : i32
    %c0_i32_1 = arith.constant 0 : i32
    return %c0_i32, %c0_i32_0 : i32, i32
  }
  func.func @transform_5(%arg0: i32) -> (i32, i32, i32) {
    %c0_i32 = arith.constant 0 : i32
    %c0_i32_0 = arith.constant 0 : i32
    %c0_i32_1 = arith.constant 0 : i32
    return %arg0, %c0_i32, %c0_i32_0 : i32, i32, i32
  }
}

</mosaic_0001>

<bundles_post_ra>
// kernel: tpu_custom_call.1
= control target key start
LH: loop header
LB: loop body
LE: loop exit
PB: predicated region body
PF: predicated region fallthrough
CT: control target
= control target key end

     0   :  { %10 = vsyncpa [#allocation5], 0  ;;  %s5530_s0 = inlined_call_operand.hbm [shape: f32[2,8,8,128], index: 0, kind: input, shape index: {}]   ;;  %s5531_s1 = inlined_call_operand.hbm [shape: f32[1152,128], index: 1, kind: input, shape index: {}]   ;;  %s5532_s2 = inlined_call_operand.hbm [shape: f32[1152,128], index: 2, kind: input, shape index: {}]   ;;  %s5533_s3 = inlined_call_operand.hbm [shape: f32[1152,128], index: 3, kind: input, shape index: {}]   ;;  %s5534_s4 = inlined_call_operand.vmem [shape: f32[1,128], index: 4, kind: input, shape index: {}]   ;;  %s5535_s5 = inlined_call_operand.hbm [shape: f32[2,64,128], index: 5, kind: output, shape index: {}]  }
   0x1   :  { %12 = vsyncpa [#allocation5 + $0x1], 0 }
   0x2   :  { %13 = vsyncpa [#allocation8], 0 }
   0x3   :  { %14 = vsyncpa [#allocation11], 0 }
   0x4   :  { %15 = vsyncpa [#allocation6], 0 }
   0x5   :  { %17 = vsyncpa [#allocation6 + $0x1], 0  ;;  %s4879_s18 = smov 0   ;;  %s4881_s19 = smov 0  }
   0x6   :  { %s4883_s20 = smov 0   ;;  %s4885_s21 = smov 0  }
   0x7 LB: > { %s4900_s22 = sadd.s32 4294967295, %s4837_s21   ;;  %s3156_s23 = sadd.s32 4294967294, %s4837_s21   ;;  %s4837_s21 = sphi %s4885_s21, %s5558_s21   ;;  %s4833_s20 = sphi %s4883_s20, %s5557_s20   ;;  %s4829_s19 = sphi %s4881_s19, %s5556_s19   ;;  %s4825_s18 = sphi %s4879_s18, %s5555_s18  }
   0x8   : > { %p43_p0 = scmp.ne.s32.totalorder %s4829_s19, %s4825_s18  ;;  %p5536_p1 = scmp.eq.s32.totalorder %s4900_s22, 0 }
   0x9   : > { %p157_p3 = scmp.eq.s32.totalorder %s3156_s23, 1  ;;  %p3157_p5 = scmp.ge.s32.totalorder %s4837_s21, 1 }
   0xa   : > { %p4909_p4 = por %p5536_p1, %p43_p0  ;;  %p164_p7 = scmp.lt.s32.totalorder %s4837_s21, 3 }
   0xb   : > { %p4914_p6 = por %p157_p3, %p43_p0  ;;  %s4839_s27 = smov [#allocation7]  }
   0xc   : > { %s5539_s24 = scalar_select %p4909_p4, 1, 0 }
   0xd   : > { %s5540_s25 = scalar_select %p4914_p6, 1, 0 }
   0xe   : > { %p4919_p8 = pnand %p3157_p5, %p164_p7  ;;  %s176_s28 = sshll.u32 %s4839_s27, 4  ;;  %s4923_s28 = int_to_ptr.vmem [resolvable:$true] %s176_s28 }
   0xf   : > { %s4840_s30 = smov [#allocation9]   ;;  %s4841_s7 = smov [#allocation10]  }
  0x10   : > { %s5541_s26 = scalar_select %p4919_p8, 1, 0 }
  0x11   : > { %p4567_p9 = pneg %p4919_p8  ;;  %s189_s6 = sshll.u32 %s4840_s30, 4  ;;  %s4934_s6 = int_to_ptr.vmem [resolvable:$true] %s189_s6 }
  0x12   : > { %s4936_s8 = sshll.u32 %s4841_s7, 4  ;;  %s4649_s11 = scalar_lea.hbm %s5531_s1, 18432  ;;  %s203_s8 = int_to_ptr.vmem [resolvable:$true] %s4936_s8 }
  0x13   : > { %p4930_p11 = pnand %p4567_p9, %p5536_p1  ;;  %p4650_p12 = scmp.ne.s32.totalorder %s5531_s1, %s4649_s11 }
  0x14   : > { %p4656_p5 = scmp.lt.u32.totalorder %s4649_s11, %s5531_s1 }
  0x15   : > { %p4946_p13 = pneg %p4930_p11 }
  0x17   : > { %p4652_p0 = pnand %p4946_p13, %p4650_p12 }
  0x19   : > { %p4653_p3 = pneg %p4652_p0 }
  0x1b   : > { %p4658_p7 = pnand %p4656_p5, %p4653_p3 }
  0x1d   : > { %4661 = shalt.err (!%p4658_p7)
}
  0x1e   : > { %s4662_s17 = scalar_lea.vmem %s4923_s28, 18432  ;;  %p4670_p2 = scmp.lt.s32.totalorder %s4923_s28, %s4923_s28 }
  0x1f   : > { %p4663_p9 = scmp.ne.s32.totalorder %s4923_s28, %s4662_s17  ;;  %p4671_p6 = scmp.lt.s32.totalorder %s4662_s17, %s4662_s17 }
  0x21   : > { %p4665_p10 = pnand %p4663_p9, %p4946_p13  ;;  %p4672_p12 = por %p4671_p6, %p4670_p2 }
  0x23   : > { %p4666_p1 = pneg %p4665_p10 }
  0x25   : > { %p4673_p0 = pnand %p4672_p12, %p4666_p1 }
  0x27   : > { %4676 = shalt.err (!%p4673_p0)
}
  0x28   : > { %s4842_s23 = smov 128   ;;  %s4843_s27 = smov 8  }
  0x29   : > { %4570 = dma.hbm_to_vmem [thread:$0]  (!%p4930_p11), %s5531_s1, 18432, %s4923_s28, [#allocation8], %s4842_s23, %s4842_s23, %s4843_s27  }
  0x2a   : > { %s4677_s11 = scalar_lea.hbm %s5532_s2, 18432 }
  0x2b   : > { %p4678_p1 = scmp.ne.s32.totalorder %s5532_s2, %s4677_s11  ;;  %p4684_p10 = scmp.lt.u32.totalorder %s4677_s11, %s5532_s2 }
  0x2d   : > { %p4680_p2 = pnand %p4678_p1, %p4946_p13 }
  0x2f   : > { %p4681_p6 = pneg %p4680_p2 }
  0x31   : > { %p4686_p3 = pnand %p4684_p10, %p4681_p6 }
  0x33   : > { %4689 = shalt.err (!%p4686_p3)
}
  0x34   : > { %s4690_s28 = scalar_lea.vmem %s4934_s6, 18432  ;;  %p4698_p12 = scmp.lt.s32.totalorder %s4934_s6, %s4934_s6 }
  0x35   : > { %p4691_p5 = scmp.ne.s32.totalorder %s4934_s6, %s4690_s28  ;;  %p4699_p0 = scmp.lt.s32.totalorder %s4690_s28, %s4690_s28 }
  0x37   : > { %p4693_p7 = pnand %p4691_p5, %p4946_p13  ;;  %p4700_p1 = por %p4699_p0, %p4698_p12 }
  0x39   : > { %p4694_p9 = pneg %p4693_p7 }
  0x3b   : > { %p4701_p2 = pnand %p4700_p1, %p4694_p9 }
  0x3d   : > { %4704 = shalt.err (!%p4701_p2)
}
  0x3e   : > { %4573 = dma.hbm_to_vmem [thread:$0]  (!%p4930_p11), %s5532_s2, 18432, %s4934_s6, [#allocation8], %s4842_s23, %s4842_s23, %s4843_s27  }
  0x3f   : > { %s4705_s10 = scalar_lea.hbm %s5533_s3, 18432 }
  0x40   : > { %p4706_p6 = scmp.ne.s32.totalorder %s5533_s3, %s4705_s10  ;;  %p4712_p5 = scmp.lt.u32.totalorder %s4705_s10, %s5533_s3 }
  0x42   : > { %p4708_p10 = pnand %p4706_p6, %p4946_p13 }
  0x44   : > { %p4709_p3 = pneg %p4708_p10 }
  0x46   : > { %p4714_p7 = pnand %p4712_p5, %p4709_p3 }
  0x48   : > { %4717 = shalt.err (!%p4714_p7)
}
  0x49   : > { %s4718_s16 = scalar_lea.vmem %s203_s8, 18432  ;;  %p4726_p1 = scmp.lt.s32.totalorder %s203_s8, %s203_s8 }
  0x4a   : > { %p4719_p9 = scmp.ne.s32.totalorder %s203_s8, %s4718_s16  ;;  %p4727_p2 = scmp.lt.s32.totalorder %s4718_s16, %s4718_s16 }
  0x4c   : > { %p4721_p12 = pnand %p4719_p9, %p4946_p13  ;;  %p4728_p4 = por %p4727_p2, %p4726_p1 }
  0x4e   : > { %p4722_p0 = pneg %p4721_p12 }
  0x50   : > { %p4729_p8 = pnand %p4728_p4, %p4722_p0 }
  0x52   : > { %4732 = shalt.err (!%p4729_p8)
}
  0x53   : > { %4576 = dma.hbm_to_vmem [thread:$0]  (!%p4930_p11), %s5533_s3, 18432, %s203_s8, [#allocation11], %s4842_s23, %s4842_s23, %s4843_s27  }
  0x54   : > { %s5019_s14 = sadd.s32 1, %s4837_s21   ;;  %s30_s17 = sadd.s32 1, %s4833_s20 }
  0x55   : > { %s27_s29 = ssub.s32 %s4837_s21, %s5019_s14  ;;  %p37_p8 = scmp.ne.s32.totalorder %s4833_s20, %s4829_s19 }
  0x56   : > { %p28_p4 = scmp.eq.s32.totalorder %s27_s29, 0  ;;  %p38_p13 = scmp.eq.s32.totalorder %s4837_s21, 0 }
  0x57   : > { %p4588_p6 = scmp.lt.s32.totalorder %s4837_s21, 2  ;;  %p5544_p3 = scmp.eq.s32.totalorder %s4900_s22, 1 }
  0x58   : > { %s5029_s30 = scalar_select %p28_p4, %s4833_s20, %s30_s17  }
  0x59   : > { %p39_p10 = por %p38_p13, %p37_p8  ;;  %p5033_p5 = por %p5544_p3, %p37_p8 }
  0x5a   : > { %s219_s9 = sand.u32 1, %s4833_s20   ;;  %s3177_s10 = sshll.u32 %s4837_s21, 10 }
  0x5b   : > { %s3162_s8 = sshll.u32 %s219_s9, 6  ;;  %s5042_s13 = scalar_lea.hbm %s5530_s0, %s3177_s10 }
  0x5c   : > { %s223_s15 = scalar_lea.vmem [#allocation4], %s3162_s8  ;;  %p5044_p11 = pnand %p4588_p6, %p39_p10 }
  0x5d   : > { %s230_s16 = sshll.u32 %s223_s15, 4  ;;  %s5050_s28 = scalar_lea.sflag [#allocation5], %s219_s9  ;;  %s5048_s16 = int_to_ptr.vmem [resolvable:$true] %s230_s16 }
  0x5e   : > { %s4733_s29 = scalar_lea.hbm %s5042_s13, 1024  ;;  %p4735_p9 = pneg %p5044_p11 }
  0x5f   : > { %p4734_p7 = scmp.ne.s32.totalorder %s5042_s13, %s4733_s29  ;;  %s4738_s8 = scalar_lea.hbm %s5530_s0, 2048 }
  0x60   : > { %p4739_p1 = scmp.lt.u32.totalorder %s5042_s13, %s5530_s0  ;;  %p4740_p2 = scmp.lt.u32.totalorder %s4738_s8, %s4733_s29 }
  0x61   : > { %p4736_p12 = pnand %p4735_p9, %p4734_p7  ;;  %p4742_p8 = scmp.lt.u32.totalorder %s4733_s29, %s5042_s13 }
  0x62   : > { %p4741_p4 = por %p4740_p2, %p4739_p1 }
  0x63   : > { %p4737_p0 = pneg %p4736_p12 }
  0x64   : > { %p4743_p13 = por %p4742_p8, %p4741_p4 }
  0x66   : > { %p4744_p6 = pnand %p4743_p13, %p4737_p0 }
  0x68   : > { %4747 = shalt.err (!%p4744_p6)
}
  0x69   : > { %s4748_s9 = scalar_lea.vmem %s5048_s16, 1024  ;;  %s4844_s15 = smov [#allocation4]  }
  0x6a   : > { %p4749_p10 = scmp.ne.s32.totalorder %s5048_s16, %s4748_s9  ;;  %s4753_s17 = sshll.u32 %s4844_s15, 4  ;;  %s4754_s17 = int_to_ptr.vmem [resolvable:$false] %s4753_s17 }
  0x6b   : > { %s4755_s10 = scalar_lea.vmem %s4754_s17, 2048  ;;  %p4756_p12 = scmp.lt.s32.totalorder %s5048_s16, %s4754_s17 }
  0x6c   : > { %p4751_p3 = pnand %p4749_p10, %p4735_p9  ;;  %p4757_p1 = scmp.lt.s32.totalorder %s4755_s10, %s4748_s9 }
  0x6e   : > { %p4752_p7 = pneg %p4751_p3  ;;  %p4758_p2 = por %p4757_p1, %p4756_p12 }
  0x70   : > { %p4759_p4 = pnand %p4758_p2, %p4752_p7 }
  0x72   : > { %4762 = shalt.err (!%p4759_p4)
}
  0x73   : > { %4580 = dma.hbm_to_vmem [thread:$0]  (!%p5044_p11), %s5042_s13, 1024, %s5048_s16, %s5050_s28, %s4842_s23, %s4842_s23, %s4843_s27  }
  0x74   : > { %p5547_p9 = scmp.ne.s32.totalorder %s5541_s26, 0 }
  0x75   : > { %s5084_s29 = sand.u32 (!%p5547_p9), 1, %s4829_s19   ;;  %p5548_p0 = scmp.ne.s32.totalorder (!%p5547_p9), %s5539_s24, 0 }
  0x76   : > { %242 = sbr.rel (%p5547_p9) target bundleno = 1055 (0x41f), region = 40  ;;  %s3166_s8 = sshll.u32 (!%p5547_p9), %s5084_s29, 6 }
  0x77   : > { %s245_s11 = scalar_lea.sflag (!%p5547_p9), [#allocation5], %s5084_s29  ;;  %s5090_s6 = scalar_lea.vmem (!%p5547_p9), [#allocation4], %s3166_s8 }
  0x7d   : > { %4808 = dma.done.wait (%p5548_p0), %s245_s11, 1024  }
  0x7e   : > { %4810 = vsyncadd (%p5548_p0), %s245_s11, 4294966272  ;;  %p5549_p11 = scmp.eq.s32.totalorder %s4900_s22, 0 }
  0x80   : > { %4812 = dma.done.wait (%p5549_p11), [#allocation8], 36864   ;;  %p5550_p8 = pmov %p5549_p11 }
  0x82   : > { %4814 = vsyncadd (%p5550_p8), [#allocation8], 4294930432  ;;  %p5551_p13 = pmov %p5550_p8 }
  0x83   : > { %p5552_p6 = pmov %p5550_p8 }
  0x84   : > { %4816 = dma.done.wait (%p5551_p13), [#allocation11], 18432  }
  0x85   : > { %4818 = vsyncadd (%p5552_p6), [#allocation11], 4294948864  ;;  %v4845_v0 = vmov 0.0   ;;  %v562_v1 = vld [vmem:[#allocation7 + $0x80] sm:$0xff]  ;;  %v563_v2 = vld [vmem:[#allocation7 + $0x88] sm:$0xff]  ;;  %s286_s23 = scalar_lea.vmem [#allocation12], %s3166_s8 }
  0x86   : > { %287 = vst [vmem:[#allocation2] sm:$0xff] %v4845_v0  ;;  %288 = vst [vmem:[#allocation2 + $0x8] sm:$0xff] %v4845_v0  ;;  %v594_v3 = vld [vmem:[#allocation7 + $0x180] sm:$0xff]  ;;  %v4055_v4 = vpack.c.bf16 %v563_v2, %v562_v1  ;;  %v595_v5 = vld [vmem:[#allocation7 + $0x188] sm:$0xff]  ;;  %s3178_s27 = sshll.u32 %s4900_s22, 10  ;;  %s3054_s13 = sshll.u32 %s286_s23, 4  ;;  %s5486_s13 = int_to_ptr.vmem [resolvable:$true] %s3054_s13 }
  0x87   : > { %290 = vst [vmem:[#allocation2 + $0x90] sm:$0xff] %v4845_v0  ;;  %291 = vst [vmem:[#allocation2 + $0x98] sm:$0xff] %v4845_v0  ;;  %v546_v6 = vld [vmem:[#allocation7] sm:$0xff]  ;;  %v547_v7 = vld [vmem:[#allocation7 + $0x8] sm:$0xff]  ;;  %v4087_v8 = vpack.c.bf16 %v595_v5, %v594_v3  ;;  %s5484_s12 = scalar_lea.hbm %s5535_s5, %s3178_s27  ;;  %s3041_s22 = scalar_lea.sflag [#allocation6], %s5084_s29 }
  0x88   : > { %293 = vst [vmem:[#allocation2 + $0x10] sm:$0x1] %v4845_v0  ;;  %294 = vst [vmem:[#allocation2 + $0x20] sm:$0x1] %v4845_v0  ;;  %v4057_v9 = vpack.c.bf16 %v547_v7, %v546_v6  ;;  %v578_v10 = vld [vmem:[#allocation7 + $0x100] sm:$0xff]  ;;  %v579_v11 = vld [vmem:[#allocation7 + $0x108] sm:$0xff]  ;;  %4056 = vmatprep.subr.bf16.mxu0 %v4055_v4 }
  0x89   : > { %295 = vst [vmem:[#allocation2 + $0x30] sm:$0x1] %v4845_v0  ;;  %296 = vst [vmem:[#allocation2 + $0x40] sm:$0x1] %v4845_v0  ;;  %v564_v12 = vld [vmem:[#allocation7 + $0x90] sm:$0xff]  ;;  %v4089_v13 = vpack.c.bf16 %v579_v11, %v578_v10  ;;  %v565_v14 = vld [vmem:[#allocation7 + $0x98] sm:$0xff]  ;;  %4088 = vmatprep.subr.bf16.mxu1 %v4087_v8 }
  0x8a   : > { %297 = vst [vmem:[#allocation2 + $0x50] sm:$0x1] %v4845_v0  ;;  %298 = vst [vmem:[#allocation2 + $0x60] sm:$0x1] %v4845_v0  ;;  %v596_v15 = vld [vmem:[#allocation7 + $0x190] sm:$0xff]  ;;  %v597_v16 = vld [vmem:[#allocation7 + $0x198] sm:$0xff]  ;;  %4058 = vmatpush3.bf16.msra.mxu0 %v4057_v9  ;;  %v4059_v17 = vpack.c.bf16 %v565_v14, %v564_v12 }
  0x8b   : > { %299 = vst [vmem:[#allocation2 + $0x70] sm:$0x1] %v4845_v0  ;;  %300 = vst [vmem:[#allocation2 + $0x80] sm:$0x1] %v4845_v0  ;;  %v4091_v18 = vpack.c.bf16 %v597_v16, %v596_v15  ;;  %v548_v19 = vld [vmem:[#allocation7 + $0x10] sm:$0xff]  ;;  %v549_v20 = vld [vmem:[#allocation7 + $0x18] sm:$0xff]  ;;  %4090 = vmatpush3.bf16.msra.mxu1 %v4089_v13 }
  0x8c   : > { %303 = vst [vmem:[#allocation2 + $0x19] sm:$0x1] %v4845_v0  ;;  %304 = vst [vmem:[#allocation2 + $0x29] sm:$0x1] %v4845_v0  ;;  %v580_v21 = vld [vmem:[#allocation7 + $0x110] sm:$0xff]  ;;  %v4061_v22 = vpack.c.bf16 %v549_v20, %v548_v19  ;;  %v581_v23 = vld [vmem:[#allocation7 + $0x118] sm:$0xff]  ;;  %4060 = vmatprep.subr.bf16.mxu0 %v4059_v17 }
  0x8d   : > { %305 = vst [vmem:[#allocation2 + $0x39] sm:$0x1] %v4845_v0  ;;  %306 = vst [vmem:[#allocation2 + $0x49] sm:$0x1] %v4845_v0  ;;  %v566_v24 = vld [vmem:[#allocation7 + $0xa0] sm:$0xff]  ;;  %v567_v25 = vld [vmem:[#allocation7 + $0xa8] sm:$0xff]  ;;  %4092 = vmatprep.subr.bf16.mxu1 %v4091_v18  ;;  %v4093_v26 = vpack.c.bf16 %v581_v23, %v580_v21 }
  0x8e   : > { %307 = vst [vmem:[#allocation2 + $0x59] sm:$0x1] %v4845_v0  ;;  %308 = vst [vmem:[#allocation2 + $0x69] sm:$0x1] %v4845_v0  ;;  %v4063_v27 = vpack.c.bf16 %v567_v25, %v566_v24  ;;  %v598_v28 = vld [vmem:[#allocation7 + $0x1a0] sm:$0xff]  ;;  %v599_v29 = vld [vmem:[#allocation7 + $0x1a8] sm:$0xff]  ;;  %4062 = vmatpush3.bf16.msra.mxu0 %v4061_v22 }
  0x8f   : > { %309 = vst [vmem:[#allocation2 + $0x79] sm:$0x1] %v4845_v0  ;;  %310 = vst [vmem:[#allocation2 + $0x89] sm:$0x1] %v4845_v0  ;;  %v550_v30 = vld [vmem:[#allocation7 + $0x20] sm:$0xff]  ;;  %v4095_v31 = vpack.c.bf16 %v599_v29, %v598_v28  ;;  %v551_v32 = vld [vmem:[#allocation7 + $0x28] sm:$0xff]  ;;  %4094 = vmatpush3.bf16.msra.mxu1 %v4093_v26 }
  0x90   : > { %292 = vst [vmem:[#allocation2] sm:$0x1] %v4845_v0  ;;  %302 = vst [vmem:[#allocation2 + $0x9] sm:$0x1] %v4845_v0  ;;  %v582_v33 = vld [vmem:[#allocation7 + $0x120] sm:$0xff]  ;;  %v583_v34 = vld [vmem:[#allocation7 + $0x128] sm:$0xff]  ;;  %v4065_v35 = vpack.c.bf16 %v551_v32, %v550_v30  ;;  %4064 = vmatprep.subr.bf16.mxu0 %v4063_v27 }
  0x91   : > { %301 = vst [vmem:[#allocation2 + $0x90] sm:$0x1] %v4845_v0  ;;  %311 = vst [vmem:[#allocation2 + $0x99] sm:$0x1] %v4845_v0  ;;  %v568_v36 = vld [vmem:[#allocation7 + $0xb0] sm:$0xff]  ;;  %v569_v37 = vld [vmem:[#allocation7 + $0xb8] sm:$0xff]  ;;  %v4097_v39 = vpack.c.bf16 %v583_v34, %v582_v33  ;;  %4096 = vmatprep.subr.bf16.mxu1 %v4095_v31 }
  0x92   : > { %v600_v38 = vld [vmem:[#allocation7 + $0x1b0] sm:$0xff]  ;;  %v4067_v40 = vpack.c.bf16 %v569_v37, %v568_v36  ;;  %v601_v41 = vld [vmem:[#allocation7 + $0x1b8] sm:$0xff]  ;;  %v570_v47 = vld [vmem:[#allocation7 + $0xc0] sm:$0xff]  ;;  %4066 = vmatpush3.bf16.msra.mxu0 %v4065_v35  ;;  %s4763_s9 = scalar_lea.vmem %s5486_s13, 1024  ;;  %s4846_s15 = smov [#allocation12]  }
  0x93   : > { %v552_v42 = vld [vmem:[#allocation7 + $0x30] sm:$0xff]  ;;  %v553_v43 = vld [vmem:[#allocation7 + $0x38] sm:$0xff]  ;;  %v4099_v44 = vpack.c.bf16 %v601_v41, %v600_v38  ;;  %v571_v48 = vld [vmem:[#allocation7 + $0xc8] sm:$0xff]  ;;  %4098 = vmatpush3.bf16.msra.mxu1 %v4097_v39  ;;  %p4764_p10 = scmp.ne.s32.totalorder %s5486_s13, %s4763_s9  ;;  %s4767_s17 = sshll.u32 %s4846_s15, 4  ;;  %s4768_s17 = int_to_ptr.vmem [resolvable:$false] %s4767_s17 }
  0x94   : > { %v584_v45 = vld [vmem:[#allocation7 + $0x130] sm:$0xff]  ;;  %v585_v46 = vld [vmem:[#allocation7 + $0x138] sm:$0xff]  ;;  %v602_v49 = vld [vmem:[#allocation7 + $0x1c0] sm:$0xff]  ;;  %v4069_v51 = vpack.c.bf16 %v553_v43, %v552_v42  ;;  %4068 = vmatprep.subr.bf16.mxu0 %v4067_v40  ;;  %v4071_v53 = vpack.c.bf16 %v571_v48, %v570_v47  ;;  %s4769_s10 = scalar_lea.vmem %s4768_s17, 2048  ;;  %p4770_p12 = scmp.lt.s32.totalorder %s5486_s13, %s4768_s17 }
  0x95   : > { %v603_v50 = vld [vmem:[#allocation7 + $0x1c8] sm:$0xff]  ;;  %v4101_v52 = vpack.c.bf16 %v585_v46, %v584_v45  ;;  %v554_v54 = vld [vmem:[#allocation7 + $0x40] sm:$0xff]  ;;  %4100 = vmatprep.subr.bf16.mxu1 %v4099_v44  ;;  %v572_v59 = vld [vmem:[#allocation7 + $0xd0] sm:$0xff]  ;;  %p4765_p3 = pnand %p4764_p10, %p5033_p5  ;;  %p4771_p1 = scmp.lt.s32.totalorder %s4769_s10, %s4763_s9 }
  0x96   : > { %v555_v55 = vld [vmem:[#allocation7 + $0x48] sm:$0xff]  ;;  %v586_v56 = vld [vmem:[#allocation7 + $0x140] sm:$0xff]  ;;  %v4103_v57 = vpack.c.bf16 %v603_v50, %v602_v49  ;;  %v573_v60 = vld [vmem:[#allocation7 + $0xd8] sm:$0xff]  ;;  %4070 = vmatpush3.bf16.msra.mxu0 %v4069_v51 }
  0x97   : > { %v587_v58 = vld [vmem:[#allocation7 + $0x148] sm:$0xff]  ;;  %v604_v61 = vld [vmem:[#allocation7 + $0x1d0] sm:$0xff]  ;;  %v605_v62 = vld [vmem:[#allocation7 + $0x1d8] sm:$0xff]  ;;  %v4073_v63 = vpack.c.bf16 %v555_v55, %v554_v54  ;;  %4102 = vmatpush3.bf16.msra.mxu1 %v4101_v52  ;;  %4072 = vmatprep.subr.bf16.mxu0 %v4071_v53  ;;  %v4075_v1 = vpack.c.bf16 %v573_v60, %v572_v59  ;;  %p4766_p7 = pneg %p4765_p3  ;;  %p4772_p2 = por %p4771_p1, %p4770_p12 }
  0x98   : > { %v4105_v0 = vpack.c.bf16 %v587_v58, %v586_v56  ;;  %v556_v2 = vld [vmem:[#allocation7 + $0x50] sm:$0xff]  ;;  %v557_v3 = vld [vmem:[#allocation7 + $0x58] sm:$0xff]  ;;  %4104 = vmatprep.subr.bf16.mxu1 %v4103_v57  ;;  %v4107_v5 = vpack.c.bf16 %v605_v62, %v604_v61  ;;  %v574_v7 = vld [vmem:[#allocation7 + $0xe0] sm:$0xff] }
  0x99   : > { %v588_v4 = vld [vmem:[#allocation7 + $0x150] sm:$0xff]  ;;  %v589_v6 = vld [vmem:[#allocation7 + $0x158] sm:$0xff]  ;;  %v575_v8 = vld [vmem:[#allocation7 + $0xe8] sm:$0xff]  ;;  %v4077_v11 = vpack.c.bf16 %v557_v3, %v556_v2  ;;  %p4773_p4 = pnand %p4772_p2, %p4766_p7 }
  0x9a   : > { %v606_v9 = vld [vmem:[#allocation7 + $0x1e0] sm:$0xff]  ;;  %v607_v10 = vld [vmem:[#allocation7 + $0x1e8] sm:$0xff]  ;;  %4074 = vmatpush3.bf16.msra.mxu0 %v4073_v63  ;;  %v4109_v14 = vpack.c.bf16 %v589_v6, %v588_v4  ;;  %v4079_v15 = vpack.c.bf16 %v575_v8, %v574_v7  ;;  %v576_v21 = vld [vmem:[#allocation7 + $0xf0] sm:$0xff] }
  0x9b   : > { %v558_v12 = vld [vmem:[#allocation7 + $0x60] sm:$0xff]  ;;  %v559_v13 = vld [vmem:[#allocation7 + $0x68] sm:$0xff]  ;;  %4106 = vmatpush3.bf16.msra.mxu1 %v4105_v0  ;;  %4076 = vmatprep.subr.bf16.mxu0 %v4075_v1  ;;  %v4111_v19 = vpack.c.bf16 %v607_v10, %v606_v9  ;;  %v577_v22 = vld [vmem:[#allocation7 + $0xf8] sm:$0xff] }
  0x9c   : > { %v590_v16 = vld [vmem:[#allocation7 + $0x160] sm:$0xff]  ;;  %4108 = vmatprep.subr.bf16.mxu1 %v4107_v5  ;;  %v591_v20 = vld [vmem:[#allocation7 + $0x168] sm:$0xff]  ;;  %v608_v23 = vld [vmem:[#allocation7 + $0x1f0] sm:$0xff]  ;;  %v4081_v25 = vpack.c.bf16 %v559_v13, %v558_v12  ;;  %v4083_v28 = vpack.c.bf16 %v577_v22, %v576_v21 }
  0x9d   : > { %v345_v17 = vld [vmem:[#allocation2 + $0x1] sm:$0xff]  ;;  %v609_v24 = vld [vmem:[#allocation7 + $0x1f8] sm:$0xff]  ;;  %v4113_v27 = vpack.c.bf16 %v591_v20, %v590_v16  ;;  %v560_v29 = vld [vmem:[#allocation7 + $0x70] sm:$0xff] }
  0x9e   : > { %v5105_v18 = vld [vmem:[%s5090_s6] sm:$0xff]  ;;  %754 = vmatprep.mubr.f32.mxu0 %v345_v17  ;;  %4078 = vmatpush3.bf16.msra.mxu0 %v4077_v11  ;;  %v5109_v26 = vld [vmem:[%s5090_s6 + $0x8] sm:$0xff]  ;;  %v561_v30 = vld [vmem:[#allocation7 + $0x78] sm:$0xff]  ;;  %v4115_v32 = vpack.c.bf16 %v609_v24, %v608_v23 }
  0x9f   : > { %321 = vst [vmem:[#allocation2 + $0x11] sm:$0xff] %v5105_v18  ;;  %4110 = vmatpush3.bf16.msra.mxu1 %v4109_v14  ;;  %4080 = vmatprep.subr.bf16.mxu0 %v4079_v15  ;;  %v592_v31 = vld [vmem:[#allocation7 + $0x170] sm:$0xff]  ;;  %322 = vst [vmem:[#allocation2 + $0x21] sm:$0xff] %v5109_v26  ;;  %v593_v33 = vld [vmem:[#allocation7 + $0x178] sm:$0xff]  ;;  %v4085_v39 = vpack.c.bf16 %v561_v30, %v560_v29 }
  0xa0   : > { %4112 = vmatprep.subr.bf16.mxu1 %v4111_v19  ;;  %v626_v34 = vld [vmem:[#allocation7 + $0x280] sm:$0xff]  ;;  %v627_v35 = vld [vmem:[#allocation7 + $0x288] sm:$0xff]  ;;  %v5113_v38 = vld [vmem:[%s5090_s6 + $0x10] sm:$0xff]  ;;  %v4117_v40 = vpack.c.bf16 %v593_v33, %v592_v31 }
  0xa1   : > { %v658_v36 = vld [vmem:[#allocation7 + $0x380] sm:$0xff]  ;;  %v659_v37 = vld [vmem:[#allocation7 + $0x388] sm:$0xff]  ;;  %323 = vst [vmem:[#allocation2 + $0x31] sm:$0xff] %v5113_v38  ;;  %v4119_v42 = vpack.c.bf16 %v627_v35, %v626_v34  ;;  %v628_v48 = vld [vmem:[#allocation7 + $0x290] sm:$0xff] }
  0xa2   : > { %4082 = vmatpush3.bf16.msra.mxu0 %v4081_v25  ;;  %v610_v43 = vld [vmem:[#allocation7 + $0x200] sm:$0xff]  ;;  %v611_v44 = vld [vmem:[#allocation7 + $0x208] sm:$0xff]  ;;  %v4151_v45 = vpack.c.bf16 %v659_v37, %v658_v36  ;;  %v629_v49 = vld [vmem:[#allocation7 + $0x298] sm:$0xff] }
  0xa3   : > { %4114 = vmatpush3.bf16.msra.mxu1 %v4113_v27  ;;  %4084 = vmatprep.subr.bf16.mxu0 %v4083_v28  ;;  %v642_v46 = vld [vmem:[#allocation7 + $0x300] sm:$0xff]  ;;  %v643_v47 = vld [vmem:[#allocation7 + $0x308] sm:$0xff]  ;;  %v5117_v50 = vld [vmem:[%s5090_s6 + $0x18] sm:$0xff]  ;;  %v4121_v52 = vpack.c.bf16 %v611_v44, %v610_v43  ;;  %v4123_v60 = vpack.c.bf16 %v629_v49, %v628_v48 }
  0xa4   : > { %4116 = vmatprep.subr.bf16.mxu1 %v4115_v32  ;;  %v329_v51 = vld [vmem:[#allocation2] sm:$0xff]  ;;  %v660_v53 = vld [vmem:[#allocation7 + $0x390] sm:$0xff]  ;;  %v661_v54 = vld [vmem:[#allocation7 + $0x398] sm:$0xff]  ;;  %324 = vst [vmem:[#allocation2 + $0x41] sm:$0xff] %v5117_v50  ;;  %v4153_v59 = vpack.c.bf16 %v643_v47, %v642_v46 }
  0xa5   : > { %v361_v55 = vld [vmem:[#allocation2 + $0x2] sm:$0xff]  ;;  %v612_v56 = vld [vmem:[#allocation7 + $0x210] sm:$0xff]  ;;  %v613_v57 = vld [vmem:[#allocation7 + $0x218] sm:$0xff]  ;;  %v4155_v63 = vpack.c.bf16 %v661_v54, %v660_v53 }
  0xa6   : > { %v377_v41 = vld [vmem:[#allocation2 + $0x10] sm:$0xff]  ;;  %4086 = vmatpush3.bf16.msra.mxu0 %v4085_v39  ;;  %v5120_v58 = vld [vmem:[#allocation2 + $0x20] sm:$0xff]  ;;  %v645_v62 = vld [vmem:[#allocation7 + $0x318] sm:$0xff]  ;;  %v4125_v3 = vpack.c.bf16 %v613_v57, %v612_v56 }
  0xa7   : > { %859 = vmatprep.mubr.f32.mxu1 %v377_v41  ;;  %4118 = vmatpush3.bf16.msra.mxu1 %v4117_v40  ;;  %v644_v61 = vld [vmem:[#allocation7 + $0x310] sm:$0xff]  ;;  %v630_v0 = vld [vmem:[#allocation7 + $0x2a0] sm:$0xff]  ;;  %v631_v1 = vld [vmem:[#allocation7 + $0x2a8] sm:$0xff] }
  0xa8   : > { %4120 = vmatprep.subr.bf16.mxu0 %v4119_v42  ;;  %4152 = vmatprep.subr.bf16.mxu1 %v4151_v45  ;;  %v5123_v2 = vld [vmem:[%s5090_s6 + $0x20] sm:$0xff]  ;;  %v663_v5 = vld [vmem:[#allocation7 + $0x3a8] sm:$0xff]  ;;  %v5128_v6 = vld [vmem:[#allocation2 + $0x12] sm:$0xff]  ;;  %v4157_v10 = vpack.c.bf16 %v645_v62, %v644_v61  ;;  %v4127_v11 = vpack.c.bf16 %v631_v1, %v630_v0 }
  0xa9   : > { %755 = vmatmul.mubr.f32.vlgmr.msra.gmra.mrb[0].mxu0 %v329_v51  ;;  %v662_v4 = vld [vmem:[#allocation7 + $0x3a0] sm:$0xff]  ;;  %325 = vst [vmem:[#allocation2 + $0x51] sm:$0xff] %v5123_v2  ;;  %v615_v8 = vld [vmem:[#allocation7 + $0x228] sm:$0xff]  ;;  %v5130_v9 = vld [vmem:[#allocation2 + $0x30] sm:$0xff] }
  0xaa   : > { %860 = vmatmul.mubr.f32.vlgmr.msra.gmra.mrb[0].mxu1 %v361_v55  ;;  %4122 = vmatpush3.bf16.msra.mxu0 %v4121_v52  ;;  %v614_v7 = vld [vmem:[#allocation7 + $0x220] sm:$0xff]  ;;  %v5133_v13 = vld [vmem:[%s5090_s6 + $0x28] sm:$0xff]  ;;  %v4159_v14 = vpack.c.bf16 %v663_v5, %v662_v4  ;;  %v632_v16 = vld [vmem:[#allocation7 + $0x2b0] sm:$0xff] }
  0xab   : > { %759 = vmatprep.mubr.f32.mxu0 %v5105_v18  ;;  %864 = vmatprep.mubr.f32.mxu1 %v5120_v58  ;;  %v646_v12 = vld [vmem:[#allocation7 + $0x320] sm:$0xff]  ;;  %v647_v15 = vld [vmem:[#allocation7 + $0x328] sm:$0xff]  ;;  %v633_v17 = vld [vmem:[#allocation7 + $0x2b8] sm:$0xff]  ;;  %326 = vst [vmem:[#allocation2 + $0x61] sm:$0xff] %v5133_v13  ;;  %v4129_v19 = vpack.c.bf16 %v615_v8, %v614_v7 }
  0xac   : > { %4154 = vmatpush3.bf16.msra.mxu1 %v4153_v59  ;;  %4124 = vmatprep.subr.bf16.mxu0 %v4123_v60  ;;  %v664_v20 = vld [vmem:[#allocation7 + $0x3b0] sm:$0xff]  ;;  %v665_v21 = vld [vmem:[#allocation7 + $0x3b8] sm:$0xff]  ;;  %v5139_v22 = vld [vmem:[#allocation2 + $0x22] sm:$0xff]  ;;  %v4161_v27 = vpack.c.bf16 %v647_v15, %v646_v12  ;;  %v4131_v28 = vpack.c.bf16 %v633_v17, %v632_v16 }
  0xad   : > { %760 = vmatmul.mubr.f32.gmra.mrb[2].mxu0 %v377_v41  ;;  %4156 = vmatprep.subr.bf16.mxu1 %v4155_v63  ;;  %v616_v23 = vld [vmem:[#allocation7 + $0x230] sm:$0xff]  ;;  %v617_v24 = vld [vmem:[#allocation7 + $0x238] sm:$0xff]  ;;  %v5141_v25 = vld [vmem:[#allocation2 + $0x40] sm:$0xff]  ;;  %v4163_v31 = vpack.c.bf16 %v665_v21, %v664_v20 }
  0xae   : > { %865 = vmatmul.mubr.f32.gmra.mrb[2].mxu1 %v5128_v6  ;;  %4126 = vmatpush3.bf16.msra.mxu0 %v4125_v3  ;;  %v648_v29 = vld [vmem:[#allocation7 + $0x330] sm:$0xff]  ;;  %v649_v32 = vld [vmem:[#allocation7 + $0x338] sm:$0xff]  ;;  %v634_v33 = vld [vmem:[#allocation7 + $0x2c0] sm:$0xff]  ;;  %v4133_v35 = vpack.c.bf16 %v617_v24, %v616_v23 }
  0xaf   : > { %764 = vmatprep.mubr.f32.mxu0 %v5109_v26  ;;  %869 = vmatprep.mubr.f32.mxu1 %v5130_v9  ;;  %v5144_v30 = vld [vmem:[%s5090_s6 + $0x30] sm:$0xff]  ;;  %v635_v34 = vld [vmem:[#allocation7 + $0x2c8] sm:$0xff]  ;;  %v666_v36 = vld [vmem:[#allocation7 + $0x3c0] sm:$0xff]  ;;  %v4165_v43 = vpack.c.bf16 %v649_v32, %v648_v29 }
  0xb0   : > { %4158 = vmatpush3.bf16.msra.mxu1 %v4157_v10  ;;  %4128 = vmatprep.subr.bf16.mxu0 %v4127_v11  ;;  %327 = vst [vmem:[#allocation2 + $0x71] sm:$0xff] %v5144_v30  ;;  %v667_v37 = vld [vmem:[#allocation7 + $0x3c8] sm:$0xff]  ;;  %v5151_v39 = vld [vmem:[#allocation2 + $0x32] sm:$0xff]  ;;  %v618_v40 = vld [vmem:[#allocation7 + $0x240] sm:$0xff]  ;;  %v4135_v44 = vpack.c.bf16 %v635_v34, %v634_v33 }
  0xb1   : > { %765 = vmatmul.mubr.f32.gmra.mrb[4].mxu0 %v5120_v58  ;;  %4160 = vmatprep.subr.bf16.mxu1 %v4159_v14  ;;  %v619_v41 = vld [vmem:[#allocation7 + $0x248] sm:$0xff]  ;;  %v5153_v42 = vld [vmem:[#allocation2 + $0x50] sm:$0xff]  ;;  %v650_v45 = vld [vmem:[#allocation7 + $0x340] sm:$0xff]  ;;  %v4167_v47 = vpack.c.bf16 %v667_v37, %v666_v36 }
  0xb2   : > { %870 = vmatmul.mubr.f32.gmra.mrb[4].mxu1 %v5139_v22  ;;  %4130 = vmatpush3.bf16.msra.mxu0 %v4129_v19  ;;  %v5156_v46 = vld [vmem:[%s5090_s6 + $0x38] sm:$0xff]  ;;  %v651_v48 = vld [vmem:[#allocation7 + $0x348] sm:$0xff]  ;;  %v636_v49 = vld [vmem:[#allocation7 + $0x2d0] sm:$0xff]  ;;  %v4137_v52 = vpack.c.bf16 %v619_v41, %v618_v40 }
  0xb3   : > { %769 = vmatprep.mubr.f32.mxu0 %v5113_v38  ;;  %874 = vmatprep.mubr.f32.mxu1 %v5141_v25  ;;  %v637_v51 = vld [vmem:[#allocation7 + $0x2d8] sm:$0xff]  ;;  %328 = vst [vmem:[#allocation2 + $0x81] sm:$0xff] %v5156_v46  ;;  %v668_v53 = vld [vmem:[#allocation7 + $0x3d0] sm:$0xff]  ;;  %v5163_v55 = vld [vmem:[#allocation2 + $0x42] sm:$0xff]  ;;  %v4169_v60 = vpack.c.bf16 %v651_v48, %v650_v45 }
  0xb4   : > { %4162 = vmatpush3.bf16.msra.mxu1 %v4161_v27  ;;  %4132 = vmatprep.subr.bf16.mxu0 %v4131_v28  ;;  %v669_v54 = vld [vmem:[#allocation7 + $0x3d8] sm:$0xff]  ;;  %v620_v56 = vld [vmem:[#allocation7 + $0x250] sm:$0xff]  ;;  %v5165_v59 = vld [vmem:[#allocation2 + $0x60] sm:$0xff]  ;;  %v4139_v61 = vpack.c.bf16 %v637_v51, %v636_v49 }
  0xb5   : > { %770 = vmatmul.mubr.f32.gmra.mrb[6].mxu0 %v5130_v9  ;;  %4164 = vmatprep.subr.bf16.mxu1 %v4163_v31  ;;  %v621_v57 = vld [vmem:[#allocation7 + $0x258] sm:$0xff]  ;;  %v652_v62 = vld [vmem:[#allocation7 + $0x350] sm:$0xff]  ;;  %v4171_v63 = vpack.c.bf16 %v669_v54, %v668_v53  ;;  %v638_v1 = vld [vmem:[#allocation7 + $0x2e0] sm:$0xff] }
  0xb6   : > { %875 = vmatmul.mubr.f32.gmra.mrb[6].mxu1 %v5151_v39  ;;  %4134 = vmatpush3.bf16.msra.mxu0 %v4133_v35  ;;  %v653_v0 = vld [vmem:[#allocation7 + $0x358] sm:$0xff]  ;;  %v639_v3 = vld [vmem:[#allocation7 + $0x2e8] sm:$0xff]  ;;  %v4141_v4 = vpack.c.bf16 %v621_v57, %v620_v56  ;;  %v670_v5 = vld [vmem:[#allocation7 + $0x3e0] sm:$0xff] }
  0xb7   : > { %774 = vmatprep.mubr.f32.mxu0 %v5117_v50  ;;  %879 = vmatprep.mubr.f32.mxu1 %v5153_v42  ;;  %v671_v7 = vld [vmem:[#allocation7 + $0x3e8] sm:$0xff]  ;;  %v5171_v8 = vld [vmem:[#allocation2 + $0x52] sm:$0xff]  ;;  %v622_v10 = vld [vmem:[#allocation7 + $0x260] sm:$0xff]  ;;  %v4173_v14 = vpack.c.bf16 %v653_v0, %v652_v62  ;;  %v4143_v15 = vpack.c.bf16 %v639_v3, %v638_v1 }
  0xb8   : > { %4166 = vmatpush3.bf16.msra.mxu1 %v4165_v43  ;;  %4136 = vmatprep.subr.bf16.mxu0 %v4135_v44  ;;  %v623_v11 = vld [vmem:[#allocation7 + $0x268] sm:$0xff]  ;;  %v5173_v12 = vld [vmem:[#allocation2 + $0x70] sm:$0xff]  ;;  %v654_v16 = vld [vmem:[#allocation7 + $0x360] sm:$0xff]  ;;  %v4175_v17 = vpack.c.bf16 %v671_v7, %v670_v5 }
  0xb9   : > { %775 = vmatmul.mubr.f32.gmra.mrb[8].mxu0 %v5141_v25  ;;  %4168 = vmatprep.subr.bf16.mxu1 %v4167_v47  ;;  %v655_v19 = vld [vmem:[#allocation7 + $0x368] sm:$0xff]  ;;  %v640_v20 = vld [vmem:[#allocation7 + $0x2f0] sm:$0xff]  ;;  %v641_v21 = vld [vmem:[#allocation7 + $0x2f8] sm:$0xff]  ;;  %v4145_v23 = vpack.c.bf16 %v623_v11, %v622_v10 }
  0xba   : > { %880 = vmatmul.mubr.f32.gmra.mrb[8].mxu1 %v5163_v55  ;;  %4138 = vmatpush3.bf16.msra.mxu0 %v4137_v52  ;;  %v672_v24 = vld [vmem:[#allocation7 + $0x3f0] sm:$0xff]  ;;  %v673_v27 = vld [vmem:[#allocation7 + $0x3f8] sm:$0xff]  ;;  %v5179_v28 = vld [vmem:[#allocation2 + $0x62] sm:$0xff]  ;;  %v4177_v33 = vpack.c.bf16 %v655_v19, %v654_v16  ;;  %v4147_v34 = vpack.c.bf16 %v641_v21, %v640_v20 }
  0xbb   : > { %779 = vmatprep.mubr.f32.mxu0 %v5123_v2  ;;  %884 = vmatprep.mubr.f32.mxu1 %v5165_v59  ;;  %v624_v29 = vld [vmem:[#allocation7 + $0x270] sm:$0xff]  ;;  %v625_v31 = vld [vmem:[#allocation7 + $0x278] sm:$0xff]  ;;  %v5181_v32 = vld [vmem:[#allocation2 + $0x80] sm:$0xff]  ;;  %v4179_v37 = vpack.c.bf16 %v673_v27, %v672_v24 }
  0xbc   : > { %4170 = vmatpush3.bf16.msra.mxu1 %v4169_v60  ;;  %4140 = vmatprep.subr.bf16.mxu0 %v4139_v61  ;;  %v674_v35 = vld [vmem:[#allocation7 + $0x400] sm:$0xff]  ;;  %v675_v36 = vld [vmem:[#allocation7 + $0x408] sm:$0xff]  ;;  %v656_v40 = vld [vmem:[#allocation7 + $0x370] sm:$0xff]  ;;  %v4149_v43 = vpack.c.bf16 %v625_v31, %v624_v29 }
  0xbd   : > { %780 = vmatmul.mubr.f32.gmra.mrb[10].mxu0 %v5153_v42  ;;  %4172 = vmatprep.subr.bf16.mxu1 %v4171_v63  ;;  %v657_v41 = vld [vmem:[#allocation7 + $0x378] sm:$0xff]  ;;  %v4183_v45 = vpack.c.bf16 %v675_v36, %v674_v35  ;;  %v676_v48 = vld [vmem:[#allocation7 + $0x410] sm:$0xff]  ;;  %v678_v52 = vld [vmem:[#allocation7 + $0x420] sm:$0xff] }
  0xbe   : > { %885 = vmatmul.mubr.f32.gmra.mrb[10].mxu1 %v5171_v8  ;;  %4142 = vmatpush3.bf16.msra.mxu0 %v4141_v4  ;;  %v5187_v44 = vld [vmem:[#allocation2 + $0x72] sm:$0xff]  ;;  %v4181_v47 = vpack.c.bf16 %v657_v41, %v656_v40  ;;  %v679_v53 = vld [vmem:[#allocation7 + $0x428] sm:$0xff]  ;;  %v682_v60 = vld [vmem:[#allocation7 + $0x440] sm:$0xff] }
  0xbf   : > { %784 = vmatprep.mubr.f32.mxu0 %v5133_v13  ;;  %889 = vmatprep.mubr.f32.mxu1 %v5173_v12  ;;  %v677_v49 = vld [vmem:[#allocation7 + $0x418] sm:$0xff]  ;;  %v4191_v54 = vpack.c.bf16 %v679_v53, %v678_v52  ;;  %v680_v56 = vld [vmem:[#allocation7 + $0x430] sm:$0xff]  ;;  %v683_v61 = vld [vmem:[#allocation7 + $0x448] sm:$0xff] }
  0xc0   : > { %4174 = vmatpush3.bf16.msra.mxu1 %v4173_v14  ;;  %4144 = vmatprep.subr.bf16.mxu0 %v4143_v15  ;;  %v4187_v51 = vpack.c.bf16 %v677_v49, %v676_v48  ;;  %v684_v62 = vld [vmem:[#allocation7 + $0x450] sm:$0xff]  ;;  %v685_v63 = vld [vmem:[#allocation7 + $0x458] sm:$0xff]  ;;  %v686_v0 = vld [vmem:[#allocation7 + $0x460] sm:$0xff] }
  0xc1   : > { %785 = vmatmul.mubr.f32.gmra.mrb[12].mxu0 %v5165_v59  ;;  %4176 = vmatprep.subr.bf16.mxu1 %v4175_v17  ;;  %v687_v1 = vld [vmem:[#allocation7 + $0x468] sm:$0xff]  ;;  %v688_v3 = vld [vmem:[#allocation7 + $0x470] sm:$0xff]  ;;  %v689_v4 = vld [vmem:[#allocation7 + $0x478] sm:$0xff] }
  0xc2   : > { %890 = vmatmul.mubr.f32.gmra.mrb[12].mxu1 %v5179_v28  ;;  %4146 = vmatpush3.bf16.msra.mxu0 %v4145_v23  ;;  %v4211_v5 = vpack.c.bf16 %v689_v4, %v688_v3  ;;  %v433_v7 = vld [vmem:[#allocation2 + $0x90] sm:$0xff]  ;;  %v1463_v11 = vld [vmem:[#allocation9 + $0x80] sm:$0xff]  ;;  %v1448_v16 = vld [vmem:[#allocation9 + $0x8] sm:$0xff] }
  0xc3   : > { %789 = vmatprep.mubr.f32.mxu0 %v5144_v30  ;;  %894 = vmatprep.mubr.f32.mxu1 %v5181_v32  ;;  %v465_v10 = vld [vmem:[#allocation2 + $0x92] sm:$0xff]  ;;  %v1447_v15 = vld [vmem:[#allocation9] sm:$0xff]  ;;  %v1468_v23 = vld [vmem:[#allocation9 + $0xa8] sm:$0xff] }
  0xc4   : > { %4178 = vmatpush3.bf16.msra.mxu1 %v4177_v33  ;;  %4148 = vmatprep.subr.bf16.mxu0 %v4147_v34  ;;  %v1466_v17 = vld [vmem:[#allocation9 + $0x98] sm:$0xff]  ;;  %v1449_v19 = vld [vmem:[#allocation9 + $0x10] sm:$0xff]  ;;  %v1467_v21 = vld [vmem:[#allocation9 + $0xa0] sm:$0xff] }
  0xc5   : > { %790 = vmatmul.mubr.f32.gmra.mrb[14].mxu0 %v5173_v12  ;;  %4180 = vmatprep.subr.bf16.mxu1 %v4179_v37  ;;  %v4223_v24 = vpack.c.bf16 %v1468_v23, %v1467_v21  ;;  %v1451_v27 = vld [vmem:[#allocation9 + $0x20] sm:$0xff]  ;;  %v1496_v31 = vld [vmem:[#allocation9 + $0x188] sm:$0xff]  ;;  %v1469_v37 = vld [vmem:[#allocation9 + $0xb0] sm:$0xff] }
  0xc6   : > { %895 = vmatmul.mubr.f32.gmra.mrb[14].mxu1 %v5187_v44  ;;  %4150 = vmatpush3.bf16.msra.mxu0 %v4149_v43  ;;  %v1495_v29 = vld [vmem:[#allocation9 + $0x180] sm:$0xff]  ;;  %v1480_v35 = vld [vmem:[#allocation9 + $0x108] sm:$0xff]  ;;  %v1470_v40 = vld [vmem:[#allocation9 + $0xb8] sm:$0xff] }
  0xc7   : > { %964 = vmatprep.mubr.f32.mxu0 %v5128_v6  ;;  %4184 = vmatprep.subr.bf16.mxu0 %v4183_v45  ;;  %v681_v6 = vld [vmem:[#allocation7 + $0x438] sm:$0xff]  ;;  %v4247_v33 = vpack.c.bf16 %v1496_v31, %v1495_v29  ;;  %v1479_v34 = vld [vmem:[#allocation9 + $0x100] sm:$0xff]  ;;  %v4227_v41 = vpack.c.bf16 %v1470_v40, %v1469_v37  ;;  %v1453_v43 = vld [vmem:[#allocation9 + $0x30] sm:$0xff] }
  0xc8   : > { %4182 = vmatpush3.bf16.msra.mxu1 %v4181_v47  ;;  %1069 = vmatprep.mubr.f32.mxu1 %v5109_v26  ;;  %v4195_v57 = vpack.c.bf16 %v681_v6, %v680_v56  ;;  %v4249_v36 = vpack.c.bf16 %v1480_v35, %v1479_v34  ;;  %v1498_v47 = vld [vmem:[#allocation9 + $0x198] sm:$0xff]  ;;  %v1472_v56 = vld [vmem:[#allocation9 + $0xc8] sm:$0xff]  ;;  %v1487_v23 = vld [vmem:[#allocation9 + $0x140] sm:$0xff] }
  0xc9   : > { %965 = vmatmul.mubr.f32.vlgmr.msra.gmra.mrb[16].mxu0 %v5105_v18  ;;  %v1482_v52 = vld [vmem:[#allocation9 + $0x118] sm:$0xff]  ;;  %v1505_v34 = vld [vmem:[#allocation9 + $0x1d0] sm:$0xff] }
  0xca   : > { %4186 = vmatpush3.bf16.msra.mxu0 %v4183_v45  ;;  %969 = vmatprep.mubr.f32.mxu0 %v5139_v22  ;;  %v1497_v45 = vld [vmem:[#allocation9 + $0x190] sm:$0xff]  ;;  %v1474_v3 = vld [vmem:[#allocation9 + $0xd8] sm:$0xff] }
  0xcb   : > { %1070 = vmatmul.mubr.f32.vlgmr.msra.gmra.mrb[16].mxu1 %v5120_v58  ;;  %4188 = vmatprep.subr.bf16.mxu0 %v4187_v51  ;;  %v4199_v58 = vpack.c.bf16 %v683_v61, %v682_v60  ;;  %v4251_v49 = vpack.c.bf16 %v1498_v47, %v1497_v45  ;;  %v1456_v60 = vld [vmem:[#allocation9 + $0x48] sm:$0xff]  ;;  %v1499_v61 = vld [vmem:[#allocation9 + $0x1a0] sm:$0xff]  ;;  %v1478_v29 = vld [vmem:[#allocation9 + $0xf8] sm:$0xff] }
  0xcc   : > { %1074 = vmatprep.mubr.f32.mxu1 %v5113_v38  ;;  %v1506_v35 = vld [vmem:[#allocation9 + $0x1d8] sm:$0xff]  ;;  %v1489_v40 = vld [vmem:[#allocation9 + $0x150] sm:$0xff]  ;;  %v1507_v45 = vld [vmem:[#allocation9 + $0x1e0] sm:$0xff] }
  0xcd   : > { %970 = vmatmul.mubr.f32.gmra.mrb[18].mxu0 %v5109_v26  ;;  %v4267_v37 = vpack.c.bf16 %v1506_v35, %v1505_v34  ;;  %v1508_v47 = vld [vmem:[#allocation9 + $0x1e8] sm:$0xff]  ;;  %v1521_v35 = vld [vmem:[#allocation9 + $0x250] sm:$0xff] }
  0xce   : > { %4190 = vmatpush3.bf16.msra.mxu0 %v4187_v51  ;;  %974 = vmatprep.mubr.f32.mxu0 %v5151_v39  ;;  %v1481_v51 = vld [vmem:[#allocation9 + $0x110] sm:$0xff] }
  0xcf   : > { %1075 = vmatmul.mubr.f32.gmra.mrb[18].mxu1 %v5130_v9  ;;  %4192 = vmatprep.subr.bf16.mxu0 %v4191_v54  ;;  %v4203_v9 = vpack.c.bf16 %v685_v63, %v684_v62  ;;  %v4253_v53 = vpack.c.bf16 %v1482_v52, %v1481_v51  ;;  %v1491_v51 = vld [vmem:[#allocation9 + $0x160] sm:$0xff]  ;;  %v1492_v52 = vld [vmem:[#allocation9 + $0x168] sm:$0xff] }
  0xd0   : > { %1079 = vmatprep.mubr.f32.mxu1 %v5117_v50 }
  0xd1   : > { %975 = vmatmul.mubr.f32.gmra.mrb[20].mxu0 %v5113_v38 }
  0xd2   : > { %4194 = vmatpush3.bf16.msra.mxu0 %v4191_v54  ;;  %979 = vmatprep.mubr.f32.mxu0 %v5163_v55  ;;  %v1471_v54 = vld [vmem:[#allocation9 + $0xc0] sm:$0xff] }
  0xd3   : > { %1080 = vmatmul.mubr.f32.gmra.mrb[20].mxu1 %v5141_v25  ;;  %4196 = vmatprep.subr.bf16.mxu0 %v4195_v57  ;;  %v4207_v25 = vpack.c.bf16 %v687_v1, %v686_v0  ;;  %v4231_v6 = vpack.c.bf16 %v1472_v56, %v1471_v54  ;;  %v1484_v0 = vld [vmem:[#allocation9 + $0x128] sm:$0xff]  ;;  %v1527_v54 = vld [vmem:[#allocation9 + $0x280] sm:$0xff] }
  0xd4   : > { %1084 = vmatprep.mubr.f32.mxu1 %v5123_v2  ;;  %v1528_v56 = vld [vmem:[#allocation9 + $0x288] sm:$0xff] }
  0xd5   : > { %980 = vmatmul.mubr.f32.gmra.mrb[22].mxu0 %v5117_v50 }
  0xd6   : > { %4198 = vmatpush3.bf16.msra.mxu0 %v4195_v57  ;;  %984 = vmatprep.mubr.f32.mxu0 %v5171_v8  ;;  %v1455_v57 = vld [vmem:[#allocation9 + $0x40] sm:$0xff] }
  0xd7   : > { %1085 = vmatmul.mubr.f32.gmra.mrb[22].mxu1 %v5153_v42  ;;  %4200 = vmatprep.subr.bf16.mxu0 %v4199_v58  ;;  %v416_v42 = vld [vmem:[#allocation2 + $0x82] sm:$0xff]  ;;  %v4233_v62 = vpack.c.bf16 %v1456_v60, %v1455_v57  ;;  %v1510_v57 = vld [vmem:[#allocation9 + $0x1f8] sm:$0xff]  ;;  %v4279_v60 = vpack.c.bf16 %v1528_v56, %v1527_v54 }
  0xd8   : > { %1089 = vmatprep.mubr.f32.mxu1 %v5133_v13  ;;  %v1575_v56 = vld [vmem:[#allocation9 + $0x400] sm:$0xff] }
  0xd9   : > { %985 = vmatmul.mubr.f32.gmra.mrb[24].mxu0 %v5123_v2 }
  0xda   : > { %4202 = vmatpush3.bf16.msra.mxu0 %v4199_v58  ;;  %989 = vmatprep.mubr.f32.mxu0 %v5179_v28  ;;  %v1500_v58 = vld [vmem:[#allocation9 + $0x1a8] sm:$0xff] }
  0xdb   : > { %1090 = vmatmul.mubr.f32.gmra.mrb[24].mxu1 %v5165_v59  ;;  %4204 = vmatprep.subr.bf16.mxu0 %v4203_v9  ;;  %v449_v59 = vld [vmem:[#allocation2 + $0x91] sm:$0xff]  ;;  %v4255_v63 = vpack.c.bf16 %v1500_v58, %v1499_v61  ;;  %v1511_v61 = vld [vmem:[#allocation9 + $0x200] sm:$0xff] }
  0xdc   : > { %1094 = vmatprep.mubr.f32.mxu1 %v5144_v30 }
  0xdd   : > { %990 = vmatmul.mubr.f32.gmra.mrb[26].mxu0 %v5133_v13 }
  0xde   : > { %4206 = vmatpush3.bf16.msra.mxu0 %v4203_v9  ;;  %994 = vmatprep.mubr.f32.mxu0 %v5187_v44  ;;  %v1483_v9 = vld [vmem:[#allocation9 + $0x120] sm:$0xff] }
  0xdf   : > { %1095 = vmatmul.mubr.f32.gmra.mrb[26].mxu1 %v5173_v12  ;;  %4208 = vmatprep.subr.bf16.mxu0 %v4207_v25  ;;  %v1464_v12 = vld [vmem:[#allocation9 + $0x88] sm:$0xff]  ;;  %v4257_v1 = vpack.c.bf16 %v1484_v0, %v1483_v9 }
  0xe0   : > { %1099 = vmatprep.mubr.f32.mxu1 %v5156_v46  ;;  %v4215_v14 = vpack.c.bf16 %v1464_v12, %v1463_v11  ;;  %v1485_v12 = vld [vmem:[#allocation9 + $0x130] sm:$0xff]  ;;  %v1512_v9 = vld [vmem:[#allocation9 + $0x208] sm:$0xff] }
  0xe1   : > { %995 = vmatmul.mubr.f32.gmra.mrb[28].mxu0 %v5144_v30 }
  0xe2   : > { %4210 = vmatpush3.bf16.msra.mxu0 %v4207_v25  ;;  %999 = vmatprep.mubr.f32.mxu0 %v416_v42  ;;  %v1473_v25 = vld [vmem:[#allocation9 + $0xd0] sm:$0xff] }
  0xe3   : > { %1100 = vmatmul.mubr.f32.gmra.mrb[28].mxu1 %v5181_v32  ;;  %4212 = vmatprep.subr.bf16.mxu0 %v4211_v5  ;;  %v4235_v4 = vpack.c.bf16 %v1474_v3, %v1473_v25  ;;  %v1529_v25 = vld [vmem:[#allocation9 + $0x290] sm:$0xff]  ;;  %v1530_v3 = vld [vmem:[#allocation9 + $0x298] sm:$0xff] }
  0xe4   : > { %1104 = vmatprep.mubr.f32.mxu1 %v449_v59  ;;  %4216 = vmatprep.subr.bf16.mxu1 %v4215_v14  ;;  %v1501_v59 = vld [vmem:[#allocation9 + $0x1b0] sm:$0xff]  ;;  %v1486_v14 = vld [vmem:[#allocation9 + $0x138] sm:$0xff] }
  0xe5   : > { %1000 = vmatmul.mubr.f32.gmra.mrb[30].mxu0 %v5156_v46 }
  0xe6   : > { %4214 = vmatpush3.bf16.msra.mxu0 %v4211_v5  ;;  %3955 = vmatprep.mubr.f32.mxu0 %v5139_v22  ;;  %v4217_v22 = vpack.c.bf16 %v1448_v16, %v1447_v15  ;;  %v1458_v5 = vld [vmem:[#allocation9 + $0x58] sm:$0xff]  ;;  %v4261_v15 = vpack.c.bf16 %v1486_v14, %v1485_v12  ;;  %v1475_v16 = vld [vmem:[#allocation9 + $0xe0] sm:$0xff]  ;;  %v1532_v14 = vld [vmem:[#allocation9 + $0x2a8] sm:$0xff] }
  0xe7   : > { %1105 = vmatmul.mubr.f32.gmra.mrb[30].mxu1 %v433_v7  ;;  %4248 = vmatprep.subr.bf16.mxu0 %v4247_v33  ;;  %v1502_v7 = vld [vmem:[#allocation9 + $0x1b8] sm:$0xff]  ;;  %v1531_v12 = vld [vmem:[#allocation9 + $0x2a0] sm:$0xff] }
  0xe8   : > { %4218 = vmatpush3.bf16.msra.mxu1 %v4217_v22  ;;  %v4259_v11 = vpack.c.bf16 %v1502_v7, %v1501_v59  ;;  %v1476_v22 = vld [vmem:[#allocation9 + $0xe8] sm:$0xff]  ;;  %v1462_v33 = vld [vmem:[#allocation9 + $0x78] sm:$0xff]  ;;  %v1513_v59 = vld [vmem:[#allocation9 + $0x210] sm:$0xff] }
  0xe9   : > { %3956 = vmatmul.mubr.f32.vlgmr.msra.gmra.mrb[32].mxu0 %v5151_v39  ;;  %v1465_v39 = vld [vmem:[#allocation9 + $0x90] sm:$0xff] }
  0xea   : > { %3958 = vmatprep.mubr.f32.mxu0 %v5163_v55  ;;  %v4219_v55 = vpack.c.bf16 %v1466_v17, %v1465_v39  ;;  %4250 = vmatpush3.bf16.msra.mxu0 %v4249_v36  ;;  %v4239_v39 = vpack.c.bf16 %v1476_v22, %v1475_v16  ;;  %v1459_v17 = vld [vmem:[#allocation9 + $0x60] sm:$0xff]  ;;  %v1516_v22 = vld [vmem:[#allocation9 + $0x228] sm:$0xff] }
  0xeb   : > { %4252 = vmatprep.subr.bf16.mxu0 %v4251_v49  ;;  %v4271_v49 = vpack.c.bf16 %v1508_v47, %v1507_v45  ;;  %v1515_v16 = vld [vmem:[#allocation9 + $0x220] sm:$0xff]  ;;  %v1524_v45 = vld [vmem:[#allocation9 + $0x268] sm:$0xff] }
  0xec   : > { %4220 = vmatprep.subr.bf16.mxu1 %v4219_v55  ;;  %v1460_v55 = vld [vmem:[#allocation9 + $0x68] sm:$0xff] }
  0xed   : > { %3959 = vmatmul.mubr.f32.gmra.mrb[34].mxu0 %v5171_v8  ;;  %v1450_v8 = vld [vmem:[#allocation9 + $0x18] sm:$0xff] }
  0xee   : > { %3961 = vmatprep.mubr.f32.mxu0 %v5179_v28  ;;  %v4221_v20 = vpack.c.bf16 %v1450_v8, %v1449_v19  ;;  %v1452_v28 = vld [vmem:[#allocation9 + $0x28] sm:$0xff]  ;;  %4254 = vmatpush3.bf16.msra.mxu0 %v4253_v53  ;;  %v1503_v19 = vld [vmem:[#allocation9 + $0x1c0] sm:$0xff]  ;;  %v4273_v53 = vpack.c.bf16 %v1492_v52, %v1491_v51  ;;  %v1525_v52 = vld [vmem:[#allocation9 + $0x270] sm:$0xff] }
  0xef   : > { %v4225_v32 = vpack.c.bf16 %v1452_v28, %v1451_v27  ;;  %4256 = vmatprep.subr.bf16.mxu0 %v4255_v63  ;;  %v1504_v8 = vld [vmem:[#allocation9 + $0x1c8] sm:$0xff]  ;;  %v1477_v28 = vld [vmem:[#allocation9 + $0xf0] sm:$0xff]  ;;  %v1494_v63 = vld [vmem:[#allocation9 + $0x178] sm:$0xff] }
  0xf0   : > { %4222 = vmatpush3.bf16.msra.mxu1 %v4221_v20  ;;  %v4241_v20 = vpack.c.bf16 %v1460_v55, %v1459_v17  ;;  %v4263_v21 = vpack.c.bf16 %v1504_v8, %v1503_v19  ;;  %v4243_v31 = vpack.c.bf16 %v1478_v29, %v1477_v28  ;;  %v1533_v17 = vld [vmem:[#allocation9 + $0x2b0] sm:$0xff]  ;;  %v1534_v55 = vld [vmem:[#allocation9 + $0x2b8] sm:$0xff]  ;;  %v1519_v28 = vld [vmem:[#allocation9 + $0x240] sm:$0xff] }
  0xf1   : > { %3962 = vmatmul.mubr.f32.gmra.mrb[36].mxu0 %v5187_v44  ;;  %4224 = vmatprep.subr.bf16.mxu1 %v4223_v24  ;;  %v1454_v44 = vld [vmem:[#allocation9 + $0x38] sm:$0xff]  ;;  %v1488_v24 = vld [vmem:[#allocation9 + $0x148] sm:$0xff]  ;;  %v4291_v19 = vpack.c.bf16 %v1534_v55, %v1533_v17  ;;  %v1517_v8 = vld [vmem:[#allocation9 + $0x230] sm:$0xff] }
  0xf2   : > { %3964 = vmatprep.mubr.f32.mxu0 %v416_v42  ;;  %v4229_v48 = vpack.c.bf16 %v1454_v44, %v1453_v43  ;;  %v1457_v42 = vld [vmem:[#allocation9 + $0x50] sm:$0xff]  ;;  %4258 = vmatpush3.bf16.msra.mxu0 %v4257_v1  ;;  %v4265_v27 = vpack.c.bf16 %v1488_v24, %v1487_v23  ;;  %v1247_v44 = vld [vmem:[#allocation2 + $0x1] sm:$0xff]  ;;  %v4281_v1 = vpack.c.bf16 %v1512_v9, %v1511_v61 }
  0xf3   : > { %4260 = vmatprep.subr.bf16.mxu0 %v4259_v11  ;;  %1655 = vmatprep.mubr.f32.mxu1 %v1247_v44  ;;  %v1535_v23 = vld [vmem:[#allocation9 + $0x2c0] sm:$0xff]  ;;  %v1536_v24 = vld [vmem:[#allocation9 + $0x2c8] sm:$0xff] }
  0xf4   : > { %4226 = vmatpush3.bf16.msra.mxu1 %v4225_v32  ;;  %v1461_v32 = vld [vmem:[#allocation9 + $0x70] sm:$0xff]  ;;  %v1520_v29 = vld [vmem:[#allocation9 + $0x248] sm:$0xff]  ;;  %v1523_v44 = vld [vmem:[#allocation9 + $0x260] sm:$0xff] }
  0xf5   : > { %3965 = vmatmul.mubr.f32.gmra.mrb[38].mxu0 %v465_v10  ;;  %4228 = vmatprep.subr.bf16.mxu1 %v4227_v41  ;;  %v4237_v10 = vpack.c.bf16 %v1458_v5, %v1457_v42  ;;  %v4245_v36 = vpack.c.bf16 %v1462_v33, %v1461_v32  ;;  %v1490_v41 = vld [vmem:[#allocation9 + $0x158] sm:$0xff]  ;;  %v1559_v42 = vld [vmem:[#allocation9 + $0x380] sm:$0xff]  ;;  %v1560_v5 = vld [vmem:[#allocation9 + $0x388] sm:$0xff]  ;;  %v4305_v47 = vpack.c.bf16 %v1524_v45, %v1523_v44 }
  0xf6   : > { %4262 = vmatpush3.bf16.msra.mxu0 %v4261_v15  ;;  %v4269_v43 = vpack.c.bf16 %v1490_v41, %v1489_v40  ;;  %v4311_v7 = vpack.c.bf16 %v1560_v5, %v1559_v42  ;;  %v4287_v15 = vpack.c.bf16 %v1532_v14, %v1531_v12  ;;  %v1537_v32 = vld [vmem:[#allocation9 + $0x2d0] sm:$0xff]  ;;  %v1538_v33 = vld [vmem:[#allocation9 + $0x2d8] sm:$0xff]  ;;  %v1539_v40 = vld [vmem:[#allocation9 + $0x2e0] sm:$0xff] }
  0xf7   : > { %4264 = vmatprep.subr.bf16.mxu0 %v4263_v21  ;;  %v4299_v34 = vpack.c.bf16 %v1538_v33, %v1537_v32  ;;  %v1540_v41 = vld [vmem:[#allocation9 + $0x2e8] sm:$0xff] }
  0xf8   : > { %4230 = vmatpush3.bf16.msra.mxu1 %v4229_v48  ;;  %v1231_v48 = vld [vmem:[#allocation2] sm:$0xff] }
  0xf9   : > { %4232 = vmatprep.subr.bf16.mxu1 %v4231_v6  ;;  %v1509_v6 = vld [vmem:[#allocation9 + $0x1f0] sm:$0xff] }
  0xfa   : > { %4266 = vmatpush3.bf16.msra.mxu0 %v4265_v27  ;;  %v4275_v58 = vpack.c.bf16 %v1510_v57, %v1509_v6  ;;  %v4295_v27 = vpack.c.bf16 %v1536_v24, %v1535_v23  ;;  %v1576_v6 = vld [vmem:[#allocation9 + $0x408] sm:$0xff] }
  0xfb   : > { %4268 = vmatprep.subr.bf16.mxu0 %v4267_v37  ;;  %v5226_v57 = vpack.c.bf16 %v1576_v6, %v1575_v56 }
  0xfc   : > { %4234 = vmatpush3.bf16.msra.mxu1 %v4233_v62  ;;  %v1493_v62 = vld [vmem:[#allocation9 + $0x170] sm:$0xff] }
  0xfd   : > { %4236 = vmatprep.subr.bf16.mxu1 %v4235_v4  ;;  %v4277_v0 = vpack.c.bf16 %v1494_v63, %v1493_v62  ;;  %v4283_v4 = vpack.c.bf16 %v1530_v3, %v1529_v25 }
  0xfe   : > { %4270 = vmatpush3.bf16.msra.mxu0 %v4269_v43  ;;  %v4303_v43 = vpack.c.bf16 %v1540_v41, %v1539_v40 }
  0xff   : > { %4272 = vmatprep.subr.bf16.mxu0 %v4271_v49  ;;  %v1542_v49 = vld [vmem:[#allocation9 + $0x2f8] sm:$0xff] }
 0x100   : > { %4238 = vmatpush3.bf16.msra.mxu1 %v4237_v10  ;;  %v1514_v10 = vld [vmem:[#allocation9 + $0x218] sm:$0xff] }
 0x101   : > { %4240 = vmatprep.subr.bf16.mxu1 %v4239_v39  ;;  %v4285_v11 = vpack.c.bf16 %v1514_v10, %v1513_v59  ;;  %v4289_v39 = vpack.c.bf16 %v1516_v22, %v1515_v16 }
 0x102   : > { %4274 = vmatpush3.bf16.msra.mxu0 %v4273_v53  ;;  %v1526_v53 = vld [vmem:[#allocation9 + $0x278] sm:$0xff] }
 0x103   : > { %4276 = vmatprep.subr.bf16.mxu0 %v4275_v58  ;;  %v4309_v54 = vpack.c.bf16 %v1526_v53, %v1525_v52 }
 0x104   : > { %4242 = vmatpush3.bf16.msra.mxu1 %v4241_v20  ;;  %v1518_v20 = vld [vmem:[#allocation9 + $0x238] sm:$0xff] }
 0x105   : > { %4244 = vmatprep.subr.bf16.mxu1 %v4243_v31  ;;  %v4293_v21 = vpack.c.bf16 %v1518_v20, %v1517_v8  ;;  %v4297_v31 = vpack.c.bf16 %v1520_v29, %v1519_v28 }
 0x106   : > { %4278 = vmatpush3.bf16.msra.mxu0 %v4277_v0 }
 0x107   : > { %4312 = vmatprep.subr.bf16.mxu0 %v4311_v7 }
 0x108   : > { %4246 = vmatpush3.bf16.msra.mxu1 %v4245_v36  ;;  %v1522_v36 = vld [vmem:[#allocation9 + $0x258] sm:$0xff] }
 0x109   : > { %4280 = vmatprep.subr.bf16.mxu1 %v4279_v60  ;;  %v4301_v37 = vpack.c.bf16 %v1522_v36, %v1521_v35 }
 0x10b   : > { %1656 = vmatmul.mubr.f32.vlgmr.msra.gmra.mrb[32].mxu1 %v1231_v48  ;;  %v1541_v48 = vld [vmem:[#allocation9 + $0x2f0] sm:$0xff] }
 0x10c   : > { %4282 = vmatpush3.bf16.msra.mxu1 %v4281_v1  ;;  %v4307_v51 = vpack.c.bf16 %v1542_v49, %v1541_v48 }
 0x10d   : > { %4284 = vmatprep.subr.bf16.mxu1 %v4283_v4 }
 0x110   : > { %4286 = vmatpush3.bf16.msra.mxu1 %v4285_v11 }
 0x111   : > { %4288 = vmatprep.subr.bf16.mxu1 %v4287_v15 }
 0x114   : > { %4290 = vmatpush3.bf16.msra.mxu1 %v4289_v39 }
 0x115   : > { %4292 = vmatprep.subr.bf16.mxu1 %v4291_v19 }
 0x118   : > { %4294 = vmatpush3.bf16.msra.mxu1 %v4293_v21 }
 0x119   : > { %4296 = vmatprep.subr.bf16.mxu1 %v4295_v27 }
 0x11c   : > { %4298 = vmatpush3.bf16.msra.mxu1 %v4297_v31 }
 0x11d   : > { %4300 = vmatprep.subr.bf16.mxu1 %v4299_v34 }
 0x120   : > { %4302 = vmatpush3.bf16.msra.mxu1 %v4301_v37 }
 0x121   : > { %4304 = vmatprep.subr.bf16.mxu1 %v4303_v43 }
 0x124   : > { %4306 = vmatpush3.bf16.msra.mxu1 %v4305_v47 }
 0x125   : > { %4308 = vmatprep.subr.bf16.mxu1 %v4307_v51 }
 0x128   : > { %4310 = vmatpush3.bf16.msra.mxu1 %v4309_v54 }
 0x129   : > { %4344 = vmatprep.subr.bf16.mxu1 %v5226_v57 }
 0x17c   : > { %v3211_v60 = vpop.f32.mrb[0].mxu0 }
 0x17d   : > { %v3267_v61 = vpop.f32.mrb[0].mxu1  ;;  %v3212_v58 = vpop.f32.mrb[1].mxu0 }
 0x17e   : > { %v3213_v62 = vadd.f32 %v3212_v58, %v3211_v60  ;;  %v3268_v63 = vpop.f32.mrb[1].mxu1 }
 0x17f   : > { %v3269_v9 = vadd.f32 %v3268_v63, %v3267_v61 }
 0x180   : > { %v3214_v0 = vpop.f32.mrb[2].mxu0 }
 0x181   : > { %v862_v1 = vadd.f32 %v3269_v9, %v3213_v62  ;;  %v3270_v25 = vpop.f32.mrb[2].mxu1  ;;  %v3215_v3 = vpop.f32.mrb[3].mxu0 }
 0x182   : > { %v3216_v4 = vadd.f32 %v3215_v3, %v3214_v0  ;;  %v3271_v42 = vpop.f32.mrb[3].mxu1 }
 0x183   : > { %v3272_v5 = vadd.f32 %v3271_v42, %v3270_v25 }
 0x184   : > { %v3217_v59 = vpop.f32.mrb[4].mxu0 }
 0x185   : > { %v867_v7 = vadd.f32 %v3272_v5, %v3216_v4  ;;  %v3273_v10 = vpop.f32.mrb[4].mxu1  ;;  %v3218_v11 = vpop.f32.mrb[5].mxu0 }
 0x186   : > { %v3219_v12 = vadd.f32 %v3218_v11, %v3217_v59  ;;  %v3274_v14 = vpop.f32.mrb[5].mxu1 }
 0x187   : > { %v3275_v15 = vadd.f32 %v3274_v14, %v3273_v10 }
 0x188   : > { %v3220_v16 = vpop.f32.mrb[6].mxu0 }
 0x189   : > { %v872_v22 = vadd.f32 %v3275_v15, %v3219_v12  ;;  %v3276_v39 = vpop.f32.mrb[6].mxu1  ;;  %v3221_v17 = vpop.f32.mrb[7].mxu0 }
 0x18a   : > { %v3222_v55 = vadd.f32 %v3221_v17, %v3220_v16  ;;  %v3277_v19 = vpop.f32.mrb[7].mxu1 }
 0x18b   : > { %v3278_v8 = vadd.f32 %v3277_v19, %v3276_v39 }
 0x18c   : > { %v3223_v20 = vpop.f32.mrb[8].mxu0 }
 0x18d   : > { %v877_v21 = vadd.f32 %v3278_v8, %v3222_v55  ;;  %v3279_v23 = vpop.f32.mrb[8].mxu1  ;;  %v3224_v24 = vpop.f32.mrb[9].mxu0 }
 0x18e   : > { %v3225_v27 = vadd.f32 %v3224_v24, %v3223_v20  ;;  %v3280_v28 = vpop.f32.mrb[9].mxu1 }
 0x18f   : > { %v3281_v29 = vadd.f32 %v3280_v28, %v3279_v23 }
 0x190   : > { %v3226_v31 = vpop.f32.mrb[10].mxu0 }
 0x191   : > { %v882_v32 = vadd.f32 %v3281_v29, %v3225_v27  ;;  %v3282_v33 = vpop.f32.mrb[10].mxu1  ;;  %v3227_v34 = vpop.f32.mrb[11].mxu0 }
 0x192   : > { %v3228_v35 = vadd.f32 %v3227_v34, %v3226_v31  ;;  %v3283_v36 = vpop.f32.mrb[11].mxu1 }
 0x193   : > { %v3284_v37 = vadd.f32 %v3283_v36, %v3282_v33 }
 0x194   : > { %v3229_v40 = vpop.f32.mrb[12].mxu0 }
 0x195   : > { %v887_v41 = vadd.f32 %v3284_v37, %v3228_v35  ;;  %v3285_v43 = vpop.f32.mrb[12].mxu1  ;;  %v3230_v44 = vpop.f32.mrb[13].mxu0 }
 0x196   : > { %v3231_v45 = vadd.f32 %v3230_v44, %v3229_v40  ;;  %v3286_v47 = vpop.f32.mrb[13].mxu1 }
 0x197   : > { %v3287_v48 = vadd.f32 %v3286_v47, %v3285_v43 }
 0x198   : > { %v3232_v49 = vpop.f32.mrb[14].mxu0 }
 0x199   : > { %v892_v51 = vadd.f32 %v3287_v48, %v3231_v45  ;;  %v3288_v52 = vpop.f32.mrb[14].mxu1  ;;  %v3233_v53 = vpop.f32.mrb[15].mxu0 }
 0x19a   : > { %v3234_v54 = vadd.f32 %v3233_v53, %v3232_v49  ;;  %v3289_v56 = vpop.f32.mrb[15].mxu1 }
 0x19b   : > { %v3290_v6 = vadd.f32 %v3289_v56, %v3288_v52 }
 0x19c   : > { %v3323_v60 = vpop.f32.mrb[16].mxu0 }
 0x19d   : > { %v897_v61 = vadd.f32 %v3290_v6, %v3234_v54  ;;  %v3324_v58 = vpop.f32.mrb[17].mxu0 }
 0x19e   : > { %v3325_v62 = vadd.f32 %v3324_v58, %v3323_v60  ;;  %v3379_v63 = vpop.f32.mrb[16].mxu1 }
 0x19f   : > { %v3380_v9 = vpop.f32.mrb[17].mxu1 }
 0x1a0   : > { %v967_v0 = vadd.f32 %v3325_v62, %v862_v1  ;;  %v3381_v25 = vadd.f32 %v3380_v9, %v3379_v63  ;;  %v3326_v3 = vpop.f32.mrb[18].mxu0 }
 0x1a1   : > { %v3327_v4 = vpop.f32.mrb[19].mxu0 }
 0x1a2   : > { %v3328_v42 = vadd.f32 %v3327_v4, %v3326_v3  ;;  %v3382_v5 = vpop.f32.mrb[18].mxu1  ;;  %v1072_v59 = vadd.f32 %v3381_v25, %v967_v0 }
 0x1a3   : > { %v3383_v10 = vpop.f32.mrb[19].mxu1 }
 0x1a4   : > { %v972_v11 = vadd.f32 %v3328_v42, %v867_v7  ;;  %v3384_v12 = vadd.f32 %v3383_v10, %v3382_v5  ;;  %v3329_v14 = vpop.f32.mrb[20].mxu0 }
 0x1a5   : > { %v3330_v15 = vpop.f32.mrb[21].mxu0 }
 0x1a6   : > { %v3331_v16 = vadd.f32 %v3330_v15, %v3329_v14  ;;  %v3385_v39 = vpop.f32.mrb[20].mxu1  ;;  %v1077_v17 = vadd.f32 %v3384_v12, %v972_v11 }
 0x1a7   : > { %v3386_v55 = vpop.f32.mrb[21].mxu1 }
 0x1a8   : > { %v977_v19 = vadd.f32 %v3331_v16, %v872_v22  ;;  %v3387_v8 = vadd.f32 %v3386_v55, %v3385_v39  ;;  %v3332_v20 = vpop.f32.mrb[22].mxu0 }
 0x1a9   : > { %v3333_v23 = vpop.f32.mrb[23].mxu0 }
 0x1aa   : > { %v3334_v1 = vadd.f32 %v3333_v23, %v3332_v20  ;;  %v3388_v24 = vpop.f32.mrb[22].mxu1  ;;  %v1082_v27 = vadd.f32 %v3387_v8, %v977_v19  ;;  %v1543_v23 = vld [vmem:[#allocation9 + $0x300] sm:$0xff] }
 0x1ab   : > { %v3389_v28 = vpop.f32.mrb[23].mxu1 }
 0x1ac   : > { %v982_v29 = vadd.f32 %v3334_v1, %v877_v21  ;;  %v3390_v31 = vadd.f32 %v3389_v28, %v3388_v24  ;;  %v3335_v33 = vpop.f32.mrb[24].mxu0  ;;  %v1544_v1 = vld [vmem:[#allocation9 + $0x308] sm:$0xff]  ;;  %v1561_v28 = vld [vmem:[#allocation9 + $0x390] sm:$0xff] }
 0x1ad   : > { %v3336_v34 = vpop.f32.mrb[25].mxu0 }
 0x1ae   : > { %v3337_v7 = vadd.f32 %v3336_v34, %v3335_v33  ;;  %v3391_v35 = vpop.f32.mrb[24].mxu1  ;;  %v1087_v36 = vadd.f32 %v3390_v31, %v982_v29  ;;  %v1562_v29 = vld [vmem:[#allocation9 + $0x398] sm:$0xff]  ;;  %v1263_v34 = vld [vmem:[#allocation2 + $0x2] sm:$0xff] }
 0x1af   : > { %v3392_v37 = vpop.f32.mrb[25].mxu1 }
 0x1b0   : > { %v987_v40 = vadd.f32 %v3337_v7, %v882_v32  ;;  %v3393_v43 = vadd.f32 %v3392_v37, %v3391_v35  ;;  %v3338_v44 = vpop.f32.mrb[26].mxu0  ;;  %v4313_v7 = vpack.c.bf16 %v1544_v1, %v1543_v23  ;;  %v1571_v23 = vld [vmem:[#allocation9 + $0x3e0] sm:$0xff]  ;;  %v1572_v1 = vld [vmem:[#allocation9 + $0x3e8] sm:$0xff] }
 0x1b1   : > { %v3339_v45 = vpop.f32.mrb[27].mxu0 }
 0x1b2   : > { %v3340_v22 = vadd.f32 %v3339_v45, %v3338_v44  ;;  %v3394_v47 = vpop.f32.mrb[26].mxu1  ;;  %v1092_v48 = vadd.f32 %v3393_v43, %v987_v40  ;;  %v4315_v40 = vpack.c.bf16 %v1562_v29, %v1561_v28  ;;  %v1545_v43 = vld [vmem:[#allocation9 + $0x310] sm:$0xff]  ;;  %v1546_v44 = vld [vmem:[#allocation9 + $0x318] sm:$0xff]  ;;  %v4335_v29 = vpack.c.bf16 %v1572_v1, %v1571_v23 }
 0x1b3   : > { %v3395_v49 = vpop.f32.mrb[27].mxu1  ;;  %v2350_v23 = vld [vmem:[#allocation10 + $0x10] sm:$0xff]  ;;  %v2351_v1 = vld [vmem:[#allocation10 + $0x18] sm:$0xff] }
 0x1b4   : > { %v992_v52 = vadd.f32 %v3340_v22, %v887_v41  ;;  %v3396_v53 = vadd.f32 %v3395_v49, %v3394_v47  ;;  %v3341_v54 = vpop.f32.mrb[28].mxu0  ;;  %v1563_v22 = vld [vmem:[#allocation9 + $0x3a0] sm:$0xff]  ;;  %v1564_v47 = vld [vmem:[#allocation9 + $0x3a8] sm:$0xff] }
 0x1b5   : > { %v3342_v56 = vpop.f32.mrb[29].mxu0 }
 0x1b6   : > { %v3343_v21 = vadd.f32 %v3342_v56, %v3341_v54  ;;  %v3397_v6 = vpop.f32.mrb[28].mxu1  ;;  %v1097_v60 = vadd.f32 %v3396_v53, %v992_v52  ;;  %v4317_v53 = vpack.c.bf16 %v1546_v44, %v1545_v43  ;;  %v4319_v54 = vpack.c.bf16 %v1564_v47, %v1563_v22  ;;  %v1547_v56 = vld [vmem:[#allocation9 + $0x320] sm:$0xff]  ;;  %v1557_v44 = vld [vmem:[#allocation9 + $0x370] sm:$0xff] }
 0x1b7   : > { %v3398_v58 = vpop.f32.mrb[29].mxu1 }
 0x1b8   : > { %v997_v62 = vadd.f32 %v3343_v21, %v892_v51  ;;  %v3399_v63 = vadd.f32 %v3398_v58, %v3397_v6  ;;  %v3344_v9 = vpop.f32.mrb[30].mxu0  ;;  %v1548_v21 = vld [vmem:[#allocation9 + $0x328] sm:$0xff]  ;;  %v1566_v58 = vld [vmem:[#allocation9 + $0x3b8] sm:$0xff] }
 0x1b9   : > { %v3345_v0 = vpop.f32.mrb[31].mxu0 }
 0x1ba   : > { %v3346_v32 = vadd.f32 %v3345_v0, %v3344_v9  ;;  %v3400_v25 = vpop.f32.mrb[30].mxu1  ;;  %v1102_v3 = vadd.f32 %v3399_v63, %v997_v62  ;;  %v4321_v63 = vpack.c.bf16 %v1548_v21, %v1547_v56  ;;  %v1549_v0 = vld [vmem:[#allocation9 + $0x330] sm:$0xff] }
 0x1bb   : > { %v3401_v4 = vpop.f32.mrb[31].mxu1 }
 0x1bc   : > { %v1002_v42 = vadd.f32 %v3346_v32, %v897_v61  ;;  %v3402_v5 = vadd.f32 %v3401_v4, %v3400_v25  ;;  %v3957_v10 = vpop.f32.mrb[32].mxu0  ;;  %v1550_v32 = vld [vmem:[#allocation9 + $0x338] sm:$0xff]  ;;  %v1568_v4 = vld [vmem:[#allocation9 + $0x3c8] sm:$0xff] }
 0x1bd   : > { %v1182_v11 = vadd.f32 %v3957_v10, %v1077_v17  ;;  %v1176_v41 = vpop.f32.mrb[33].mxu0 }
 0x1be   : > { %v1177_v12 = vadd.f32 %v1176_v41, %v1072_v59  ;;  %v1107_v14 = vadd.f32 %v3402_v5, %v1002_v42  ;;  %v4325_v5 = vpack.c.bf16 %v1550_v32, %v1549_v0  ;;  %v1552_v41 = vld [vmem:[#allocation9 + $0x348] sm:$0xff]  ;;  %v1586_v32 = vld [vmem:[#allocation9 + $0x458] sm:$0xff] }
 0x1bf   : > { %v5229_v15 = vmax.f32 %v1182_v11, 0.0  ;;  %v1551_v11 = vld [vmem:[#allocation9 + $0x340] sm:$0xff] }
 0x1c0   : > { %v5231_v16 = vmax.f32 %v1177_v12, 0.0  ;;  %v3960_v39 = vpop.f32.mrb[34].mxu0 }
 0x1c1   : > { %1224 = vst [vmem:[#allocation2 + $0x21] sm:$0xff] %v5229_v15  ;;  %v1192_v51 = vadd.f32 %v3960_v39, %v1087_v36  ;;  %v1186_v55 = vpop.f32.mrb[35].mxu0  ;;  %v1570_v39 = vld [vmem:[#allocation9 + $0x3d8] sm:$0xff] }
 0x1c2   : > { %1223 = vst [vmem:[#allocation2 + $0x11] sm:$0xff] %v5231_v16  ;;  %v1187_v19 = vadd.f32 %v1186_v55, %v1082_v27  ;;  %1660 = vmatprep.mubr.f32.mxu1 %v5231_v16  ;;  %v4329_v55 = vpack.c.bf16 %v1552_v41, %v1551_v11  ;;  %v1334_v11 = vld [vmem:[#allocation2 + $0x90] sm:$0xff] }
 0x1c3   : > { %v5236_v61 = vmax.f32 %v1192_v51, 0.0 }
 0x1c4   : > { %v5238_v17 = vmax.f32 %v1187_v19, 0.0  ;;  %v3963_v59 = vpop.f32.mrb[36].mxu0 }
 0x1c5   : > { %1226 = vst [vmem:[#allocation2 + $0x41] sm:$0xff] %v5236_v61  ;;  %v1202_v8 = vadd.f32 %v3963_v59, %v1097_v60  ;;  %v1196_v20 = vpop.f32.mrb[37].mxu0  ;;  %v1565_v60 = vld [vmem:[#allocation9 + $0x3b0] sm:$0xff] }
 0x1c6   : > { %1225 = vst [vmem:[#allocation2 + $0x31] sm:$0xff] %v5238_v17  ;;  %v1197_v24 = vadd.f32 %v1196_v20, %v1092_v48  ;;  %v4323_v9 = vpack.c.bf16 %v1566_v58, %v1565_v60  ;;  %v1553_v59 = vld [vmem:[#allocation9 + $0x350] sm:$0xff]  ;;  %v1579_v58 = vld [vmem:[#allocation9 + $0x420] sm:$0xff] }
 0x1c7   : > { %v5242_v31 = vmax.f32 %v1202_v8, 0.0  ;;  %v1554_v8 = vld [vmem:[#allocation9 + $0x358] sm:$0xff] }
 0x1c8   : > { %v5244_v27 = vmax.f32 %v1197_v24, 0.0  ;;  %v3966_v33 = vpop.f32.mrb[38].mxu0  ;;  %v5251_v49 = vld [vmem:[#allocation2 + $0x20] sm:$0xff]  ;;  %v4333_v28 = vpack.c.bf16 %v1554_v8, %v1553_v59  ;;  %v2366_v59 = vld [vmem:[#allocation10 + $0x90] sm:$0xff]  ;;  %v2367_v8 = vld [vmem:[#allocation10 + $0x98] sm:$0xff] }
 0x1c9   : > { %1228 = vst [vmem:[#allocation2 + $0x61] sm:$0xff] %v5242_v31  ;;  %v1212_v35 = vadd.f32 %v3966_v33, %v1107_v14  ;;  %v1206_v36 = vpop.f32.mrb[39].mxu0  ;;  %v1279_v37 = vld [vmem:[#allocation2 + $0x10] sm:$0xff]  ;;  %v5267_v25 = vld [vmem:[#allocation2 + $0x22] sm:$0xff] }
 0x1ca   : > { %1227 = vst [vmem:[#allocation2 + $0x51] sm:$0xff] %v5244_v27  ;;  %v1207_v45 = vadd.f32 %v1206_v36, %v1102_v3  ;;  %1760 = vmatprep.mubr.f32.mxu0 %v1279_v37  ;;  %1661 = vmatmul.mubr.f32.gmra.mrb[34].mxu1 %v1279_v37  ;;  %v5259_v6 = vld [vmem:[#allocation2 + $0x12] sm:$0xff]  ;;  %v1567_v3 = vld [vmem:[#allocation9 + $0x3c0] sm:$0xff] }
 0x1cb   : > { %v5248_v48 = vmax.f32 %v1212_v35, 0.0  ;;  %1761 = vmatmul.mubr.f32.vlgmr.msra.gmra.mrb[40].mxu0 %v1263_v34  ;;  %1665 = vmatprep.mubr.f32.mxu1 %v5229_v15  ;;  %v4327_v10 = vpack.c.bf16 %v1568_v4, %v1567_v3  ;;  %v1569_v14 = vld [vmem:[#allocation9 + $0x3d0] sm:$0xff]  ;;  %v1555_v33 = vld [vmem:[#allocation9 + $0x360] sm:$0xff]  ;;  %v1556_v34 = vld [vmem:[#allocation9 + $0x368] sm:$0xff] }
 0x1cc   : > { %v5253_v52 = vmax.f32 %v1207_v45, 0.0  ;;  %1765 = vmatprep.mubr.f32.mxu0 %v5251_v49  ;;  %4314 = vmatpush3.bf16.msra.mxu0 %v4313_v7  ;;  %v5271_v42 = vld [vmem:[#allocation2 + $0x40] sm:$0xff]  ;;  %v4331_v19 = vpack.c.bf16 %v1570_v39, %v1569_v14  ;;  %v1573_v35 = vld [vmem:[#allocation9 + $0x3f0] sm:$0xff]  ;;  %v1574_v36 = vld [vmem:[#allocation9 + $0x3f8] sm:$0xff] }
 0x1cd   : > { %1230 = vst [vmem:[#allocation2 + $0x81] sm:$0xff] %v5248_v48  ;;  %4316 = vmatprep.subr.bf16.mxu0 %v4315_v40  ;;  %v5263_v62 = vld [vmem:[#allocation2 + $0x30] sm:$0xff]  ;;  %v5283_v20 = vld [vmem:[#allocation2 + $0x42] sm:$0xff]  ;;  %v4337_v40 = vpack.c.bf16 %v1556_v34, %v1555_v33  ;;  %v4339_v43 = vpack.c.bf16 %v1574_v36, %v1573_v35  ;;  %v1558_v45 = vld [vmem:[#allocation9 + $0x378] sm:$0xff] }
 0x1ce   : > { %1229 = vst [vmem:[#allocation2 + $0x71] sm:$0xff] %v5253_v52  ;;  %1666 = vmatmul.mubr.f32.gmra.mrb[36].mxu1 %v5251_v49  ;;  %v5275_v12 = vld [vmem:[#allocation2 + $0x32] sm:$0xff]  ;;  %v4341_v56 = vpack.c.bf16 %v1558_v45, %v1557_v44  ;;  %v1588_v3 = vld [vmem:[#allocation9 + $0x468] sm:$0xff]  ;;  %v2364_v14 = vld [vmem:[#allocation10 + $0x80] sm:$0xff] }
 0x1cf   : > { %1766 = vmatmul.mubr.f32.gmra.mrb[42].mxu0 %v5259_v6  ;;  %1670 = vmatprep.mubr.f32.mxu1 %v5238_v17  ;;  %v2365_v39 = vld [vmem:[#allocation10 + $0x88] sm:$0xff]  ;;  %v2352_v34 = vld [vmem:[#allocation10 + $0x20] sm:$0xff] }
 0x1d0   : > { %1770 = vmatprep.mubr.f32.mxu0 %v5263_v62  ;;  %4318 = vmatpush3.bf16.msra.mxu0 %v4317_v53  ;;  %v5287_v24 = vld [vmem:[#allocation2 + $0x60] sm:$0xff]  ;;  %v1577_v53 = vld [vmem:[#allocation9 + $0x410] sm:$0xff]  ;;  %v2397_v36 = vld [vmem:[#allocation10 + $0x188] sm:$0xff] }
 0x1d1   : > { %4320 = vmatprep.subr.bf16.mxu0 %v4319_v54  ;;  %v5279_v51 = vld [vmem:[#allocation2 + $0x50] sm:$0xff]  ;;  %v5299_v22 = vld [vmem:[#allocation2 + $0x62] sm:$0xff]  ;;  %v1578_v54 = vld [vmem:[#allocation9 + $0x418] sm:$0xff] }
 0x1d2   : > { %1671 = vmatmul.mubr.f32.gmra.mrb[38].mxu1 %v5263_v62  ;;  %v5291_v7 = vld [vmem:[#allocation2 + $0x52] sm:$0xff]  ;;  %v4347_v60 = vpack.c.bf16 %v1578_v54, %v1577_v53  ;;  %v2396_v35 = vld [vmem:[#allocation10 + $0x180] sm:$0xff]  ;;  %v2381_v44 = vld [vmem:[#allocation10 + $0x108] sm:$0xff] }
 0x1d3   : > { %1771 = vmatmul.mubr.f32.gmra.mrb[44].mxu0 %v5267_v25  ;;  %1675 = vmatprep.mubr.f32.mxu1 %v5236_v61  ;;  %v2354_v54 = vld [vmem:[#allocation10 + $0x30] sm:$0xff] }
 0x1d4   : > { %1775 = vmatprep.mubr.f32.mxu0 %v5271_v42  ;;  %4322 = vmatpush3.bf16.msra.mxu0 %v4321_v63  ;;  %v5302_v47 = vld [vmem:[#allocation2 + $0x80] sm:$0xff]  ;;  %v1580_v63 = vld [vmem:[#allocation9 + $0x428] sm:$0xff] }
 0x1d5   : > { %4324 = vmatprep.subr.bf16.mxu0 %v4323_v9  ;;  %v5295_v37 = vld [vmem:[#allocation2 + $0x70] sm:$0xff]  ;;  %v1582_v9 = vld [vmem:[#allocation9 + $0x438] sm:$0xff] }
 0x1d6   : > { %1676 = vmatmul.mubr.f32.gmra.mrb[40].mxu1 %v5271_v42  ;;  %v5306_v21 = vld [vmem:[#allocation2 + $0x72] sm:$0xff] }
 0x1d7   : > { %1776 = vmatmul.mubr.f32.gmra.mrb[46].mxu0 %v5275_v12  ;;  %1680 = vmatprep.mubr.f32.mxu1 %v5244_v27 }
 0x1d8   : > { %1780 = vmatprep.mubr.f32.mxu0 %v5279_v51  ;;  %4326 = vmatpush3.bf16.msra.mxu0 %v4325_v5  ;;  %v1318_v5 = vld [vmem:[#allocation2 + $0x82] sm:$0xff] }
 0x1d9   : > { %4328 = vmatprep.subr.bf16.mxu0 %v4327_v10 }
 0x1da   : > { %1681 = vmatmul.mubr.f32.gmra.mrb[42].mxu1 %v5279_v51 }
 0x1db   : > { %1781 = vmatmul.mubr.f32.gmra.mrb[48].mxu0 %v5283_v20  ;;  %1685 = vmatprep.mubr.f32.mxu1 %v5242_v31 }
 0x1dc   : > { %1785 = vmatprep.mubr.f32.mxu0 %v5287_v24  ;;  %4330 = vmatpush3.bf16.msra.mxu0 %v4329_v55  ;;  %v2348_v55 = vld [vmem:[#allocation10] sm:$0xff] }
 0x1dd   : > { %4332 = vmatprep.subr.bf16.mxu0 %v4331_v19 }
 0x1de   : > { %1686 = vmatmul.mubr.f32.gmra.mrb[44].mxu1 %v5287_v24 }
 0x1df   : > { %1786 = vmatmul.mubr.f32.gmra.mrb[50].mxu0 %v5291_v7  ;;  %1690 = vmatprep.mubr.f32.mxu1 %v5253_v52 }
 0x1e0   : > { %1790 = vmatprep.mubr.f32.mxu0 %v5295_v37  ;;  %4334 = vmatpush3.bf16.msra.mxu0 %v4333_v28  ;;  %v2368_v28 = vld [vmem:[#allocation10 + $0xa0] sm:$0xff] }
 0x1e1   : > { %4336 = vmatprep.subr.bf16.mxu0 %v4335_v29  ;;  %v2369_v29 = vld [vmem:[#allocation10 + $0xa8] sm:$0xff] }
 0x1e2   : > { %1691 = vmatmul.mubr.f32.gmra.mrb[46].mxu1 %v5295_v37  ;;  %v4383_v33 = vpack.c.bf16 %v2369_v29, %v2368_v28 }
 0x1e3   : > { %1791 = vmatmul.mubr.f32.gmra.mrb[52].mxu0 %v5299_v22  ;;  %1865 = vmatprep.mubr.f32.mxu1 %v5259_v6  ;;  %v4351_v6 = vpack.c.bf16 %v1580_v63, %v1579_v58 }
 0x1e4   : > { %1795 = vmatprep.mubr.f32.mxu0 %v5302_v47  ;;  %4338 = vmatpush3.bf16.msra.mxu0 %v4337_v40  ;;  %v4407_v40 = vpack.c.bf16 %v2397_v36, %v2396_v35  ;;  %v2378_v35 = vld [vmem:[#allocation10 + $0xf0] sm:$0xff]  ;;  %v2379_v36 = vld [vmem:[#allocation10 + $0xf8] sm:$0xff] }
 0x1e5   : > { %4340 = vmatprep.subr.bf16.mxu0 %v4339_v43  ;;  %v2380_v43 = vld [vmem:[#allocation10 + $0x100] sm:$0xff] }
 0x1e6   : > { %1866 = vmatmul.mubr.f32.vlgmr.msra.gmra.mrb[48].mxu1 %v5231_v16  ;;  %v1581_v16 = vld [vmem:[#allocation9 + $0x430] sm:$0xff]  ;;  %v4409_v45 = vpack.c.bf16 %v2381_v44, %v2380_v43  ;;  %v2363_v43 = vld [vmem:[#allocation10 + $0x78] sm:$0xff] }
 0x1e7   : > { %1796 = vmatmul.mubr.f32.gmra.mrb[54].mxu0 %v5306_v21  ;;  %1870 = vmatprep.mubr.f32.mxu1 %v5267_v25  ;;  %v4355_v0 = vpack.c.bf16 %v1582_v9, %v1581_v16  ;;  %v2383_v16 = vld [vmem:[#allocation10 + $0x118] sm:$0xff]  ;;  %v2406_v44 = vld [vmem:[#allocation10 + $0x1d0] sm:$0xff] }
 0x1e8   : > { %4342 = vmatpush3.bf16.msra.mxu0 %v4341_v56  ;;  %1970 = vmatprep.mubr.f32.mxu0 %v5229_v15  ;;  %v2355_v56 = vld [vmem:[#allocation10 + $0x38] sm:$0xff] }
 0x1e9   : > { %4346 = vmatpush3.bf16.msra.mxu1 %v5226_v57  ;;  %v1583_v57 = vld [vmem:[#allocation9 + $0x440] sm:$0xff]  ;;  %v4389_v58 = vpack.c.bf16 %v2355_v56, %v2354_v54  ;;  %v2391_v54 = vld [vmem:[#allocation10 + $0x158] sm:$0xff] }
 0x1ea   : > { %1871 = vmatmul.mubr.f32.gmra.mrb[50].mxu1 %v5229_v15  ;;  %4348 = vmatprep.subr.bf16.mxu1 %v4347_v60  ;;  %v1584_v15 = vld [vmem:[#allocation9 + $0x448] sm:$0xff] }
 0x1eb   : > { %1971 = vmatmul.mubr.f32.vlgmr.msra.gmra.mrb[56].mxu0 %v5251_v49  ;;  %1875 = vmatprep.mubr.f32.mxu1 %v5275_v12  ;;  %v4359_v49 = vpack.c.bf16 %v1584_v15, %v1583_v57  ;;  %v2373_v57 = vld [vmem:[#allocation10 + $0xc8] sm:$0xff] }
 0x1ec   : > { %1975 = vmatprep.mubr.f32.mxu0 %v5238_v17 }
 0x1ed   : > { %4350 = vmatpush3.bf16.msra.mxu1 %v4347_v60  ;;  %v2399_v60 = vld [vmem:[#allocation10 + $0x198] sm:$0xff] }
 0x1ee   : > { %1876 = vmatmul.mubr.f32.gmra.mrb[52].mxu1 %v5238_v17  ;;  %4352 = vmatprep.subr.bf16.mxu1 %v4351_v6  ;;  %v1585_v17 = vld [vmem:[#allocation9 + $0x450] sm:$0xff] }
 0x1ef   : > { %1976 = vmatmul.mubr.f32.gmra.mrb[58].mxu0 %v5263_v62  ;;  %1880 = vmatprep.mubr.f32.mxu1 %v5283_v20  ;;  %v4363_v62 = vpack.c.bf16 %v1586_v32, %v1585_v17  ;;  %v2357_v17 = vld [vmem:[#allocation10 + $0x48] sm:$0xff]  ;;  %v2400_v32 = vld [vmem:[#allocation10 + $0x1a0] sm:$0xff] }
 0x1f0   : > { %1980 = vmatprep.mubr.f32.mxu0 %v5236_v61 }
 0x1f1   : > { %4354 = vmatpush3.bf16.msra.mxu1 %v4351_v6  ;;  %v2382_v6 = vld [vmem:[#allocation10 + $0x110] sm:$0xff] }
 0x1f2   : > { %1881 = vmatmul.mubr.f32.gmra.mrb[54].mxu1 %v5236_v61  ;;  %4356 = vmatprep.subr.bf16.mxu1 %v4355_v0  ;;  %v1587_v61 = vld [vmem:[#allocation9 + $0x460] sm:$0xff]  ;;  %v4413_v9 = vpack.c.bf16 %v2383_v16, %v2382_v6 }
 0x1f3   : > { %1981 = vmatmul.mubr.f32.gmra.mrb[60].mxu0 %v5271_v42  ;;  %1885 = vmatprep.mubr.f32.mxu1 %v5291_v7  ;;  %v4367_v4 = vpack.c.bf16 %v1588_v3, %v1587_v61  ;;  %v1590_v42 = vld [vmem:[#allocation9 + $0x478] sm:$0xff]  ;;  %v2392_v16 = vld [vmem:[#allocation10 + $0x160] sm:$0xff] }
 0x1f4   : > { %1985 = vmatprep.mubr.f32.mxu0 %v5244_v27 }
 0x1f5   : > { %4358 = vmatpush3.bf16.msra.mxu1 %v4355_v0  ;;  %v2372_v0 = vld [vmem:[#allocation10 + $0xc0] sm:$0xff] }
 0x1f6   : > { %1886 = vmatmul.mubr.f32.gmra.mrb[56].mxu1 %v5244_v27  ;;  %4360 = vmatprep.subr.bf16.mxu1 %v4359_v49  ;;  %v1589_v27 = vld [vmem:[#allocation9 + $0x470] sm:$0xff]  ;;  %v4391_v15 = vpack.c.bf16 %v2373_v57, %v2372_v0  ;;  %v2428_v57 = vld [vmem:[#allocation10 + $0x280] sm:$0xff] }
 0x1f7   : > { %1986 = vmatmul.mubr.f32.gmra.mrb[62].mxu0 %v5279_v51  ;;  %1890 = vmatprep.mubr.f32.mxu1 %v5299_v22  ;;  %v4371_v10 = vpack.c.bf16 %v1590_v42, %v1589_v27  ;;  %v4375_v51 = vpack.c.bf16 %v2365_v39, %v2364_v14  ;;  %v2385_v27 = vld [vmem:[#allocation10 + $0x128] sm:$0xff] }
 0x1f8   : > { %1990 = vmatprep.mubr.f32.mxu0 %v5242_v31 }
 0x1f9   : > { %4362 = vmatpush3.bf16.msra.mxu1 %v4359_v49  ;;  %4376 = vmatprep.subr.bf16.mxu0 %v4375_v51  ;;  %v2356_v49 = vld [vmem:[#allocation10 + $0x40] sm:$0xff]  ;;  %v2386_v51 = vld [vmem:[#allocation10 + $0x130] sm:$0xff] }
 0x1fa   : > { %1891 = vmatmul.mubr.f32.gmra.mrb[58].mxu1 %v5242_v31  ;;  %4364 = vmatprep.subr.bf16.mxu1 %v4363_v62  ;;  %v1350_v31 = vld [vmem:[#allocation2 + $0x91] sm:$0xff]  ;;  %v4393_v61 = vpack.c.bf16 %v2357_v17, %v2356_v49 }
 0x1fb   : > { %1991 = vmatmul.mubr.f32.gmra.mrb[64].mxu0 %v5287_v24  ;;  %1895 = vmatprep.mubr.f32.mxu1 %v5306_v21  ;;  %v4381_v24 = vpack.c.bf16 %v2351_v1, %v2350_v23  ;;  %v2361_v23 = vld [vmem:[#allocation10 + $0x68] sm:$0xff]  ;;  %v2404_v1 = vld [vmem:[#allocation10 + $0x1c0] sm:$0xff]  ;;  %v2410_v49 = vld [vmem:[#allocation10 + $0x1f0] sm:$0xff] }
 0x1fc   : > { %1995 = vmatprep.mubr.f32.mxu0 %v5253_v52  ;;  %v2411_v17 = vld [vmem:[#allocation10 + $0x1f8] sm:$0xff] }
 0x1fd   : > { %4366 = vmatpush3.bf16.msra.mxu1 %v4363_v62  ;;  %v2401_v62 = vld [vmem:[#allocation10 + $0x1a8] sm:$0xff] }
 0x1fe   : > { %1896 = vmatmul.mubr.f32.gmra.mrb[60].mxu1 %v5253_v52  ;;  %4368 = vmatprep.subr.bf16.mxu1 %v4367_v4  ;;  %v3459_v52 = vpop.f32.mrb[32].mxu1  ;;  %v4415_v3 = vpack.c.bf16 %v2401_v62, %v2400_v32  ;;  %v2412_v62 = vld [vmem:[#allocation10 + $0x200] sm:$0xff] }
 0x1ff   : > { %1996 = vmatmul.mubr.f32.gmra.mrb[66].mxu0 %v5295_v37  ;;  %1900 = vmatprep.mubr.f32.mxu1 %v1318_v5  ;;  %v3460_v41 = vpop.f32.mrb[33].mxu1 }
 0x200   : > { %2000 = vmatprep.mubr.f32.mxu0 %v5248_v48 }
 0x201   : > { %4370 = vmatpush3.bf16.msra.mxu1 %v4367_v4  ;;  %v2384_v4 = vld [vmem:[#allocation10 + $0x120] sm:$0xff] }
 0x202   : > { %1901 = vmatmul.mubr.f32.gmra.mrb[62].mxu1 %v5248_v48  ;;  %4372 = vmatprep.subr.bf16.mxu1 %v4371_v10  ;;  %v1366_v48 = vld [vmem:[#allocation2 + $0x92] sm:$0xff]  ;;  %v4417_v42 = vpack.c.bf16 %v2385_v27, %v2384_v4  ;;  %v2413_v27 = vld [vmem:[#allocation10 + $0x208] sm:$0xff] }
 0x203   : > { %2001 = vmatmul.mubr.f32.gmra.mrb[68].mxu0 %v5302_v47  ;;  %3999 = vmatprep.mubr.f32.mxu1 %v5267_v25  ;;  %v5344_v25 = vadd.f32 %v3460_v41, %v3459_v52  ;;  %v2371_v47 = vld [vmem:[#allocation10 + $0xb8] sm:$0xff]  ;;  %v2402_v52 = vld [vmem:[#allocation10 + $0x1b0] sm:$0xff] }
 0x204   : > { %2005 = vmatprep.mubr.f32.mxu0 %v1350_v31  ;;  %v2403_v41 = vld [vmem:[#allocation10 + $0x1b8] sm:$0xff] }
 0x205   : > { %4374 = vmatpush3.bf16.msra.mxu1 %v4371_v10  ;;  %v2375_v10 = vld [vmem:[#allocation10 + $0xd8] sm:$0xff]  ;;  %v4419_v39 = vpack.c.bf16 %v2403_v41, %v2402_v52  ;;  %v2461_v52 = vld [vmem:[#allocation10 + $0x388] sm:$0xff]  ;;  %v2414_v41 = vld [vmem:[#allocation10 + $0x210] sm:$0xff] }
 0x206   : > { %4408 = vmatprep.subr.bf16.mxu1 %v4407_v40  ;;  %v2362_v40 = vld [vmem:[#allocation10 + $0x70] sm:$0xff]  ;;  %v2395_v4 = vld [vmem:[#allocation10 + $0x178] sm:$0xff] }
 0x207   : > { %2006 = vmatmul.mubr.f32.gmra.mrb[70].mxu0 %v1334_v11  ;;  %v2358_v11 = vld [vmem:[#allocation10 + $0x50] sm:$0xff] }
 0x208   : > { %4000 = vmatmul.mubr.f32.vlgmr.msra.gmra.mrb[64].mxu1 %v5275_v12  ;;  %v2349_v12 = vld [vmem:[#allocation10 + $0x8] sm:$0xff] }
 0x209   : > { %4002 = vmatprep.mubr.f32.mxu1 %v5283_v20  ;;  %v4377_v19 = vpack.c.bf16 %v2349_v12, %v2348_v55  ;;  %v4379_v20 = vpack.c.bf16 %v2367_v8, %v2366_v59  ;;  %4410 = vmatpush3.bf16.msra.mxu1 %v4409_v45  ;;  %v2387_v55 = vld [vmem:[#allocation10 + $0x138] sm:$0xff]  ;;  %v2377_v59 = vld [vmem:[#allocation10 + $0xe8] sm:$0xff] }
 0x20a   : > { %v4421_v12 = vpack.c.bf16 %v2387_v55, %v2386_v51  ;;  %v2407_v45 = vld [vmem:[#allocation10 + $0x1d8] sm:$0xff]  ;;  %v2432_v55 = vld [vmem:[#allocation10 + $0x2a0] sm:$0xff] }
 0x20b   : > { %4378 = vmatpush3.bf16.msra.mxu0 %v4377_v19  ;;  %v2376_v19 = vld [vmem:[#allocation10 + $0xe0] sm:$0xff] }
 0x20c   : > { %4003 = vmatmul.mubr.f32.gmra.mrb[66].mxu1 %v5291_v7  ;;  %4380 = vmatprep.subr.bf16.mxu0 %v4379_v20  ;;  %v2353_v7 = vld [vmem:[#allocation10 + $0x28] sm:$0xff]  ;;  %v4399_v8 = vpack.c.bf16 %v2377_v59, %v2376_v19  ;;  %v2360_v20 = vld [vmem:[#allocation10 + $0x60] sm:$0xff] }
 0x20d   : > { %4005 = vmatprep.mubr.f32.mxu1 %v5299_v22  ;;  %v4385_v37 = vpack.c.bf16 %v2353_v7, %v2352_v34  ;;  %v2370_v22 = vld [vmem:[#allocation10 + $0xb0] sm:$0xff]  ;;  %v4401_v28 = vpack.c.bf16 %v2361_v23, %v2360_v20  ;;  %v2389_v34 = vld [vmem:[#allocation10 + $0x148] sm:$0xff]  ;;  %v2416_v59 = vld [vmem:[#allocation10 + $0x220] sm:$0xff] }
 0x20e   : > { %v4387_v53 = vpack.c.bf16 %v2371_v47, %v2370_v22  ;;  %v4405_v22 = vpack.c.bf16 %v2363_v43, %v2362_v40  ;;  %v4427_v47 = vpack.c.bf16 %v2407_v45, %v2406_v44  ;;  %v2434_v23 = vld [vmem:[#allocation10 + $0x2b0] sm:$0xff]  ;;  %v2439_v44 = vld [vmem:[#allocation10 + $0x2d8] sm:$0xff] }
 0x20f   : > { %4382 = vmatpush3.bf16.msra.mxu0 %v4381_v24  ;;  %v2405_v24 = vld [vmem:[#allocation10 + $0x1c8] sm:$0xff]  ;;  %v2438_v43 = vld [vmem:[#allocation10 + $0x2d0] sm:$0xff] }
 0x210   : > { %4006 = vmatmul.mubr.f32.gmra.mrb[68].mxu1 %v5306_v21  ;;  %4384 = vmatprep.subr.bf16.mxu0 %v4383_v33  ;;  %v2398_v21 = vld [vmem:[#allocation10 + $0x190] sm:$0xff]  ;;  %v4423_v29 = vpack.c.bf16 %v2405_v24, %v2404_v1  ;;  %v2388_v33 = vld [vmem:[#allocation10 + $0x140] sm:$0xff]  ;;  %v2435_v1 = vld [vmem:[#allocation10 + $0x2b8] sm:$0xff]  ;;  %v4459_v45 = vpack.c.bf16 %v2439_v44, %v2438_v43 }
 0x211   : > { %4008 = vmatprep.mubr.f32.mxu1 %v1318_v5  ;;  %v4411_v63 = vpack.c.bf16 %v2399_v60, %v2398_v21  ;;  %v2374_v5 = vld [vmem:[#allocation10 + $0xd0] sm:$0xff]  ;;  %v4425_v7 = vpack.c.bf16 %v2389_v34, %v2388_v33  ;;  %v2148_v21 = vld [vmem:[#allocation2 + $0x1] sm:$0xff]  ;;  %v4451_v24 = vpack.c.bf16 %v2435_v1, %v2434_v23 }
 0x212   : > { %v4395_v31 = vpack.c.bf16 %v2375_v10, %v2374_v5  ;;  %v2408_v60 = vld [vmem:[#allocation10 + $0x1e0] sm:$0xff]  ;;  %2563 = vmatprep.mubr.f32.mxu0 %v2148_v21  ;;  %v4441_v5 = vpack.c.bf16 %v2413_v27, %v2412_v62  ;;  %v2430_v10 = vld [vmem:[#allocation10 + $0x290] sm:$0xff] }
 0x213   : > { %4386 = vmatpush3.bf16.msra.mxu0 %v4385_v37  ;;  %4412 = vmatprep.subr.bf16.mxu1 %v4411_v63  ;;  %v4403_v37 = vpack.c.bf16 %v2379_v36, %v2378_v35  ;;  %v2132_v63 = vld [vmem:[#allocation2] sm:$0xff] }
 0x214   : > { %4009 = vmatmul.mubr.f32.gmra.mrb[70].mxu1 %v1366_v48  ;;  %4388 = vmatprep.subr.bf16.mxu0 %v4387_v53  ;;  %v2359_v48 = vld [vmem:[#allocation10 + $0x58] sm:$0xff]  ;;  %v2390_v53 = vld [vmem:[#allocation10 + $0x150] sm:$0xff]  ;;  %v2436_v34 = vld [vmem:[#allocation10 + $0x2c0] sm:$0xff] }
 0x215   : > { %4414 = vmatpush3.bf16.msra.mxu1 %v4413_v9  ;;  %v4397_v14 = vpack.c.bf16 %v2359_v48, %v2358_v11  ;;  %v4429_v56 = vpack.c.bf16 %v2391_v54, %v2390_v53  ;;  %v2393_v9 = vld [vmem:[#allocation10 + $0x168] sm:$0xff]  ;;  %v2460_v48 = vld [vmem:[#allocation10 + $0x380] sm:$0xff] }
 0x216   : > { %4416 = vmatprep.subr.bf16.mxu1 %v4415_v3  ;;  %v4433_v0 = vpack.c.bf16 %v2393_v9, %v2392_v16  ;;  %v2394_v3 = vld [vmem:[#allocation10 + $0x170] sm:$0xff]  ;;  %v2420_v36 = vld [vmem:[#allocation10 + $0x240] sm:$0xff]  ;;  %v2443_v16 = vld [vmem:[#allocation10 + $0x2f8] sm:$0xff] }
 0x217   : > { %4390 = vmatpush3.bf16.msra.mxu0 %v4389_v58  ;;  %v2409_v58 = vld [vmem:[#allocation10 + $0x1e8] sm:$0xff]  ;;  %v2440_v54 = vld [vmem:[#allocation10 + $0x2e0] sm:$0xff] }
 0x218   : > { %4392 = vmatprep.subr.bf16.mxu0 %v4391_v15  ;;  %v4431_v6 = vpack.c.bf16 %v2409_v58, %v2408_v60  ;;  %v2429_v15 = vld [vmem:[#allocation10 + $0x288] sm:$0xff]  ;;  %v2424_v60 = vld [vmem:[#allocation10 + $0x260] sm:$0xff] }
 0x219   : > { %4418 = vmatpush3.bf16.msra.mxu1 %v4417_v42  ;;  %v4439_v32 = vpack.c.bf16 %v2429_v15, %v2428_v57  ;;  %v4437_v42 = vpack.c.bf16 %v2395_v4, %v2394_v3  ;;  %v2425_v58 = vld [vmem:[#allocation10 + $0x268] sm:$0xff]  ;;  %v2427_v57 = vld [vmem:[#allocation10 + $0x278] sm:$0xff] }
 0x21a   : > { %4420 = vmatprep.subr.bf16.mxu1 %v4419_v39  ;;  %v2415_v39 = vld [vmem:[#allocation10 + $0x218] sm:$0xff] }
 0x21b   : > { %4394 = vmatpush3.bf16.msra.mxu0 %v4393_v61  ;;  %v4435_v61 = vpack.c.bf16 %v2411_v17, %v2410_v49  ;;  %v4445_v51 = vpack.c.bf16 %v2415_v39, %v2414_v41  ;;  %v2476_v49 = vld [vmem:[#allocation10 + $0x400] sm:$0xff]  ;;  %v2477_v17 = vld [vmem:[#allocation10 + $0x408] sm:$0xff] }
 0x21c   : > { %4396 = vmatprep.subr.bf16.mxu0 %v4395_v31  ;;  %v2431_v31 = vld [vmem:[#allocation10 + $0x298] sm:$0xff] }
 0x21d   : > { %4422 = vmatpush3.bf16.msra.mxu1 %v4421_v12  ;;  %v4443_v11 = vpack.c.bf16 %v2431_v31, %v2430_v10  ;;  %v2433_v12 = vld [vmem:[#allocation10 + $0x2a8] sm:$0xff] }
 0x21e   : > { %4424 = vmatprep.subr.bf16.mxu1 %v4423_v29  ;;  %v4447_v19 = vpack.c.bf16 %v2433_v12, %v2432_v55  ;;  %v2419_v29 = vld [vmem:[#allocation10 + $0x238] sm:$0xff] }
 0x21f   : > { %4398 = vmatpush3.bf16.msra.mxu0 %v4397_v14  ;;  %v4471_v14 = vpack.c.bf16 %v2461_v52, %v2460_v48 }
 0x220   : > { %4400 = vmatprep.subr.bf16.mxu0 %v4399_v8  ;;  %v2417_v8 = vld [vmem:[#allocation10 + $0x228] sm:$0xff] }
 0x221   : > { %4426 = vmatpush3.bf16.msra.mxu1 %v4425_v7  ;;  %v4449_v20 = vpack.c.bf16 %v2417_v8, %v2416_v59  ;;  %v2437_v7 = vld [vmem:[#allocation10 + $0x2c8] sm:$0xff] }
 0x222   : > { %4428 = vmatprep.subr.bf16.mxu1 %v4427_v47  ;;  %v4455_v35 = vpack.c.bf16 %v2437_v7, %v2436_v34  ;;  %v2423_v47 = vld [vmem:[#allocation10 + $0x258] sm:$0xff] }
 0x223   : > { %4402 = vmatpush3.bf16.msra.mxu0 %v4401_v28  ;;  %v2418_v28 = vld [vmem:[#allocation10 + $0x230] sm:$0xff] }
 0x224   : > { %4404 = vmatprep.subr.bf16.mxu0 %v4403_v37  ;;  %v4453_v33 = vpack.c.bf16 %v2419_v29, %v2418_v28  ;;  %v2421_v37 = vld [vmem:[#allocation10 + $0x248] sm:$0xff] }
 0x225   : > { %4430 = vmatpush3.bf16.msra.mxu1 %v4429_v56  ;;  %v4457_v40 = vpack.c.bf16 %v2421_v37, %v2420_v36  ;;  %v2441_v56 = vld [vmem:[#allocation10 + $0x2e8] sm:$0xff] }
 0x226   : > { %4432 = vmatprep.subr.bf16.mxu1 %v4431_v6  ;;  %v4463_v21 = vpack.c.bf16 %v2441_v56, %v2440_v54  ;;  %v2442_v6 = vld [vmem:[#allocation10 + $0x2f0] sm:$0xff] }
 0x227   : > { %4406 = vmatpush3.bf16.msra.mxu0 %v4405_v22  ;;  %v2422_v22 = vld [vmem:[#allocation10 + $0x250] sm:$0xff]  ;;  %v4467_v9 = vpack.c.bf16 %v2443_v16, %v2442_v6 }
 0x228   : > { %4440 = vmatprep.subr.bf16.mxu0 %v4439_v32  ;;  %v4461_v53 = vpack.c.bf16 %v2423_v47, %v2422_v22  ;;  %v5346_v32 = vpack.c.bf16 %v2477_v17, %v2476_v49 }
 0x229   : > { %4434 = vmatpush3.bf16.msra.mxu1 %v4433_v0  ;;  %v2426_v0 = vld [vmem:[#allocation10 + $0x270] sm:$0xff] }
 0x22a   : > { %2564 = vmatmul.mubr.f32.vlgmr.msra.gmra.mrb[72].mxu0 %v2132_v63  ;;  %4436 = vmatprep.subr.bf16.mxu1 %v4435_v61  ;;  %v4465_v63 = vpack.c.bf16 %v2425_v58, %v2424_v60  ;;  %v4469_v15 = vpack.c.bf16 %v2427_v57, %v2426_v0 }
 0x22b   : > { %4442 = vmatpush3.bf16.msra.mxu0 %v4441_v5 }
 0x22c   : > { %4444 = vmatprep.subr.bf16.mxu0 %v4443_v11 }
 0x22d   : > { %4438 = vmatpush3.bf16.msra.mxu1 %v4437_v42  ;;  %v1658_v42 = vadd.f32 %v5344_v25, %v5105_v18 }
 0x22e   : > { %4472 = vmatprep.subr.bf16.mxu1 %v4471_v14 }
 0x22f   : > { %4446 = vmatpush3.bf16.msra.mxu0 %v4445_v51 }
 0x230   : > { %4448 = vmatprep.subr.bf16.mxu0 %v4447_v19 }
 0x233   : > { %4450 = vmatpush3.bf16.msra.mxu0 %v4449_v20 }
 0x234   : > { %4452 = vmatprep.subr.bf16.mxu0 %v4451_v24 }
 0x237   : > { %4454 = vmatpush3.bf16.msra.mxu0 %v4453_v33 }
 0x238   : > { %4456 = vmatprep.subr.bf16.mxu0 %v4455_v35 }
 0x23b   : > { %4458 = vmatpush3.bf16.msra.mxu0 %v4457_v40 }
 0x23c   : > { %4460 = vmatprep.subr.bf16.mxu0 %v4459_v45 }
 0x23f   : > { %4462 = vmatpush3.bf16.msra.mxu0 %v4461_v53 }
 0x240   : > { %4464 = vmatprep.subr.bf16.mxu0 %v4463_v21 }
 0x243   : > { %4466 = vmatpush3.bf16.msra.mxu0 %v4465_v63 }
 0x244   : > { %4468 = vmatprep.subr.bf16.mxu0 %v4467_v9 }
 0x247   : > { %4470 = vmatpush3.bf16.msra.mxu0 %v4469_v15 }
 0x248   : > { %4504 = vmatprep.subr.bf16.mxu0 %v5346_v32 }
 0x29d   : > { %v3462_v62 = vpop.f32.mrb[34].mxu1 }
 0x29e   : > { %v3515_v61 = vpop.f32.mrb[40].mxu0  ;;  %v3463_v3 = vpop.f32.mrb[35].mxu1 }
 0x29f   : > { %v3464_v4 = vadd.f32 %v3463_v3, %v3462_v62  ;;  %v3516_v27 = vpop.f32.mrb[41].mxu0 }
 0x2a0   : > { %v3517_v5 = vadd.f32 %v3516_v27, %v3515_v61 }
 0x2a1   : > { %v3465_v10 = vpop.f32.mrb[36].mxu1  ;;  %v1663_v14 = vadd.f32 %v3464_v4, %v5109_v26 }
 0x2a2   : > { %v1763_v31 = vadd.f32 %v3517_v5, %v1658_v42  ;;  %v3518_v11 = vpop.f32.mrb[42].mxu0  ;;  %v3466_v48 = vpop.f32.mrb[37].mxu1 }
 0x2a3   : > { %v3467_v52 = vadd.f32 %v3466_v48, %v3465_v10  ;;  %v3519_v41 = vpop.f32.mrb[43].mxu0 }
 0x2a4   : > { %v3520_v39 = vadd.f32 %v3519_v41, %v3518_v11 }
 0x2a5   : > { %v3468_v51 = vpop.f32.mrb[38].mxu1  ;;  %v1668_v20 = vadd.f32 %v3467_v52, %v5113_v38 }
 0x2a6   : > { %v1768_v55 = vadd.f32 %v3520_v39, %v1663_v14  ;;  %v3521_v12 = vpop.f32.mrb[44].mxu0  ;;  %v3469_v19 = vpop.f32.mrb[39].mxu1 }
 0x2a7   : > { %v3470_v59 = vadd.f32 %v3469_v19, %v3468_v51  ;;  %v3522_v8 = vpop.f32.mrb[45].mxu0 }
 0x2a8   : > { %v3523_v23 = vadd.f32 %v3522_v8, %v3521_v12 }
 0x2a9   : > { %v3471_v18 = vpop.f32.mrb[40].mxu1  ;;  %v1673_v33 = vadd.f32 %v3470_v59, %v5117_v50 }
 0x2aa   : > { %v1773_v25 = vadd.f32 %v3523_v23, %v1668_v20  ;;  %v3524_v1 = vpop.f32.mrb[46].mxu0  ;;  %v3472_v24 = vpop.f32.mrb[41].mxu1 }
 0x2ab   : > { %v3473_v28 = vadd.f32 %v3472_v24, %v3471_v18  ;;  %v3525_v29 = vpop.f32.mrb[47].mxu0 }
 0x2ac   : > { %v3526_v34 = vadd.f32 %v3525_v29, %v3524_v1 }
 0x2ad   : > { %v3474_v26 = vpop.f32.mrb[42].mxu1  ;;  %v1678_v43 = vadd.f32 %v3473_v28, %v5123_v2 }
 0x2ae   : > { %v1778_v7 = vadd.f32 %v3526_v34, %v1673_v33  ;;  %v3527_v35 = vpop.f32.mrb[48].mxu0  ;;  %v3475_v36 = vpop.f32.mrb[43].mxu1 }
 0x2af   : > { %v3476_v37 = vadd.f32 %v3475_v36, %v3474_v26  ;;  %v3528_v40 = vpop.f32.mrb[49].mxu0 }
 0x2b0   : > { %v3529_v44 = vadd.f32 %v3528_v40, %v3527_v35 }
 0x2b1   : > { %v3477_v38 = vpop.f32.mrb[44].mxu1  ;;  %v1683_v56 = vadd.f32 %v3476_v37, %v5133_v13 }
 0x2b2   : > { %v1783_v45 = vadd.f32 %v3529_v44, %v1678_v43  ;;  %v3530_v22 = vpop.f32.mrb[50].mxu0  ;;  %v3478_v47 = vpop.f32.mrb[45].mxu1 }
 0x2b3   : > { %v3479_v53 = vadd.f32 %v3478_v47, %v3477_v38  ;;  %v3531_v54 = vpop.f32.mrb[51].mxu0 }
 0x2b4   : > { %v3532_v21 = vadd.f32 %v3531_v54, %v3530_v22 }
 0x2b5   : > { %v3480_v50 = vpop.f32.mrb[46].mxu1  ;;  %v1688_v9 = vadd.f32 %v3479_v53, %v5144_v30 }
 0x2b6   : > { %v1788_v60 = vadd.f32 %v3532_v21, %v1683_v56  ;;  %v3533_v58 = vpop.f32.mrb[52].mxu0  ;;  %v3481_v63 = vpop.f32.mrb[47].mxu1 }
 0x2b7   : > { %v3482_v6 = vadd.f32 %v3481_v63, %v3480_v50  ;;  %v3534_v16 = vpop.f32.mrb[53].mxu0 }
 0x2b8   : > { %v3535_v0 = vadd.f32 %v3534_v16, %v3533_v58 }
 0x2b9   : > { %v3571_v2 = vpop.f32.mrb[48].mxu1  ;;  %v1693_v61 = vadd.f32 %v3482_v6, %v5156_v46 }
 0x2ba   : > { %v1793_v57 = vadd.f32 %v3535_v0, %v1688_v9  ;;  %v3536_v15 = vpop.f32.mrb[54].mxu0  ;;  %v3572_v49 = vpop.f32.mrb[49].mxu1 }
 0x2bb   : > { %v3537_v17 = vpop.f32.mrb[55].mxu0  ;;  %v3573_v62 = vadd.f32 %v3572_v49, %v3571_v2 }
 0x2bc   : > { %v3538_v3 = vadd.f32 %v3537_v17, %v3536_v15 }
 0x2bd   : > { %v1868_v13 = vadd.f32 %v3573_v62, %v1763_v31  ;;  %v3574_v4 = vpop.f32.mrb[50].mxu1 }
 0x2be   : > { %v1798_v27 = vadd.f32 %v3538_v3, %v1693_v61  ;;  %v3627_v42 = vpop.f32.mrb[56].mxu0  ;;  %v3575_v5 = vpop.f32.mrb[51].mxu1 }
 0x2bf   : > { %v3576_v10 = vadd.f32 %v3575_v5, %v3574_v4  ;;  %v3628_v11 = vpop.f32.mrb[57].mxu0 }
 0x2c0   : > { %v3629_v48 = vadd.f32 %v3628_v11, %v3627_v42 }
 0x2c1   : > { %v1873_v52 = vadd.f32 %v3576_v10, %v1768_v55  ;;  %v3577_v30 = vpop.f32.mrb[52].mxu1 }
 0x2c2   : > { %v3630_v41 = vpop.f32.mrb[58].mxu0  ;;  %v3578_v14 = vpop.f32.mrb[53].mxu1  ;;  %v1973_v39 = vadd.f32 %v3629_v48, %v1868_v13 }
 0x2c3   : > { %v3579_v51 = vadd.f32 %v3578_v14, %v3577_v30  ;;  %v3631_v12 = vpop.f32.mrb[59].mxu0 }
 0x2c4   : > { %v3632_v19 = vadd.f32 %v3631_v12, %v3630_v41  ;;  %v2444_v12 = vld [vmem:[#allocation10 + $0x300] sm:$0xff] }
 0x2c5   : > { %v1878_v59 = vadd.f32 %v3579_v51, %v1773_v25  ;;  %v3580_v8 = vpop.f32.mrb[54].mxu1 }
 0x2c6   : > { %v3633_v46 = vpop.f32.mrb[60].mxu0  ;;  %v3581_v20 = vpop.f32.mrb[55].mxu1  ;;  %v1978_v31 = vadd.f32 %v3632_v19, %v1873_v52  ;;  %v2445_v19 = vld [vmem:[#allocation10 + $0x308] sm:$0xff] }
 0x2c7   : > { %v3582_v23 = vadd.f32 %v3581_v20, %v3580_v8  ;;  %v3634_v18 = vpop.f32.mrb[61].mxu0  ;;  %v2462_v8 = vld [vmem:[#allocation10 + $0x390] sm:$0xff] }
 0x2c8   : > { %v3635_v1 = vadd.f32 %v3634_v18, %v3633_v46  ;;  %v2463_v46 = vld [vmem:[#allocation10 + $0x398] sm:$0xff]  ;;  %v2164_v18 = vld [vmem:[#allocation2 + $0x2] sm:$0xff] }
 0x2c9   : > { %v1883_v24 = vadd.f32 %v3582_v23, %v1778_v7  ;;  %v3583_v28 = vpop.f32.mrb[56].mxu1 }
 0x2ca   : > { %v3636_v29 = vpop.f32.mrb[62].mxu0  ;;  %v3584_v33 = vpop.f32.mrb[57].mxu1  ;;  %v1983_v55 = vadd.f32 %v3635_v1, %v1878_v59  ;;  %v4473_v1 = vpack.c.bf16 %v2445_v19, %v2444_v12  ;;  %v2474_v12 = vld [vmem:[#allocation10 + $0x3f0] sm:$0xff]  ;;  %v2475_v19 = vld [vmem:[#allocation10 + $0x3f8] sm:$0xff] }
 0x2cb   : > { %v3585_v34 = vadd.f32 %v3584_v33, %v3583_v28  ;;  %v3637_v26 = vpop.f32.mrb[63].mxu0  ;;  %v4475_v33 = vpack.c.bf16 %v2463_v46, %v2462_v8  ;;  %v4499_v46 = vpack.c.bf16 %v2475_v19, %v2474_v12 }
 0x2cc   : > { %v3638_v35 = vadd.f32 %v3637_v26, %v3636_v29 }
 0x2cd   : > { %v1888_v36 = vadd.f32 %v3585_v34, %v1783_v45  ;;  %v3586_v37 = vpop.f32.mrb[58].mxu1  ;;  %v2447_v34 = vld [vmem:[#allocation10 + $0x318] sm:$0xff] }
 0x2ce   : > { %v3639_v40 = vpop.f32.mrb[64].mxu0  ;;  %v3587_v43 = vpop.f32.mrb[59].mxu1  ;;  %v1988_v25 = vadd.f32 %v3638_v35, %v1883_v24  ;;  %v2464_v35 = vld [vmem:[#allocation10 + $0x3a0] sm:$0xff] }
 0x2cf   : > { %v3588_v44 = vadd.f32 %v3587_v43, %v3586_v37  ;;  %v3640_v38 = vpop.f32.mrb[65].mxu0 }
 0x2d0   : > { %v3641_v22 = vadd.f32 %v3640_v38, %v3639_v40  ;;  %v2448_v38 = vld [vmem:[#allocation10 + $0x320] sm:$0xff] }
 0x2d1   : > { %v1893_v47 = vadd.f32 %v3588_v44, %v1788_v60  ;;  %v3589_v53 = vpop.f32.mrb[60].mxu1 }
 0x2d2   : > { %v3642_v54 = vpop.f32.mrb[66].mxu0  ;;  %v3590_v56 = vpop.f32.mrb[61].mxu1  ;;  %v1993_v7 = vadd.f32 %v3641_v22, %v1888_v36  ;;  %v2465_v36 = vld [vmem:[#allocation10 + $0x3a8] sm:$0xff] }
 0x2d3   : > { %v3591_v21 = vadd.f32 %v3590_v56, %v3589_v53  ;;  %v3643_v50 = vpop.f32.mrb[67].mxu0  ;;  %v4479_v44 = vpack.c.bf16 %v2465_v36, %v2464_v35  ;;  %v2449_v22 = vld [vmem:[#allocation10 + $0x328] sm:$0xff]  ;;  %v2466_v53 = vld [vmem:[#allocation10 + $0x3b0] sm:$0xff] }
 0x2d4   : > { %v3644_v58 = vadd.f32 %v3643_v50, %v3642_v54  ;;  %v2467_v54 = vld [vmem:[#allocation10 + $0x3b8] sm:$0xff]  ;;  %v2450_v50 = vld [vmem:[#allocation10 + $0x330] sm:$0xff]  ;;  %v2481_v35 = vld [vmem:[#allocation10 + $0x428] sm:$0xff] }
 0x2d5   : > { %v1898_v63 = vadd.f32 %v3591_v21, %v1793_v57  ;;  %v3592_v6 = vpop.f32.mrb[62].mxu1  ;;  %v4483_v21 = vpack.c.bf16 %v2467_v54, %v2466_v53  ;;  %v2491_v54 = vld [vmem:[#allocation10 + $0x478] sm:$0xff] }
 0x2d6   : > { %v3645_v16 = vpop.f32.mrb[68].mxu0  ;;  %v3593_v9 = vpop.f32.mrb[63].mxu1  ;;  %v1998_v45 = vadd.f32 %v3644_v58, %v1893_v47  ;;  %v2451_v58 = vld [vmem:[#allocation10 + $0x338] sm:$0xff] }
 0x2d7   : > { %v3594_v0 = vadd.f32 %v3593_v9, %v3592_v6  ;;  %v3646_v2 = vpop.f32.mrb[69].mxu0  ;;  %v2468_v6 = vld [vmem:[#allocation10 + $0x3c0] sm:$0xff] }
 0x2d8   : > { %v3647_v15 = vadd.f32 %v3646_v2, %v3645_v16  ;;  %v2469_v16 = vld [vmem:[#allocation10 + $0x3c8] sm:$0xff]  ;;  %v2452_v2 = vld [vmem:[#allocation10 + $0x340] sm:$0xff] }
 0x2d9   : > { %v1903_v49 = vadd.f32 %v3594_v0, %v1798_v27  ;;  %v4487_v0 = vpack.c.bf16 %v2469_v16, %v2468_v6 }
 0x2da   : > { %v3648_v17 = vpop.f32.mrb[70].mxu0  ;;  %v2003_v62 = vadd.f32 %v3647_v15, %v1898_v63  ;;  %v2453_v15 = vld [vmem:[#allocation10 + $0x348] sm:$0xff] }
 0x2db   : > { %v4001_v61 = vpop.f32.mrb[64].mxu1  ;;  %v3649_v60 = vpop.f32.mrb[71].mxu0 }
 0x2dc   : > { %v2083_v3 = vadd.f32 %v4001_v61, %v1978_v31  ;;  %v3650_v13 = vadd.f32 %v3649_v60, %v3648_v17  ;;  %v2077_v4 = vpop.f32.mrb[65].mxu1  ;;  %v2470_v17 = vld [vmem:[#allocation10 + $0x3d0] sm:$0xff]  ;;  %v4489_v60 = vpack.c.bf16 %v2453_v15, %v2452_v2 }
 0x2dd   : > { %v2078_v42 = vadd.f32 %v2077_v4, %v1973_v39  ;;  %v2455_v4 = vld [vmem:[#allocation10 + $0x358] sm:$0xff] }
 0x2de   : > { %v5358_v5 = vmax.f32 %v2083_v3, 0.0  ;;  %v2008_v10 = vadd.f32 %v3650_v13, %v1903_v49  ;;  %v2454_v13 = vld [vmem:[#allocation10 + $0x350] sm:$0xff] }
 0x2df   : > { %v5360_v57 = vmax.f32 %v2078_v42, 0.0  ;;  %v4004_v11 = vpop.f32.mrb[66].mxu1 }
 0x2e0   : > { %2125 = vst [vmem:[#allocation2 + $0x21] sm:$0xff] %v5358_v5  ;;  %v2093_v48 = vadd.f32 %v4004_v11, %v1988_v25  ;;  %v2087_v52 = vpop.f32.mrb[67].mxu1  ;;  %v2473_v11 = vld [vmem:[#allocation10 + $0x3e8] sm:$0xff] }
 0x2e1   : > { %2124 = vst [vmem:[#allocation2 + $0x11] sm:$0xff] %v5360_v57  ;;  %v2088_v27 = vadd.f32 %v2087_v52, %v1983_v55  ;;  %2568 = vmatprep.mubr.f32.mxu0 %v5360_v57  ;;  %v2446_v55 = vld [vmem:[#allocation10 + $0x310] sm:$0xff]  ;;  %v4493_v52 = vpack.c.bf16 %v2455_v4, %v2454_v13 }
 0x2e2   : > { %v5365_v30 = vmax.f32 %v2093_v48, 0.0  ;;  %v4477_v25 = vpack.c.bf16 %v2447_v34, %v2446_v55 }
 0x2e3   : > { %v5367_v41 = vmax.f32 %v2088_v27, 0.0  ;;  %v4007_v14 = vpop.f32.mrb[68].mxu1 }
 0x2e4   : > { %2127 = vst [vmem:[#allocation2 + $0x41] sm:$0xff] %v5365_v30  ;;  %v2103_v39 = vadd.f32 %v4007_v14, %v1998_v45  ;;  %v2097_v51 = vpop.f32.mrb[69].mxu1  ;;  %v4485_v45 = vpack.c.bf16 %v2451_v58, %v2450_v50  ;;  %v2456_v14 = vld [vmem:[#allocation10 + $0x360] sm:$0xff] }
 0x2e5   : > { %2126 = vst [vmem:[#allocation2 + $0x31] sm:$0xff] %v5367_v41  ;;  %v2098_v59 = vadd.f32 %v2097_v51, %v1993_v7  ;;  %v4481_v7 = vpack.c.bf16 %v2449_v22, %v2448_v38  ;;  %v2487_v38 = vld [vmem:[#allocation10 + $0x458] sm:$0xff] }
 0x2e6   : > { %v5371_v20 = vmax.f32 %v2103_v39, 0.0  ;;  %v2457_v39 = vld [vmem:[#allocation10 + $0x368] sm:$0xff] }
 0x2e7   : > { %v5373_v31 = vmax.f32 %v2098_v59, 0.0  ;;  %v4010_v23 = vpop.f32.mrb[70].mxu1  ;;  %v5380_v40 = vld [vmem:[#allocation2 + $0x20] sm:$0xff]  ;;  %v4497_v8 = vpack.c.bf16 %v2457_v39, %v2456_v14 }
 0x2e8   : > { %2129 = vst [vmem:[#allocation2 + $0x61] sm:$0xff] %v5371_v20  ;;  %v2113_v24 = vadd.f32 %v4010_v23, %v2008_v10  ;;  %v2107_v28 = vpop.f32.mrb[71].mxu1  ;;  %v2180_v29 = vld [vmem:[#allocation2 + $0x10] sm:$0xff]  ;;  %v5396_v63 = vld [vmem:[#allocation2 + $0x22] sm:$0xff] }
 0x2e9   : > { %2128 = vst [vmem:[#allocation2 + $0x51] sm:$0xff] %v5373_v31  ;;  %v2108_v26 = vadd.f32 %v2107_v28, %v2003_v62  ;;  %2668 = vmatprep.mubr.f32.mxu1 %v2180_v29  ;;  %2569 = vmatmul.mubr.f32.gmra.mrb[74].mxu0 %v2180_v29  ;;  %v5388_v47 = vld [vmem:[#allocation2 + $0x12] sm:$0xff]  ;;  %v2472_v10 = vld [vmem:[#allocation10 + $0x3e0] sm:$0xff] }
 0x2ea   : > { %v5377_v37 = vmax.f32 %v2113_v24, 0.0  ;;  %2669 = vmatmul.mubr.f32.vlgmr.msra.gmra.mrb[72].mxu1 %v2164_v18  ;;  %2573 = vmatprep.mubr.f32.mxu0 %v5358_v5  ;;  %v2471_v62 = vld [vmem:[#allocation10 + $0x3d8] sm:$0xff]  ;;  %v4495_v27 = vpack.c.bf16 %v2473_v11, %v2472_v10  ;;  %v2458_v23 = vld [vmem:[#allocation10 + $0x370] sm:$0xff] }
 0x2eb   : > { %v5382_v43 = vmax.f32 %v2108_v26, 0.0  ;;  %2673 = vmatprep.mubr.f32.mxu1 %v5380_v40  ;;  %4474 = vmatpush3.bf16.msra.mxu1 %v4473_v1  ;;  %v5400_v9 = vld [vmem:[#allocation2 + $0x40] sm:$0xff]  ;;  %v4491_v3 = vpack.c.bf16 %v2471_v62, %v2470_v17  ;;  %v2459_v18 = vld [vmem:[#allocation10 + $0x378] sm:$0xff]  ;;  %v2478_v28 = vld [vmem:[#allocation10 + $0x410] sm:$0xff] }
 0x2ec   : > { %2131 = vst [vmem:[#allocation2 + $0x81] sm:$0xff] %v5377_v37  ;;  %4476 = vmatprep.subr.bf16.mxu1 %v4475_v33  ;;  %v5392_v56 = vld [vmem:[#allocation2 + $0x30] sm:$0xff]  ;;  %v5412_v42 = vld [vmem:[#allocation2 + $0x42] sm:$0xff]  ;;  %v2479_v29 = vld [vmem:[#allocation10 + $0x418] sm:$0xff]  ;;  %v4501_v33 = vpack.c.bf16 %v2459_v18, %v2458_v23 }
 0x2ed   : > { %2130 = vst [vmem:[#allocation2 + $0x71] sm:$0xff] %v5382_v43  ;;  %2574 = vmatmul.mubr.f32.gmra.mrb[76].mxu0 %v5380_v40  ;;  %v5404_v49 = vld [vmem:[#allocation2 + $0x32] sm:$0xff]  ;;  %v4507_v34 = vpack.c.bf16 %v2479_v29, %v2478_v28  ;;  %v2480_v26 = vld [vmem:[#allocation10 + $0x420] sm:$0xff] }
 0x2ee   : > { %2674 = vmatmul.mubr.f32.gmra.mrb[74].mxu1 %v5388_v47  ;;  %2578 = vmatprep.mubr.f32.mxu0 %v5367_v41  ;;  %v4511_v36 = vpack.c.bf16 %v2481_v35, %v2480_v26 }
 0x2ef   : > { %2678 = vmatprep.mubr.f32.mxu1 %v5392_v56  ;;  %4478 = vmatpush3.bf16.msra.mxu1 %v4477_v25  ;;  %v5416_v48 = vld [vmem:[#allocation2 + $0x60] sm:$0xff]  ;;  %v2483_v25 = vld [vmem:[#allocation10 + $0x438] sm:$0xff] }
 0x2f0   : > { %4480 = vmatprep.subr.bf16.mxu1 %v4479_v44  ;;  %v5408_v61 = vld [vmem:[#allocation2 + $0x50] sm:$0xff]  ;;  %v5428_v1 = vld [vmem:[#allocation2 + $0x62] sm:$0xff] }
 0x2f1   : > { %2579 = vmatmul.mubr.f32.gmra.mrb[78].mxu0 %v5392_v56  ;;  %v5420_v51 = vld [vmem:[#allocation2 + $0x52] sm:$0xff] }
 0x2f2   : > { %2679 = vmatmul.mubr.f32.gmra.mrb[76].mxu1 %v5396_v63  ;;  %2583 = vmatprep.mubr.f32.mxu0 %v5365_v30 }
 0x2f3   : > { %2683 = vmatprep.mubr.f32.mxu1 %v5400_v9  ;;  %4482 = vmatpush3.bf16.msra.mxu1 %v4481_v7  ;;  %v5431_v24 = vld [vmem:[#allocation2 + $0x80] sm:$0xff] }
 0x2f4   : > { %4484 = vmatprep.subr.bf16.mxu1 %v4483_v21  ;;  %v5424_v59 = vld [vmem:[#allocation2 + $0x70] sm:$0xff] }
 0x2f5   : > { %2584 = vmatmul.mubr.f32.gmra.mrb[80].mxu0 %v5400_v9  ;;  %v5435_v55 = vld [vmem:[#allocation2 + $0x72] sm:$0xff] }
 0x2f6   : > { %2684 = vmatmul.mubr.f32.gmra.mrb[78].mxu1 %v5404_v49  ;;  %2588 = vmatprep.mubr.f32.mxu0 %v5373_v31 }
 0x2f7   : > { %2688 = vmatprep.mubr.f32.mxu1 %v5408_v61  ;;  %4486 = vmatpush3.bf16.msra.mxu1 %v4485_v45 }
 0x2f8   : > { %4488 = vmatprep.subr.bf16.mxu1 %v4487_v0 }
 0x2f9   : > { %2589 = vmatmul.mubr.f32.gmra.mrb[82].mxu0 %v5408_v61 }
 0x2fa   : > { %2689 = vmatmul.mubr.f32.gmra.mrb[80].mxu1 %v5412_v42  ;;  %2593 = vmatprep.mubr.f32.mxu0 %v5371_v20 }
 0x2fb   : > { %2693 = vmatprep.mubr.f32.mxu1 %v5416_v48  ;;  %4490 = vmatpush3.bf16.msra.mxu1 %v4489_v60 }
 0x2fc   : > { %4492 = vmatprep.subr.bf16.mxu1 %v4491_v3 }
 0x2fd   : > { %2594 = vmatmul.mubr.f32.gmra.mrb[84].mxu0 %v5416_v48  ;;  %v3707_v21 = vpop.f32.mrb[72].mxu0 }
 0x2fe   : > { %2694 = vmatmul.mubr.f32.gmra.mrb[82].mxu1 %v5420_v51  ;;  %2598 = vmatprep.mubr.f32.mxu0 %v5382_v43  ;;  %v3708_v50 = vpop.f32.mrb[73].mxu0 }
 0x2ff   : > { %2698 = vmatprep.mubr.f32.mxu1 %v5424_v59  ;;  %4494 = vmatpush3.bf16.msra.mxu1 %v4493_v52  ;;  %v3709_v58 = vadd.f32 %v3708_v50, %v3707_v21 }
 0x300   : > { %4496 = vmatprep.subr.bf16.mxu1 %v4495_v27 }
 0x301   : > { %2599 = vmatmul.mubr.f32.gmra.mrb[86].mxu0 %v5424_v59 }
 0x302   : > { %2699 = vmatmul.mubr.f32.gmra.mrb[84].mxu1 %v5428_v1  ;;  %2773 = vmatprep.mubr.f32.mxu0 %v5388_v47  ;;  %v2489_v47 = vld [vmem:[#allocation10 + $0x468] sm:$0xff] }
 0x303   : > { %2703 = vmatprep.mubr.f32.mxu1 %v5431_v24  ;;  %4498 = vmatpush3.bf16.msra.mxu1 %v4497_v8 }
 0x304   : > { %4500 = vmatprep.subr.bf16.mxu1 %v4499_v46 }
 0x305   : > { %2774 = vmatmul.mubr.f32.vlgmr.msra.gmra.mrb[88].mxu0 %v5360_v57  ;;  %v2482_v57 = vld [vmem:[#allocation10 + $0x430] sm:$0xff] }
 0x306   : > { %2704 = vmatmul.mubr.f32.gmra.mrb[86].mxu1 %v5435_v55  ;;  %2778 = vmatprep.mubr.f32.mxu0 %v5396_v63  ;;  %v4515_v44 = vpack.c.bf16 %v2483_v25, %v2482_v57 }
 0x307   : > { %4502 = vmatpush3.bf16.msra.mxu1 %v4501_v33  ;;  %2878 = vmatprep.mubr.f32.mxu1 %v5358_v5 }
 0x308   : > { %4506 = vmatpush3.bf16.msra.mxu0 %v5346_v32  ;;  %4535 = vmatprep.subr.bf16.mxu1 %v5346_v32 }
 0x309   : > { %2779 = vmatmul.mubr.f32.gmra.mrb[90].mxu0 %v5358_v5  ;;  %4508 = vmatprep.subr.bf16.mxu0 %v4507_v34  ;;  %v2484_v5 = vld [vmem:[#allocation10 + $0x440] sm:$0xff] }
 0x30a   : > { %2879 = vmatmul.mubr.f32.vlgmr.msra.gmra.mrb[88].mxu1 %v5380_v40  ;;  %2783 = vmatprep.mubr.f32.mxu0 %v5404_v49  ;;  %v2485_v40 = vld [vmem:[#allocation10 + $0x448] sm:$0xff] }
 0x30b   : > { %2883 = vmatprep.mubr.f32.mxu1 %v5367_v41  ;;  %4543 = vmatpush3.bf16.msra.mxu1 %v5346_v32  ;;  %v4519_v32 = vpack.c.bf16 %v2485_v40, %v2484_v5 }
 0x30c   : > { %4510 = vmatpush3.bf16.msra.mxu0 %v4507_v34  ;;  %4536 = vmatprep.subr.bf16.mxu1 %v4507_v34 }
 0x30d   : > { %2784 = vmatmul.mubr.f32.gmra.mrb[92].mxu0 %v5367_v41  ;;  %4512 = vmatprep.subr.bf16.mxu0 %v4511_v36  ;;  %v2486_v41 = vld [vmem:[#allocation10 + $0x450] sm:$0xff] }
 0x30e   : > { %2884 = vmatmul.mubr.f32.gmra.mrb[90].mxu1 %v5392_v56  ;;  %2788 = vmatprep.mubr.f32.mxu0 %v5412_v42  ;;  %v4523_v22 = vpack.c.bf16 %v2487_v38, %v2486_v41  ;;  %v2219_v56 = vld [vmem:[#allocation2 + $0x82] sm:$0xff] }
 0x30f   : > { %2888 = vmatprep.mubr.f32.mxu1 %v5365_v30  ;;  %4544 = vmatpush3.bf16.msra.mxu1 %v4507_v34 }
 0x310   : > { %4514 = vmatpush3.bf16.msra.mxu0 %v4511_v36  ;;  %4537 = vmatprep.subr.bf16.mxu1 %v4511_v36 }
 0x311   : > { %2789 = vmatmul.mubr.f32.gmra.mrb[94].mxu0 %v5365_v30  ;;  %4516 = vmatprep.subr.bf16.mxu0 %v4515_v44  ;;  %v2488_v30 = vld [vmem:[#allocation10 + $0x460] sm:$0xff] }
 0x312   : > { %2889 = vmatmul.mubr.f32.gmra.mrb[92].mxu1 %v5400_v9  ;;  %2793 = vmatprep.mubr.f32.mxu0 %v5420_v51  ;;  %v4527_v53 = vpack.c.bf16 %v2489_v47, %v2488_v30 }
 0x313   : > { %2893 = vmatprep.mubr.f32.mxu1 %v5373_v31  ;;  %4545 = vmatpush3.bf16.msra.mxu1 %v4511_v36 }
 0x314   : > { %4518 = vmatpush3.bf16.msra.mxu0 %v4515_v44  ;;  %4538 = vmatprep.subr.bf16.mxu1 %v4515_v44 }
 0x315   : > { %2794 = vmatmul.mubr.f32.gmra.mrb[96].mxu0 %v5373_v31  ;;  %4520 = vmatprep.subr.bf16.mxu0 %v4519_v32  ;;  %v2490_v31 = vld [vmem:[#allocation10 + $0x470] sm:$0xff] }
 0x316   : > { %2894 = vmatmul.mubr.f32.gmra.mrb[94].mxu1 %v5408_v61  ;;  %2798 = vmatprep.mubr.f32.mxu0 %v5428_v1  ;;  %v4531_v7 = vpack.c.bf16 %v2491_v54, %v2490_v31 }
 0x317   : > { %2898 = vmatprep.mubr.f32.mxu1 %v5371_v20  ;;  %4546 = vmatpush3.bf16.msra.mxu1 %v4515_v44 }
 0x318   : > { %4522 = vmatpush3.bf16.msra.mxu0 %v4519_v32  ;;  %4539 = vmatprep.subr.bf16.mxu1 %v4519_v32 }
 0x319   : > { %2799 = vmatmul.mubr.f32.gmra.mrb[98].mxu0 %v5371_v20  ;;  %4524 = vmatprep.subr.bf16.mxu0 %v4523_v22  ;;  %v2251_v20 = vld [vmem:[#allocation2 + $0x91] sm:$0xff] }
 0x31a   : > { %2899 = vmatmul.mubr.f32.gmra.mrb[96].mxu1 %v5416_v48  ;;  %2803 = vmatprep.mubr.f32.mxu0 %v5435_v55 }
 0x31b   : > { %2903 = vmatprep.mubr.f32.mxu1 %v5382_v43  ;;  %4547 = vmatpush3.bf16.msra.mxu1 %v4519_v32 }
 0x31c   : > { %4526 = vmatpush3.bf16.msra.mxu0 %v4523_v22  ;;  %4540 = vmatprep.subr.bf16.mxu1 %v4523_v22 }
 0x31d   : > { %2804 = vmatmul.mubr.f32.gmra.mrb[100].mxu0 %v5382_v43  ;;  %4528 = vmatprep.subr.bf16.mxu0 %v4527_v53  ;;  %v2235_v43 = vld [vmem:[#allocation2 + $0x90] sm:$0xff] }
 0x31e   : > { %2904 = vmatmul.mubr.f32.gmra.mrb[98].mxu1 %v5424_v59  ;;  %2808 = vmatprep.mubr.f32.mxu0 %v2219_v56 }
 0x31f   : > { %2908 = vmatprep.mubr.f32.mxu1 %v5377_v37  ;;  %4548 = vmatpush3.bf16.msra.mxu1 %v4523_v22 }
 0x320   : > { %4530 = vmatpush3.bf16.msra.mxu0 %v4527_v53  ;;  %4541 = vmatprep.subr.bf16.mxu1 %v4527_v53 }
 0x321   : > { %2809 = vmatmul.mubr.f32.gmra.mrb[102].mxu0 %v5377_v37  ;;  %4532 = vmatprep.subr.bf16.mxu0 %v4531_v7  ;;  %v2267_v37 = vld [vmem:[#allocation2 + $0x92] sm:$0xff] }
 0x322   : > { %2909 = vmatmul.mubr.f32.gmra.mrb[100].mxu1 %v5431_v24  ;;  %4043 = vmatprep.mubr.f32.mxu0 %v5396_v63  ;;  %v3171_v63 = vld [vmem:[%s5534_s4] ss:$0 sm:$0xff] }
 0x323   : > { %4549 = vmatpush3.bf16.msra.mxu1 %v4527_v53  ;;  %2913 = vmatprep.mubr.f32.mxu1 %v2251_v20  ;;  %v2566_v16 = vadd.f32 %v3709_v58, %v3171_v63 }
 0x324   : > { %4534 = vmatpush3.bf16.msra.mxu0 %v4531_v7  ;;  %4542 = vmatprep.subr.bf16.mxu1 %v4531_v7 }
 0x326   : > { %2914 = vmatmul.mubr.f32.gmra.mrb[102].mxu1 %v2235_v43 }
 0x327   : > { %4044 = vmatmul.mubr.f32.vlgmr.msra.gmra.mrb[104].mxu0 %v5404_v49  ;;  %4550 = vmatpush3.bf16.msra.mxu1 %v4531_v7 }
 0x328   : > { %4046 = vmatprep.mubr.f32.mxu0 %v5412_v42  ;;  %4049 = vmatprep.mubr.f32.mxu1 %v5428_v1 }
 0x32a   : > { %4050 = vmatmul.mubr.f32.vlgmr.msra.gmra.mrb[104].mxu1 %v5435_v55 }
 0x32b   : > { %4047 = vmatmul.mubr.f32.gmra.mrb[106].mxu0 %v5420_v51  ;;  %4052 = vmatprep.mubr.f32.mxu1 %v2219_v56 }
 0x32e   : > { %4053 = vmatmul.mubr.f32.gmra.mrb[106].mxu1 %v2267_v37 }
 0x3bc   : > { %v3710_v6 = vpop.f32.mrb[74].mxu0 }
 0x3bd   : > { %v3763_v9 = vpop.f32.mrb[72].mxu1  ;;  %v3711_v45 = vpop.f32.mrb[75].mxu0 }
 0x3be   : > { %v3712_v0 = vadd.f32 %v3711_v45, %v3710_v6  ;;  %v3764_v2 = vpop.f32.mrb[73].mxu1 }
 0x3bf   : > { %v3765_v15 = vadd.f32 %v3764_v2, %v3763_v9 }
 0x3c0   : > { %v3713_v49 = vpop.f32.mrb[76].mxu0  ;;  %v2571_v13 = vadd.f32 %v3712_v0, %v3171_v63 }
 0x3c1   : > { %v2671_v17 = vadd.f32 %v3765_v15, %v2566_v16  ;;  %v3766_v62 = vpop.f32.mrb[74].mxu1  ;;  %v3714_v61 = vpop.f32.mrb[77].mxu0 }
 0x3c2   : > { %v3715_v60 = vadd.f32 %v3714_v61, %v3713_v49  ;;  %v3767_v3 = vpop.f32.mrb[75].mxu1 }
 0x3c3   : > { %v3768_v4 = vadd.f32 %v3767_v3, %v3766_v62 }
 0x3c4   : > { %v3716_v42 = vpop.f32.mrb[78].mxu0  ;;  %v2576_v14 = vadd.f32 %v3715_v60, %v3171_v63 }
 0x3c5   : > { %v2676_v10 = vadd.f32 %v3768_v4, %v2571_v13  ;;  %v3769_v11 = vpop.f32.mrb[76].mxu1  ;;  %v3717_v48 = vpop.f32.mrb[79].mxu0 }
 0x3c6   : > { %v3718_v52 = vadd.f32 %v3717_v48, %v3716_v42  ;;  %v3770_v27 = vpop.f32.mrb[77].mxu1 }
 0x3c7   : > { %v3771_v39 = vadd.f32 %v3770_v27, %v3769_v11 }
 0x3c8   : > { %v3719_v51 = vpop.f32.mrb[80].mxu0  ;;  %v2581_v23 = vadd.f32 %v3718_v52, %v3171_v63 }
 0x3c9   : > { %v2681_v12 = vadd.f32 %v3771_v39, %v2576_v14  ;;  %v3772_v19 = vpop.f32.mrb[78].mxu1  ;;  %v3720_v59 = vpop.f32.mrb[81].mxu0 }
 0x3ca   : > { %v3721_v8 = vadd.f32 %v3720_v59, %v3719_v51  ;;  %v3773_v46 = vpop.f32.mrb[79].mxu1 }
 0x3cb   : > { %v3774_v18 = vadd.f32 %v3773_v46, %v3772_v19 }
 0x3cc   : > { %v3722_v1 = vpop.f32.mrb[82].mxu0  ;;  %v2586_v34 = vadd.f32 %v3721_v8, %v3171_v63 }
 0x3cd   : > { %v2686_v24 = vadd.f32 %v3774_v18, %v2581_v23  ;;  %v3775_v28 = vpop.f32.mrb[80].mxu1  ;;  %v3723_v29 = vpop.f32.mrb[83].mxu0 }
 0x3ce   : > { %v3724_v33 = vadd.f32 %v3723_v29, %v3722_v1  ;;  %v3776_v55 = vpop.f32.mrb[81].mxu1 }
 0x3cf   : > { %v3777_v26 = vadd.f32 %v3776_v55, %v3775_v28 }
 0x3d0   : > { %v3725_v35 = vpop.f32.mrb[84].mxu0  ;;  %v2591_v40 = vadd.f32 %v3724_v33, %v3171_v63 }
 0x3d1   : > { %v2691_v36 = vadd.f32 %v3777_v26, %v2586_v34  ;;  %v3778_v57 = vpop.f32.mrb[82].mxu1  ;;  %v3726_v25 = vpop.f32.mrb[85].mxu0 }
 0x3d2   : > { %v3727_v44 = vadd.f32 %v3726_v25, %v3725_v35  ;;  %v3779_v5 = vpop.f32.mrb[83].mxu1 }
 0x3d3   : > { %v3780_v32 = vadd.f32 %v3779_v5, %v3778_v57 }
 0x3d4   : > { %v3728_v41 = vpop.f32.mrb[86].mxu0  ;;  %v2596_v31 = vadd.f32 %v3727_v44, %v3171_v63 }
 0x3d5   : > { %v2696_v38 = vadd.f32 %v3780_v32, %v2591_v40  ;;  %v3781_v22 = vpop.f32.mrb[84].mxu1  ;;  %v3729_v30 = vpop.f32.mrb[87].mxu0 }
 0x3d6   : > { %v3730_v47 = vadd.f32 %v3729_v30, %v3728_v41  ;;  %v3782_v53 = vpop.f32.mrb[85].mxu1 }
 0x3d7   : > { %v3783_v54 = vadd.f32 %v3782_v53, %v3781_v22 }
 0x3d8   : > { %v3819_v56 = vpop.f32.mrb[88].mxu0  ;;  %v2601_v50 = vadd.f32 %v3730_v47, %v3171_v63 }
 0x3d9   : > { %v2701_v7 = vadd.f32 %v3783_v54, %v2596_v31  ;;  %v3784_v20 = vpop.f32.mrb[86].mxu1  ;;  %v3820_v43 = vpop.f32.mrb[89].mxu0 }
 0x3da   : > { %v3785_v37 = vpop.f32.mrb[87].mxu1  ;;  %v3821_v21 = vadd.f32 %v3820_v43, %v3819_v56 }
 0x3db   : > { %v3786_v58 = vadd.f32 %v3785_v37, %v3784_v20 }
 0x3dc   : > { %v2776_v6 = vadd.f32 %v3821_v21, %v2671_v17  ;;  %v3822_v16 = vpop.f32.mrb[90].mxu0 }
 0x3dd   : > { %v2706_v9 = vadd.f32 %v3786_v58, %v2601_v50  ;;  %v3875_v45 = vpop.f32.mrb[88].mxu1  ;;  %v3823_v0 = vpop.f32.mrb[91].mxu0 }
 0x3de   : > { %v3824_v2 = vadd.f32 %v3823_v0, %v3822_v16  ;;  %v3876_v15 = vpop.f32.mrb[89].mxu1 }
 0x3df   : > { %v3877_v49 = vadd.f32 %v3876_v15, %v3875_v45 }
 0x3e0   : > { %v2781_v62 = vadd.f32 %v3824_v2, %v2676_v10  ;;  %v3825_v61 = vpop.f32.mrb[92].mxu0 }
 0x3e1   : > { %v3878_v60 = vpop.f32.mrb[90].mxu1  ;;  %v3826_v3 = vpop.f32.mrb[93].mxu0  ;;  %v2881_v13 = vadd.f32 %v3877_v49, %v2776_v6 }
 0x3e2   : > { %v3827_v4 = vadd.f32 %v3826_v3, %v3825_v61  ;;  %v3879_v42 = vpop.f32.mrb[91].mxu1 }
 0x3e3   : > { %v3880_v11 = vadd.f32 %v3879_v42, %v3878_v60 }
 0x3e4   : > { %v2786_v48 = vadd.f32 %v3827_v4, %v2681_v12  ;;  %v3828_v52 = vpop.f32.mrb[94].mxu0 }
 0x3e5   : > { %v3881_v63 = vpop.f32.mrb[92].mxu1  ;;  %v3829_v27 = vpop.f32.mrb[95].mxu0  ;;  %v2886_v17 = vadd.f32 %v3880_v11, %v2781_v62 }
 0x3e6   : > { %v3830_v14 = vadd.f32 %v3829_v27, %v3828_v52  ;;  %v3882_v39 = vpop.f32.mrb[93].mxu1 }
 0x3e7   : > { %v3883_v51 = vadd.f32 %v3882_v39, %v3881_v63 }
 0x3e8   : > { %v2791_v19 = vadd.f32 %v3830_v14, %v2686_v24  ;;  %v3831_v59 = vpop.f32.mrb[96].mxu0 }
 0x3e9   : > { %v3884_v8 = vpop.f32.mrb[94].mxu1  ;;  %v3832_v46 = vpop.f32.mrb[97].mxu0  ;;  %v2891_v10 = vadd.f32 %v3883_v51, %v2786_v48 }
 0x3ea   : > { %v3833_v23 = vadd.f32 %v3832_v46, %v3831_v59  ;;  %v3885_v18 = vpop.f32.mrb[95].mxu1 }
 0x3eb   : > { %v3886_v1 = vadd.f32 %v3885_v18, %v3884_v8 }
 0x3ec   : > { %v2796_v28 = vadd.f32 %v3833_v23, %v2691_v36  ;;  %v3834_v29 = vpop.f32.mrb[98].mxu0 }
 0x3ed   : > { %v3887_v33 = vpop.f32.mrb[96].mxu1  ;;  %v3835_v55 = vpop.f32.mrb[99].mxu0  ;;  %v2896_v12 = vadd.f32 %v3886_v1, %v2791_v19 }
 0x3ee   : > { %v3836_v34 = vadd.f32 %v3835_v55, %v3834_v29  ;;  %v3888_v26 = vpop.f32.mrb[97].mxu1 }
 0x3ef   : > { %v3889_v35 = vadd.f32 %v3888_v26, %v3887_v33 }
 0x3f0   : > { %v2801_v57 = vadd.f32 %v3836_v34, %v2696_v38  ;;  %v3837_v25 = vpop.f32.mrb[100].mxu0 }
 0x3f1   : > { %v3890_v44 = vpop.f32.mrb[98].mxu1  ;;  %v3838_v5 = vpop.f32.mrb[101].mxu0  ;;  %v2901_v24 = vadd.f32 %v3889_v35, %v2796_v28 }
 0x3f2   : > { %v3839_v40 = vadd.f32 %v3838_v5, %v3837_v25  ;;  %v3891_v32 = vpop.f32.mrb[99].mxu1 }
 0x3f3   : > { %v3892_v41 = vadd.f32 %v3891_v32, %v3890_v44 }
 0x3f4   : > { %v2806_v22 = vadd.f32 %v3839_v40, %v2701_v7  ;;  %v3840_v30 = vpop.f32.mrb[102].mxu0 }
 0x3f5   : > { %v3893_v47 = vpop.f32.mrb[100].mxu1  ;;  %v3841_v53 = vpop.f32.mrb[103].mxu0  ;;  %v2906_v36 = vadd.f32 %v3892_v41, %v2801_v57 }
 0x3f6   : > { %v3842_v31 = vadd.f32 %v3841_v53, %v3840_v30  ;;  %v3894_v54 = vpop.f32.mrb[101].mxu1 }
 0x3f7   : > { %v3895_v56 = vadd.f32 %v3894_v54, %v3893_v47 }
 0x3f8   : > { %v2811_v20 = vadd.f32 %v3842_v31, %v2706_v9 }
 0x3f9   : > { %v3896_v43 = vpop.f32.mrb[102].mxu1  ;;  %v2911_v37 = vadd.f32 %v3895_v56, %v2806_v22 }
 0x3fa   : > { %v4045_v21 = vpop.f32.mrb[104].mxu0  ;;  %v3897_v38 = vpop.f32.mrb[103].mxu1 }
 0x3fb   : > { %v2991_v50 = vadd.f32 %v4045_v21, %v2886_v17  ;;  %v3898_v58 = vadd.f32 %v3897_v38, %v3896_v43  ;;  %v2985_v6 = vpop.f32.mrb[105].mxu0 }
 0x3fc   : > { %v2986_v16 = vadd.f32 %v2985_v6, %v2881_v13 }
 0x3fd   : > { %4633 = vtanh.f32 %v2991_v50  ;;  %v4051_v45 = vpop.f32.mrb[104].mxu1  ;;  %v2916_v0 = vadd.f32 %v3898_v58, %v2811_v20 }
 0x3fe   : > { %4635 = vtanh.f32 %v2986_v16  ;;  %v4048_v7 = vpop.f32.mrb[106].mxu0  ;;  %v3011_v2 = vadd.f32 %v4051_v45, %v2906_v36  ;;  %v3005_v15 = vpop.f32.mrb[105].mxu1 }
 0x3ff   : > { %v3001_v49 = vadd.f32 %v4048_v7, %v2896_v12  ;;  %v2995_v62 = vpop.f32.mrb[107].mxu0  ;;  %v3006_v61 = vadd.f32 %v3005_v15, %v2901_v24 }
 0x400   : > { %4637 = vtanh.f32 %v3011_v2  ;;  %v2996_v9 = vadd.f32 %v2995_v62, %v2891_v10 }
 0x401   : > { %4639 = vtanh.f32 %v3001_v49  ;;  %v4054_v60 = vpop.f32.mrb[106].mxu1 }
 0x402   : > { %4641 = vtanh.f32 %v2996_v9  ;;  %v3021_v3 = vadd.f32 %v4054_v60, %v2916_v0  ;;  %v3015_v4 = vpop.f32.mrb[107].mxu1 }
 0x403   : > { %4643 = vtanh.f32 %v3006_v61  ;;  %v3016_v13 = vadd.f32 %v3015_v4, %v2911_v37 }
 0x404   : > { %4645 = vtanh.f32 %v3021_v3 }
 0x405   : > { %4647 = vtanh.f32 %v3016_v13 }
 0x407   : > { %v4634_v42 = vpop.eup %4633 }
 0x408   : > { %v4636_v11 = vpop.eup %4635  ;;  %3033 = vst [vmem:[%s286_s23 + $0x8] sm:$0xff] %v4634_v42 }
 0x409   : > { %3032 = vst [vmem:[%s286_s23] sm:$0xff] %v4636_v11 }
 0x40a   : > { %v4638_v48 = vpop.eup %4637 }
 0x40b   : > { %v4640_v52 = vpop.eup %4639  ;;  %3037 = vst [vmem:[%s286_s23 + $0x28] sm:$0xff] %v4638_v48 }
 0x40c   : > { %v4642_v63 = vpop.eup %4641  ;;  %3035 = vst [vmem:[%s286_s23 + $0x18] sm:$0xff] %v4640_v52 }
 0x40d   : > { %v4644_v27 = vpop.eup %4643  ;;  %3034 = vst [vmem:[%s286_s23 + $0x10] sm:$0xff] %v4642_v63 }
 0x40e   : > { %v4646_v17 = vpop.eup %4645  ;;  %3036 = vst [vmem:[%s286_s23 + $0x20] sm:$0xff] %v4644_v27 }
 0x40f   : > { %v4648_v14 = vpop.eup %4647  ;;  %3039 = vst [vmem:[%s286_s23 + $0x38] sm:$0xff] %v4646_v17 }
 0x410   : > { %3038 = vst [vmem:[%s286_s23 + $0x30] sm:$0xff] %v4648_v14 }
 0x411   : > { %4776 = shalt.err (!%p4773_p4)
}
 0x412   : > { %s4777_s8 = scalar_lea.hbm %s5484_s12, 1024  ;;  %s4781_s24 = scalar_lea.hbm %s5535_s5, 2048 }
 0x413   : > { %p4778_p9 = scmp.ne.s32.totalorder %s5484_s12, %s4777_s8  ;;  %p4782_p8 = scmp.lt.u32.totalorder %s5484_s12, %s5535_s5 }
 0x414   : > { %p4783_p13 = scmp.lt.u32.totalorder %s4781_s24, %s4777_s8  ;;  %p4785_p10 = scmp.lt.u32.totalorder %s4777_s8, %s5484_s12 }
 0x415   : > { %p4779_p0 = pnand %p4778_p9, %p5033_p5 }
 0x416   : > { %p4784_p6 = por %p4783_p13, %p4782_p8 }
 0x417   : > { %p4780_p11 = pneg %p4779_p0 }
 0x418   : > { %p4786_p3 = por %p4785_p10, %p4784_p6 }
 0x41a   : > { %p4787_p7 = pnand %p4786_p3, %p4780_p11 }
 0x41c   : > { %4790 = shalt.err (!%p4787_p7)
}
 0x41d   : > { %s4847_s27 = smov 128   ;;  %s4848_s16 = smov 8  }
 0x41e   : > { %4565 = dma.vmem_to_hbm [thread:$0]  (%p5033_p5), %s5486_s13, 1024, %s5484_s12, %s3041_s22, %s4847_s27, %s4847_s27, %s4848_s16  }
 0x41f PF: > { %s3069_s28 = sand.u32 1, %s4825_s18   ;;  %p5553_p12 = scmp.ne.s32.totalorder %s5540_s25, 0 }
 0x420   : > { %p5554_p1 = scmp.ge.s32.totalorder %s4837_s21, 2  ;;  %s3070_s9 = scalar_lea.sflag [#allocation6], %s3069_s28 }
 0x422   : > { %p4582_p2 = pnand %p5554_p1, %p5553_p12 }
 0x424   : > { %4820 = dma.done.wait (!%p4582_p2), %s3070_s9, 1024  }
 0x425   : > { %4822 = vsyncadd (!%p4582_p2), %s3070_s9, 4294966272  ;;  %p20_p4 = scmp.ge.s32.totalorder %s5019_s14, 4   ;;  %s5555_s18 = smov %s4829_s19 }
 0x426   : > { %s5556_s19 = smov %s4833_s20  ;;  %s5557_s20 = smov %s5029_s30 }
 0x427   : > { %s5558_s21 = smov %s5019_s14  ;;  %22 = sbr.rel (!%p20_p4) target bundleno = 7 (0x7), region = 100 }
 0x42e   :  { %3075 = vsyncpa [#allocation5], 1 }
 0x42f   :  { %3077 = vsyncpa [#allocation5 + $0x1], 1 }
 0x430   :  { %3078 = vsyncpa [#allocation8], 1 }
 0x431   :  { %3079 = vsyncpa [#allocation11], 1 }
 0x432   :  { %3080 = vsyncpa [#allocation6], 1 }
 0x433   :  { %3082 = vsyncpa [#allocation6 + $0x1], 1 }

</bundles_post_ra>
